<compile_context>
chip_gen: v7x
topology: tpu7x:2x2x1
jax: 0.10.0
libtpu: 0.0.40
codegen_flags: <defaults>
</compile_context>

<pallas_src>
import functools

import jax
import jax.numpy as jnp
from jax.experimental import pallas as pl
from jax.experimental.pallas import tpu as pltpu

EPS = 1e-5     # PyTorch BatchNorm2d default eps
LANE = 128     # TPU lane width
WPAD_L = 8     # left spatial pad inside scratch (sublane-aligned interior store)


def _round_up(v, m):
    return (v + m - 1) // m * m


# ---------------------------------------------------------------------------
# Fused Pallas kernel
# ---------------------------------------------------------------------------
def _bottleneck_kernel(x_ref, w1_ref, w2_ref, w3_ref,
                       g1_ref, b1_ref, g2_ref, b2_ref, g3_ref, b3_ref,
                       o_ref, xp_ref, *, n, h, w, eps):
    m = n * h * w
    inv_m = 1.0 / m

    def bn(y, g, b):
        # two-pass batch statistics (per channel, over all M rows), f32
        mu = jnp.sum(y, axis=0, keepdims=True) * inv_m
        d = y - mu
        var = jnp.sum(d * d, axis=0, keepdims=True) * inv_m
        scale = g * jax.lax.rsqrt(var + eps)
        return d * scale + b

    x_bf = x_ref[...]                                          # (M, Ci_p) bf16

    # ---- conv1 (1x1) + bn1 + relu -----------------------------------------
    y1 = jnp.dot(x_bf, w1_ref[...], preferred_element_type=jnp.float32)
    y1 = jnp.maximum(bn(y1, g1_ref[...], b1_ref[...]), 0.0)    # (M, Cm_p) f32
    cm = y1.shape[-1]
    wp = xp_ref.shape[2]

    # ---- fused spatial pad: halo-only zero fill, interior written once ----
    # scratch layout (n, h+2, wp, cm); valid data at rows 1..h,
    # cols WPAD_L..WPAD_L+w-1 (sublane-aligned store).
    zrow = jnp.zeros((n, 1, wp, cm), jnp.float32)
    xp_ref[:, 0:1, :, :] = zrow                                 # top halo row
    xp_ref[:, h + 1:h + 2, :, :] = zrow                         # bottom halo row
    zl = jnp.zeros((n, h, WPAD_L, cm), jnp.float32)
    xp_ref[:, 1:h + 1, 0:WPAD_L, :] = zl                        # left band
    zr = jnp.zeros((n, h, wp - (WPAD_L + w), cm), jnp.float32)
    xp_ref[:, 1:h + 1, WPAD_L + w:wp, :] = zr                   # right band
    xp_ref[:, 1:h + 1, WPAD_L:WPAD_L + w, :] = y1.reshape(n, h, w, cm)
    xp = xp_ref[...]

    # ---- conv2 (3x3, stride 1, pad 1): 9 shifted-window dots, f32 acc -----
    acc = jnp.zeros((m, cm), jnp.float32)
    for dy in range(3):
        for dx in range(3):
            tap = dy * 3 + dx
            win = xp[:, dy:dy + h, (WPAD_L - 1) + dx:(WPAD_L - 1) + dx + w, :]
            acc = acc + jnp.dot(
                win.reshape(m, cm).astype(jnp.bfloat16),
                w2_ref[tap * cm:(tap + 1) * cm, :],
                preferred_element_type=jnp.float32)
    y2 = jnp.maximum(bn(acc, g2_ref[...], b2_ref[...]), 0.0)    # (M, Cm_p) f32

    # ---- conv3 (1x1) + bn3 + residual + relu ------------------------------
    y3 = jnp.dot(y2.astype(jnp.bfloat16), w3_ref[...],
                 preferred_element_type=jnp.float32)
    y3 = bn(y3, g3_ref[...], b3_ref[...])
    o_ref[...] = jnp.maximum(y3 + x_bf.astype(jnp.float32), 0.0).astype(o_ref.dtype)


# ---------------------------------------------------------------------------
# Wrapper: weight prep, VMEM budgeting, pallas_call
# ---------------------------------------------------------------------------
def _prepare_params(params, Cin, planes, Cexp, Ci_p, Cm_p, Co_p):
    # conv1: (planes, Cin, 1, 1) -> (Ci_p, Cm_p) bf16
    w1 = jnp.transpose(params["w1"][:, :, 0, 0], (1, 0))
    w1 = jnp.pad(w1, ((0, Ci_p - Cin), (0, Cm_p - planes))).astype(jnp.bfloat16)
    # conv2: (planes, planes, 3, 3) -> tap-major (9*Cm_p, Cm_p) bf16
    w2 = jnp.transpose(params["w2"], (2, 3, 1, 0))              # (3,3,ci,co)
    w2 = jnp.pad(w2, ((0, 0), (0, 0), (0, Cm_p - planes), (0, Cm_p - planes)))
    w2 = w2.reshape(9 * Cm_p, Cm_p).astype(jnp.bfloat16)
    # conv3: (4*planes, planes, 1, 1) -> (Cm_p, Co_p) bf16
    w3 = jnp.transpose(params["w3"][:, :, 0, 0], (1, 0))
    w3 = jnp.pad(w3, ((0, Cm_p - planes), (0, Co_p - Cexp))).astype(jnp.bfloat16)

    def pad_vec(v, cp):
        return jnp.pad(v, (0, cp - v.shape[0])).reshape(1, cp).astype(jnp.float32)

    g1, b1 = pad_vec(params["g1"], Cm_p), pad_vec(params["b1"], Cm_p)
    g2, b2 = pad_vec(params["g2"], Cm_p), pad_vec(params["b2"], Cm_p)
    g3, b3 = pad_vec(params["g3"], Co_p), pad_vec(params["b3"], Co_p)
    return (w1, w2, w3, g1, b1, g2, b2, g3, b3)


def _vmem_estimate(M, N, H, W, Ci_p, Cm_p, Co_p):
    x_bytes = 2 * M * Ci_p                                       # bf16 input
    out_bytes = 4 * M * Co_p                                     # f32 output
    scratch = 4 * N * (H + 2) * (WPAD_L + W + 8) * Cm_p          # halo scratch
    weights = 2 * (Ci_p * Cm_p + 9 * Cm_p * Cm_p + Cm_p * Co_p) \
              + 4 * 2 * (2 * Cm_p + Co_p)
    values = 4 * M * (3 * Cm_p + 2 * Co_p)                       # live f32 values (rough)
    # inputs/outputs are double-buffered by the BlockSpec pipeline
    return 2 * x_bytes + 2 * out_bytes + scratch + 2 * weights + values


def bottleneck_forward(x_nchw, params, stride=1, eps=EPS):
    assert stride == 1, "TODO(synk): stride>1 / downsample path not implemented"
    N, Cin, H, W = x_nchw.shape
    planes = params["w1"].shape[0]
    Cexp = planes * 4
    assert Cin == Cexp, "identity residual requires inplanes == planes * expansion"

    Ci_p = _round_up(Cin, LANE)
    Cm_p = _round_up(planes, LANE)
    Co_p = _round_up(Cexp, LANE)
    assert Ci_p == Co_p
    M = N * H * W

    # NCHW -> NHWC -> (M, C) bf16, channel-padded to lane width
    x_nhwc = jnp.transpose(x_nchw, (0, 2, 3, 1)).reshape(M, Cin)
    x2d = jnp.pad(x_nhwc, ((0, 0), (0, Ci_p - Cin))).astype(jnp.bfloat16)

    weights = _prepare_params(params, Cin, planes, Cexp, Ci_p, Cm_p, Co_p)
    args = (x2d,) + weights
    kernel = functools.partial(_bottleneck_kernel, n=N, h=H, w=W, eps=eps)

    # --- VMEM budget: derive the limit from the working set, cap below the
    #     physical per-core VMEM (v7x has only 64 MiB; v5e/v6e have 128 MiB).
    try:
        phys_vmem = int(pltpu.get_tpu_info().vmem_capacity_bytes)
    except Exception:
        phys_vmem = 64 << 20          # conservative v7x per-core assumption
    cap = phys_vmem - (8 << 20)
    est = _vmem_estimate(M, N, H, W, Ci_p, Cm_p, Co_p)
    assert est <= cap, (
        "TODO(synk): fused working set exceeds VMEM; needs the M-tiled "
        "two-pass-BN pipeline (tile over images / H-row bands, 'parallel' axis)")
    vmem_limit = int(min(max(est + (8 << 20), 32 << 20), cap))

    flops = 2 * M * (Ci_p * Cm_p + 9 * Cm_p * Cm_p + Cm_p * Co_p)
    bytes_accessed = (2 * M * Ci_p + 4 * M * Co_p
                      + 2 * (Ci_p * Cm_p + 9 * Cm_p * Cm_p + Cm_p * Co_p)
                      + 4 * 2 * (2 * Cm_p + Co_p))

    out = pl.pallas_call(
        kernel,
        out_shape=jax.ShapeDtypeStruct((M, Co_p), jnp.float32),
        grid=(1,),
        in_specs=[pl.BlockSpec(a.shape, lambda i, nd=a.ndim: (0,) * nd)
                  for a in args],
        out_specs=pl.BlockSpec((M, Co_p), lambda i: (0, 0)),
        scratch_shapes=[pltpu.VMEM((N, H + 2, WPAD_L + W + 8, Cm_p), jnp.float32)],
        compiler_params=pltpu.CompilerParams(
            dimension_semantics=("arbitrary",),
            vmem_limit_bytes=vmem_limit),
        cost_estimate=pl.CostEstimate(
            flops=flops, transcendentals=2 * Cm_p + Co_p,
            bytes_accessed=bytes_accessed),
    )(*args)

    out = out[:, :Cexp].reshape(N, H, W, Cexp)
    return jnp.transpose(out, (0, 3, 1, 2))                      # back to NCHW


# ---------------------------------------------------------------------------
# Pure-JAX reference (f32, HIGHEST precision) — sanity check of the lowering
# ---------------------------------------------------------------------------
def _ref_bn(y, g, b, eps=EPS):
    mu = y.mean(axis=(0, 2, 3), keepdims=True)
    var = ((y - mu) ** 2).mean(axis=(0, 2, 3), keepdims=True)
    return (y - mu) * jax.lax.rsqrt(var + eps) * g.reshape(1, -1, 1, 1) \
        + b.reshape(1, -1, 1, 1)


def ref_forward(x, p, stride=1):
    conv = functools.partial(
        jax.lax.conv_general_dilated,
        dimension_numbers=("NCHW", "OIHW", "NCHW"),
        precision=jax.lax.Precision.HIGHEST,
    )
    out = conv(x, p["w1"], (1, 1), "VALID")
    out = jnp.maximum(_ref_bn(out, p["g1"], p["b1"]), 0.0)
    out = conv(out, p["w2"], (stride, stride), [(1, 1), (1, 1)])
    out = jnp.maximum(_ref_bn(out, p["g2"], p["b2"]), 0.0)
    out = conv(out, p["w3"], (1, 1), "VALID")
    out = _ref_bn(out, p["g3"], p["b3"])
    out = out + x
    return jnp.maximum(out, 0.0)


# ---------------------------------------------------------------------------
if __name__ == "__main__":
    N, planes, H, W = 2, 8, 16, 16
    inplanes = planes * 4                 # identity residual path
    stride = 1

    key = jax.random.PRNGKey(0)
    ks = jax.random.split(key, 10)
    params = {
        "w1": 0.1 * jax.random.normal(ks[0], (planes, inplanes, 1, 1), jnp.float32),
        "w2": 0.1 * jax.random.normal(ks[1], (planes, planes, 3, 3), jnp.float32),
        "w3": 0.1 * jax.random.normal(ks[2], (planes * 4, planes, 1, 1), jnp.float32),
        "g1": 1.0 + 0.1 * jax.random.normal(ks[3], (planes,), jnp.float32),
        "b1": 0.1 * jax.random.normal(ks[4], (planes,), jnp.float32),
        "g2": 1.0 + 0.1 * jax.random.normal(ks[5], (planes,), jnp.float32),
        "b2": 0.1 * jax.random.normal(ks[6], (planes,), jnp.float32),
        "g3": 1.0 + 0.1 * jax.random.normal(ks[7], (planes * 4,), jnp.float32),
        "b3": 0.1 * jax.random.normal(ks[8], (planes * 4,), jnp.float32),
    }
    x = jax.random.normal(ks[9], (N, inplanes, H, W), jnp.float32)

    out = bottleneck_forward(x, params, stride=stride)
    out = jax.block_until_ready(out)

    ref = jax.block_until_ready(ref_forward(x, params, stride=stride))
    assert out.shape == (N, planes * 4, H, W)
    # bf16 MXU operands vs f32 HIGHEST reference -> loose tolerance
    assert jnp.allclose(out, ref, atol=5e-2, rtol=5e-2), (
        f"max abs diff {jnp.max(jnp.abs(out - ref))}"
    )
    print("KERNEL_OK")
</pallas_src>

<mosaic_0001>
module attributes {stable_mosaic.version = 11 : i64} {
  func.func @_bottleneck_kernel(%arg0: i32, %arg1: memref<512x128xbf16, #tpu.memory_space<vmem>>, %arg2: memref<128x128xbf16, #tpu.memory_space<vmem>>, %arg3: memref<1152x128xbf16, #tpu.memory_space<vmem>>, %arg4: memref<128x128xbf16, #tpu.memory_space<vmem>>, %arg5: memref<1x128xf32, #tpu.memory_space<vmem>>, %arg6: memref<1x128xf32, #tpu.memory_space<vmem>>, %arg7: memref<1x128xf32, #tpu.memory_space<vmem>>, %arg8: memref<1x128xf32, #tpu.memory_space<vmem>>, %arg9: memref<1x128xf32, #tpu.memory_space<vmem>>, %arg10: memref<1x128xf32, #tpu.memory_space<vmem>>, %arg11: memref<512x128xf32, #tpu.memory_space<vmem>>, %arg12: memref<2x18x32x128xf32, #tpu.memory_space<vmem>>) attributes {dimension_semantics = [#tpu.dimension_semantics<arbitrary>], iteration_bounds = array<i64: 1>, scalar_prefetch = 0 : i64, scratch_operands = 1 : i64, tpu.core_type = #tpu.core_type<tc>, window_params = [{pipeline_mode = #tpu.pipeline_mode<synchronous>, transform_indices = @transform_0, window_bounds = array<i64: 512, 128>}, {pipeline_mode = #tpu.pipeline_mode<synchronous>, transform_indices = @transform_1, window_bounds = array<i64: 128, 128>}, {pipeline_mode = #tpu.pipeline_mode<synchronous>, transform_indices = @transform_2, window_bounds = array<i64: 1152, 128>}, {pipeline_mode = #tpu.pipeline_mode<synchronous>, transform_indices = @transform_3, window_bounds = array<i64: 128, 128>}, {pipeline_mode = #tpu.pipeline_mode<synchronous>, transform_indices = @transform_4, window_bounds = array<i64: 1, 128>}, {pipeline_mode = #tpu.pipeline_mode<synchronous>, transform_indices = @transform_5, window_bounds = array<i64: 1, 128>}, {pipeline_mode = #tpu.pipeline_mode<synchronous>, transform_indices = @transform_6, window_bounds = array<i64: 1, 128>}, {pipeline_mode = #tpu.pipeline_mode<synchronous>, transform_indices = @transform_7, window_bounds = array<i64: 1, 128>}, {pipeline_mode = #tpu.pipeline_mode<synchronous>, transform_indices = @transform_8, window_bounds = array<i64: 1, 128>}, {pipeline_mode = #tpu.pipeline_mode<synchronous>, transform_indices = @transform_9, window_bounds = array<i64: 1, 128>}, {pipeline_mode = #tpu.pipeline_mode<synchronous>, transform_indices = @transform_10, window_bounds = array<i64: 512, 128>}]} {
    %c0 = arith.constant 0 : index
    %c0_0 = arith.constant 0 : index
    %0 = vector.load %arg1[%c0, %c0_0] : memref<512x128xbf16, #tpu.memory_space<vmem>>, vector<512x128xbf16>
    %c0_1 = arith.constant 0 : index
    %c0_2 = arith.constant 0 : index
    %1 = vector.load %arg2[%c0_1, %c0_2] : memref<128x128xbf16, #tpu.memory_space<vmem>>, vector<128x128xbf16>
    %cst = arith.constant dense<0.000000e+00> : vector<512x128xf32>
    %2 = tpu.matmul %0, %1, %cst {dimension_numbers = #tpu.dot_dimension_numbers<[1], [0], [0], [1], [0, 0, 1, 1], [], []>} : vector<512x128xbf16>, vector<128x128xbf16>, vector<512x128xf32> -> vector<512x128xf32>
    %c0_3 = arith.constant 0 : index
    %c0_4 = arith.constant 0 : index
    %3 = vector.load %arg5[%c0_3, %c0_4] : memref<1x128xf32, #tpu.memory_space<vmem>>, vector<1x128xf32>
    %c0_5 = arith.constant 0 : index
    %c0_6 = arith.constant 0 : index
    %4 = vector.load %arg6[%c0_5, %c0_6] : memref<1x128xf32, #tpu.memory_space<vmem>>, vector<1x128xf32>
    %cst_7 = arith.constant dense<0.000000e+00> : vector<128xf32>
    %5 = vector.multi_reduction <add>, %2, %cst_7 [0] : vector<512x128xf32> to vector<128xf32>
    %6 = vector.shape_cast %5 : vector<128xf32> to vector<1x128xf32>
    %cst_8 = arith.constant 0.001953125 : f32
    %7 = vector.broadcast %cst_8 : f32 to vector<1x128xf32>
    %8 = arith.mulf %6, %7 : vector<1x128xf32>
    %9 = vector.broadcast %8 : vector<1x128xf32> to vector<512x128xf32>
    %10 = arith.subf %2, %9 : vector<512x128xf32>
    %11 = arith.mulf %10, %10 : vector<512x128xf32>
    %cst_9 = arith.constant dense<0.000000e+00> : vector<128xf32>
    %12 = vector.multi_reduction <add>, %11, %cst_9 [0] : vector<512x128xf32> to vector<128xf32>
    %13 = vector.shape_cast %12 : vector<128xf32> to vector<1x128xf32>
    %cst_10 = arith.constant 0.001953125 : f32
    %14 = vector.broadcast %cst_10 : f32 to vector<1x128xf32>
    %15 = arith.mulf %13, %14 : vector<1x128xf32>
    %cst_11 = arith.constant 9.99999974E-6 : f32
    %16 = vector.broadcast %cst_11 : f32 to vector<1x128xf32>
    %17 = arith.addf %15, %16 : vector<1x128xf32>
    %18 = math.rsqrt %17 : vector<1x128xf32>
    %19 = arith.mulf %3, %18 : vector<1x128xf32>
    %20 = vector.broadcast %19 : vector<1x128xf32> to vector<512x128xf32>
    %21 = arith.mulf %10, %20 : vector<512x128xf32>
    %22 = vector.broadcast %4 : vector<1x128xf32> to vector<512x128xf32>
    %23 = arith.addf %21, %22 : vector<512x128xf32>
    %cst_12 = arith.constant 0.000000e+00 : f32
    %24 = vector.broadcast %cst_12 : f32 to vector<512x128xf32>
    %25 = arith.maximumf %23, %24 : vector<512x128xf32>
    %cst_13 = arith.constant 0.000000e+00 : f32
    %26 = vector.broadcast %cst_13 : f32 to vector<2x1x32x128xf32>
    %c0_14 = arith.constant 0 : index
    %c0_15 = arith.constant 0 : index
    %c0_16 = arith.constant 0 : index
    %c0_17 = arith.constant 0 : index
    %27 = vector.load %arg12[%c0_14, %c0_15, %c0_16, %c0_17] : memref<2x18x32x128xf32, #tpu.memory_space<vmem>>, vector<2x1x32x128xf32>
    tpu.vector_store %arg12[%c0_14, %c0_15, %c0_16, %c0_17], %26 {strides = array<i32>} : memref<2x18x32x128xf32, #tpu.memory_space<vmem>>, vector<2x1x32x128xf32>,
    %c0_18 = arith.constant 0 : index
    %c17 = arith.constant 17 : index
    %c0_19 = arith.constant 0 : index
    %c0_20 = arith.constant 0 : index
    %28 = vector.load %arg12[%c0_18, %c17, %c0_19, %c0_20] : memref<2x18x32x128xf32, #tpu.memory_space<vmem>>, vector<2x1x32x128xf32>
    tpu.vector_store %arg12[%c0_18, %c17, %c0_19, %c0_20], %26 {strides = array<i32>} : memref<2x18x32x128xf32, #tpu.memory_space<vmem>>, vector<2x1x32x128xf32>,
    %cst_21 = arith.constant 0.000000e+00 : f32
    %29 = vector.broadcast %cst_21 : f32 to vector<2x16x8x128xf32>
    %c0_22 = arith.constant 0 : index
    %c1 = arith.constant 1 : index
    %c0_23 = arith.constant 0 : index
    %c0_24 = arith.constant 0 : index
    %30 = vector.load %arg12[%c0_22, %c1, %c0_23, %c0_24] : memref<2x18x32x128xf32, #tpu.memory_space<vmem>>, vector<2x16x8x128xf32>
    tpu.vector_store %arg12[%c0_22, %c1, %c0_23, %c0_24], %29 {strides = array<i32>} : memref<2x18x32x128xf32, #tpu.memory_space<vmem>>, vector<2x16x8x128xf32>,
    %cst_25 = arith.constant 0.000000e+00 : f32
    %31 = vector.broadcast %cst_25 : f32 to vector<2x16x8x128xf32>
    %c0_26 = arith.constant 0 : index
    %c1_27 = arith.constant 1 : index
    %c24 = arith.constant 24 : index
    %c0_28 = arith.constant 0 : index
    %32 = vector.load %arg12[%c0_26, %c1_27, %c24, %c0_28] : memref<2x18x32x128xf32, #tpu.memory_space<vmem>>, vector<2x16x8x128xf32>
    tpu.vector_store %arg12[%c0_26, %c1_27, %c24, %c0_28], %31 {strides = array<i32>} : memref<2x18x32x128xf32, #tpu.memory_space<vmem>>, vector<2x16x8x128xf32>,
    %33 = vector.shape_cast %25 : vector<512x128xf32> to vector<2x16x16x128xf32>
    %c0_29 = arith.constant 0 : index
    %c1_30 = arith.constant 1 : index
    %c8 = arith.constant 8 : index
    %c0_31 = arith.constant 0 : index
    %34 = vector.load %arg12[%c0_29, %c1_30, %c8, %c0_31] : memref<2x18x32x128xf32, #tpu.memory_space<vmem>>, vector<2x16x16x128xf32>
    tpu.vector_store %arg12[%c0_29, %c1_30, %c8, %c0_31], %33 {strides = array<i32>} : memref<2x18x32x128xf32, #tpu.memory_space<vmem>>, vector<2x16x16x128xf32>,
    %c0_32 = arith.constant 0 : index
    %c0_33 = arith.constant 0 : index
    %c0_34 = arith.constant 0 : index
    %c0_35 = arith.constant 0 : index
    %35 = vector.load %arg12[%c0_32, %c0_33, %c0_34, %c0_35] : memref<2x18x32x128xf32, #tpu.memory_space<vmem>>, vector<2x18x32x128xf32>
    %cst_36 = arith.constant 0.000000e+00 : f32
    %36 = vector.broadcast %cst_36 : f32 to vector<512x128xf32>
    %37 = vector.extract_strided_slice %35 {offsets = [0, 0, 7, 0], sizes = [2, 16, 16, 128], strides = [1, 1, 1, 1]} : vector<2x18x32x128xf32> to vector<2x16x16x128xf32>
    %38 = vector.shape_cast %37 : vector<2x16x16x128xf32> to vector<512x128xf32>
    %39 = arith.truncf %38 : vector<512x128xf32> to vector<512x128xbf16>
    %c0_37 = arith.constant 0 : index
    %c0_38 = arith.constant 0 : index
    %40 = vector.load %arg3[%c0_37, %c0_38] : memref<1152x128xbf16, #tpu.memory_space<vmem>>, vector<128x128xbf16>
    %cst_39 = arith.constant dense<0.000000e+00> : vector<512x128xf32>
    %41 = tpu.matmul %39, %40, %cst_39 {dimension_numbers = #tpu.dot_dimension_numbers<[1], [0], [0], [1], [0, 0, 1, 1], [], []>} : vector<512x128xbf16>, vector<128x128xbf16>, vector<512x128xf32> -> vector<512x128xf32>
    %42 = arith.addf %36, %41 : vector<512x128xf32>
    %43 = vector.extract_strided_slice %35 {offsets = [0, 0, 8, 0], sizes = [2, 16, 16, 128], strides = [1, 1, 1, 1]} : vector<2x18x32x128xf32> to vector<2x16x16x128xf32>
    %44 = vector.shape_cast %43 : vector<2x16x16x128xf32> to vector<512x128xf32>
    %45 = arith.truncf %44 : vector<512x128xf32> to vector<512x128xbf16>
    %c128 = arith.constant 128 : index
    %c0_40 = arith.constant 0 : index
    %46 = vector.load %arg3[%c128, %c0_40] : memref<1152x128xbf16, #tpu.memory_space<vmem>>, vector<128x128xbf16>
    %cst_41 = arith.constant dense<0.000000e+00> : vector<512x128xf32>
    %47 = tpu.matmul %45, %46, %cst_41 {dimension_numbers = #tpu.dot_dimension_numbers<[1], [0], [0], [1], [0, 0, 1, 1], [], []>} : vector<512x128xbf16>, vector<128x128xbf16>, vector<512x128xf32> -> vector<512x128xf32>
    %48 = arith.addf %42, %47 : vector<512x128xf32>
    %49 = vector.extract_strided_slice %35 {offsets = [0, 0, 9, 0], sizes = [2, 16, 16, 128], strides = [1, 1, 1, 1]} : vector<2x18x32x128xf32> to vector<2x16x16x128xf32>
    %50 = vector.shape_cast %49 : vector<2x16x16x128xf32> to vector<512x128xf32>
    %51 = arith.truncf %50 : vector<512x128xf32> to vector<512x128xbf16>
    %c256 = arith.constant 256 : index
    %c0_42 = arith.constant 0 : index
    %52 = vector.load %arg3[%c256, %c0_42] : memref<1152x128xbf16, #tpu.memory_space<vmem>>, vector<128x128xbf16>
    %cst_43 = arith.constant dense<0.000000e+00> : vector<512x128xf32>
    %53 = tpu.matmul %51, %52, %cst_43 {dimension_numbers = #tpu.dot_dimension_numbers<[1], [0], [0], [1], [0, 0, 1, 1], [], []>} : vector<512x128xbf16>, vector<128x128xbf16>, vector<512x128xf32> -> vector<512x128xf32>
    %54 = arith.addf %48, %53 : vector<512x128xf32>
    %55 = vector.extract_strided_slice %35 {offsets = [0, 1, 7, 0], sizes = [2, 16, 16, 128], strides = [1, 1, 1, 1]} : vector<2x18x32x128xf32> to vector<2x16x16x128xf32>
    %56 = vector.shape_cast %55 : vector<2x16x16x128xf32> to vector<512x128xf32>
    %57 = arith.truncf %56 : vector<512x128xf32> to vector<512x128xbf16>
    %c384 = arith.constant 384 : index
    %c0_44 = arith.constant 0 : index
    %58 = vector.load %arg3[%c384, %c0_44] : memref<1152x128xbf16, #tpu.memory_space<vmem>>, vector<128x128xbf16>
    %cst_45 = arith.constant dense<0.000000e+00> : vector<512x128xf32>
    %59 = tpu.matmul %57, %58, %cst_45 {dimension_numbers = #tpu.dot_dimension_numbers<[1], [0], [0], [1], [0, 0, 1, 1], [], []>} : vector<512x128xbf16>, vector<128x128xbf16>, vector<512x128xf32> -> vector<512x128xf32>
    %60 = arith.addf %54, %59 : vector<512x128xf32>
    %61 = vector.extract_strided_slice %35 {offsets = [0, 1, 8, 0], sizes = [2, 16, 16, 128], strides = [1, 1, 1, 1]} : vector<2x18x32x128xf32> to vector<2x16x16x128xf32>
    %62 = vector.shape_cast %61 : vector<2x16x16x128xf32> to vector<512x128xf32>
    %63 = arith.truncf %62 : vector<512x128xf32> to vector<512x128xbf16>
    %c512 = arith.constant 512 : index
    %c0_46 = arith.constant 0 : index
    %64 = vector.load %arg3[%c512, %c0_46] : memref<1152x128xbf16, #tpu.memory_space<vmem>>, vector<128x128xbf16>
    %cst_47 = arith.constant dense<0.000000e+00> : vector<512x128xf32>
    %65 = tpu.matmul %63, %64, %cst_47 {dimension_numbers = #tpu.dot_dimension_numbers<[1], [0], [0], [1], [0, 0, 1, 1], [], []>} : vector<512x128xbf16>, vector<128x128xbf16>, vector<512x128xf32> -> vector<512x128xf32>
    %66 = arith.addf %60, %65 : vector<512x128xf32>
    %67 = vector.extract_strided_slice %35 {offsets = [0, 1, 9, 0], sizes = [2, 16, 16, 128], strides = [1, 1, 1, 1]} : vector<2x18x32x128xf32> to vector<2x16x16x128xf32>
    %68 = vector.shape_cast %67 : vector<2x16x16x128xf32> to vector<512x128xf32>
    %69 = arith.truncf %68 : vector<512x128xf32> to vector<512x128xbf16>
    %c640 = arith.constant 640 : index
    %c0_48 = arith.constant 0 : index
    %70 = vector.load %arg3[%c640, %c0_48] : memref<1152x128xbf16, #tpu.memory_space<vmem>>, vector<128x128xbf16>
    %cst_49 = arith.constant dense<0.000000e+00> : vector<512x128xf32>
    %71 = tpu.matmul %69, %70, %cst_49 {dimension_numbers = #tpu.dot_dimension_numbers<[1], [0], [0], [1], [0, 0, 1, 1], [], []>} : vector<512x128xbf16>, vector<128x128xbf16>, vector<512x128xf32> -> vector<512x128xf32>
    %72 = arith.addf %66, %71 : vector<512x128xf32>
    %73 = vector.extract_strided_slice %35 {offsets = [0, 2, 7, 0], sizes = [2, 16, 16, 128], strides = [1, 1, 1, 1]} : vector<2x18x32x128xf32> to vector<2x16x16x128xf32>
    %74 = vector.shape_cast %73 : vector<2x16x16x128xf32> to vector<512x128xf32>
    %75 = arith.truncf %74 : vector<512x128xf32> to vector<512x128xbf16>
    %c768 = arith.constant 768 : index
    %c0_50 = arith.constant 0 : index
    %76 = vector.load %arg3[%c768, %c0_50] : memref<1152x128xbf16, #tpu.memory_space<vmem>>, vector<128x128xbf16>
    %cst_51 = arith.constant dense<0.000000e+00> : vector<512x128xf32>
    %77 = tpu.matmul %75, %76, %cst_51 {dimension_numbers = #tpu.dot_dimension_numbers<[1], [0], [0], [1], [0, 0, 1, 1], [], []>} : vector<512x128xbf16>, vector<128x128xbf16>, vector<512x128xf32> -> vector<512x128xf32>
    %78 = arith.addf %72, %77 : vector<512x128xf32>
    %79 = vector.extract_strided_slice %35 {offsets = [0, 2, 8, 0], sizes = [2, 16, 16, 128], strides = [1, 1, 1, 1]} : vector<2x18x32x128xf32> to vector<2x16x16x128xf32>
    %80 = vector.shape_cast %79 : vector<2x16x16x128xf32> to vector<512x128xf32>
    %81 = arith.truncf %80 : vector<512x128xf32> to vector<512x128xbf16>
    %c896 = arith.constant 896 : index
    %c0_52 = arith.constant 0 : index
    %82 = vector.load %arg3[%c896, %c0_52] : memref<1152x128xbf16, #tpu.memory_space<vmem>>, vector<128x128xbf16>
    %cst_53 = arith.constant dense<0.000000e+00> : vector<512x128xf32>
    %83 = tpu.matmul %81, %82, %cst_53 {dimension_numbers = #tpu.dot_dimension_numbers<[1], [0], [0], [1], [0, 0, 1, 1], [], []>} : vector<512x128xbf16>, vector<128x128xbf16>, vector<512x128xf32> -> vector<512x128xf32>
    %84 = arith.addf %78, %83 : vector<512x128xf32>
    %85 = vector.extract_strided_slice %35 {offsets = [0, 2, 9, 0], sizes = [2, 16, 16, 128], strides = [1, 1, 1, 1]} : vector<2x18x32x128xf32> to vector<2x16x16x128xf32>
    %86 = vector.shape_cast %85 : vector<2x16x16x128xf32> to vector<512x128xf32>
    %87 = arith.truncf %86 : vector<512x128xf32> to vector<512x128xbf16>
    %c1024 = arith.constant 1024 : index
    %c0_54 = arith.constant 0 : index
    %88 = vector.load %arg3[%c1024, %c0_54] : memref<1152x128xbf16, #tpu.memory_space<vmem>>, vector<128x128xbf16>
    %cst_55 = arith.constant dense<0.000000e+00> : vector<512x128xf32>
    %89 = tpu.matmul %87, %88, %cst_55 {dimension_numbers = #tpu.dot_dimension_numbers<[1], [0], [0], [1], [0, 0, 1, 1], [], []>} : vector<512x128xbf16>, vector<128x128xbf16>, vector<512x128xf32> -> vector<512x128xf32>
    %90 = arith.addf %84, %89 : vector<512x128xf32>
    %c0_56 = arith.constant 0 : index
    %c0_57 = arith.constant 0 : index
    %91 = vector.load %arg7[%c0_56, %c0_57] : memref<1x128xf32, #tpu.memory_space<vmem>>, vector<1x128xf32>
    %c0_58 = arith.constant 0 : index
    %c0_59 = arith.constant 0 : index
    %92 = vector.load %arg8[%c0_58, %c0_59] : memref<1x128xf32, #tpu.memory_space<vmem>>, vector<1x128xf32>
    %cst_60 = arith.constant dense<0.000000e+00> : vector<128xf32>
    %93 = vector.multi_reduction <add>, %90, %cst_60 [0] : vector<512x128xf32> to vector<128xf32>
    %94 = vector.shape_cast %93 : vector<128xf32> to vector<1x128xf32>
    %cst_61 = arith.constant 0.001953125 : f32
    %95 = vector.broadcast %cst_61 : f32 to vector<1x128xf32>
    %96 = arith.mulf %94, %95 : vector<1x128xf32>
    %97 = vector.broadcast %96 : vector<1x128xf32> to vector<512x128xf32>
    %98 = arith.subf %90, %97 : vector<512x128xf32>
    %99 = arith.mulf %98, %98 : vector<512x128xf32>
    %cst_62 = arith.constant dense<0.000000e+00> : vector<128xf32>
    %100 = vector.multi_reduction <add>, %99, %cst_62 [0] : vector<512x128xf32> to vector<128xf32>
    %101 = vector.shape_cast %100 : vector<128xf32> to vector<1x128xf32>
    %cst_63 = arith.constant 0.001953125 : f32
    %102 = vector.broadcast %cst_63 : f32 to vector<1x128xf32>
    %103 = arith.mulf %101, %102 : vector<1x128xf32>
    %cst_64 = arith.constant 9.99999974E-6 : f32
    %104 = vector.broadcast %cst_64 : f32 to vector<1x128xf32>
    %105 = arith.addf %103, %104 : vector<1x128xf32>
    %106 = math.rsqrt %105 : vector<1x128xf32>
    %107 = arith.mulf %91, %106 : vector<1x128xf32>
    %108 = vector.broadcast %107 : vector<1x128xf32> to vector<512x128xf32>
    %109 = arith.mulf %98, %108 : vector<512x128xf32>
    %110 = vector.broadcast %92 : vector<1x128xf32> to vector<512x128xf32>
    %111 = arith.addf %109, %110 : vector<512x128xf32>
    %cst_65 = arith.constant 0.000000e+00 : f32
    %112 = vector.broadcast %cst_65 : f32 to vector<512x128xf32>
    %113 = arith.maximumf %111, %112 : vector<512x128xf32>
    %114 = arith.truncf %113 : vector<512x128xf32> to vector<512x128xbf16>
    %c0_66 = arith.constant 0 : index
    %c0_67 = arith.constant 0 : index
    %115 = vector.load %arg4[%c0_66, %c0_67] : memref<128x128xbf16, #tpu.memory_space<vmem>>, vector<128x128xbf16>
    %cst_68 = arith.constant dense<0.000000e+00> : vector<512x128xf32>
    %116 = tpu.matmul %114, %115, %cst_68 {dimension_numbers = #tpu.dot_dimension_numbers<[1], [0], [0], [1], [0, 0, 1, 1], [], []>} : vector<512x128xbf16>, vector<128x128xbf16>, vector<512x128xf32> -> vector<512x128xf32>
    %c0_69 = arith.constant 0 : index
    %c0_70 = arith.constant 0 : index
    %117 = vector.load %arg9[%c0_69, %c0_70] : memref<1x128xf32, #tpu.memory_space<vmem>>, vector<1x128xf32>
    %c0_71 = arith.constant 0 : index
    %c0_72 = arith.constant 0 : index
    %118 = vector.load %arg10[%c0_71, %c0_72] : memref<1x128xf32, #tpu.memory_space<vmem>>, vector<1x128xf32>
    %cst_73 = arith.constant dense<0.000000e+00> : vector<128xf32>
    %119 = vector.multi_reduction <add>, %116, %cst_73 [0] : vector<512x128xf32> to vector<128xf32>
    %120 = vector.shape_cast %119 : vector<128xf32> to vector<1x128xf32>
    %cst_74 = arith.constant 0.001953125 : f32
    %121 = vector.broadcast %cst_74 : f32 to vector<1x128xf32>
    %122 = arith.mulf %120, %121 : vector<1x128xf32>
    %123 = vector.broadcast %122 : vector<1x128xf32> to vector<512x128xf32>
    %124 = arith.subf %116, %123 : vector<512x128xf32>
    %125 = arith.mulf %124, %124 : vector<512x128xf32>
    %cst_75 = arith.constant dense<0.000000e+00> : vector<128xf32>
    %126 = vector.multi_reduction <add>, %125, %cst_75 [0] : vector<512x128xf32> to vector<128xf32>
    %127 = vector.shape_cast %126 : vector<128xf32> to vector<1x128xf32>
    %cst_76 = arith.constant 0.001953125 : f32
    %128 = vector.broadcast %cst_76 : f32 to vector<1x128xf32>
    %129 = arith.mulf %127, %128 : vector<1x128xf32>
    %cst_77 = arith.constant 9.99999974E-6 : f32
    %130 = vector.broadcast %cst_77 : f32 to vector<1x128xf32>
    %131 = arith.addf %129, %130 : vector<1x128xf32>
    %132 = math.rsqrt %131 : vector<1x128xf32>
    %133 = arith.mulf %117, %132 : vector<1x128xf32>
    %134 = vector.broadcast %133 : vector<1x128xf32> to vector<512x128xf32>
    %135 = arith.mulf %124, %134 : vector<512x128xf32>
    %136 = vector.broadcast %118 : vector<1x128xf32> to vector<512x128xf32>
    %137 = arith.addf %135, %136 : vector<512x128xf32>
    %138 = arith.extf %0 : vector<512x128xbf16> to vector<512x128xf32>
    %139 = arith.addf %137, %138 : vector<512x128xf32>
    %cst_78 = arith.constant 0.000000e+00 : f32
    %140 = vector.broadcast %cst_78 : f32 to vector<512x128xf32>
    %141 = arith.maximumf %139, %140 : vector<512x128xf32>
    %c0_79 = arith.constant 0 : index
    %c0_80 = arith.constant 0 : index
    %142 = vector.load %arg11[%c0_79, %c0_80] : memref<512x128xf32, #tpu.memory_space<vmem>>, vector<512x128xf32>
    tpu.vector_store %arg11[%c0_79, %c0_80], %141 {strides = array<i32>} : memref<512x128xf32, #tpu.memory_space<vmem>>, vector<512x128xf32>,
    return
  }
  func.func @transform_0(%arg0: i32) -> (i32, i32) {
    %c0_i32 = arith.constant 0 : i32
    %c0_i32_0 = arith.constant 0 : i32
    %c0_i32_1 = arith.constant 0 : i32
    return %c0_i32, %c0_i32_0 : i32, i32
  }
  func.func @transform_1(%arg0: i32) -> (i32, i32) {
    %c0_i32 = arith.constant 0 : i32
    %c0_i32_0 = arith.constant 0 : i32
    %c0_i32_1 = arith.constant 0 : i32
    return %c0_i32, %c0_i32_0 : i32, i32
  }
  func.func @transform_2(%arg0: i32) -> (i32, i32) {
    %c0_i32 = arith.constant 0 : i32
    %c0_i32_0 = arith.constant 0 : i32
    %c0_i32_1 = arith.constant 0 : i32
    return %c0_i32, %c0_i32_0 : i32, i32
  }
  func.func @transform_3(%arg0: i32) -> (i32, i32) {
    %c0_i32 = arith.constant 0 : i32
    %c0_i32_0 = arith.constant 0 : i32
    %c0_i32_1 = arith.constant 0 : i32
    return %c0_i32, %c0_i32_0 : i32, i32
  }
  func.func @transform_4(%arg0: i32) -> (i32, i32) {
    %c0_i32 = arith.constant 0 : i32
    %c0_i32_0 = arith.constant 0 : i32
    %c0_i32_1 = arith.constant 0 : i32
    return %c0_i32, %c0_i32_0 : i32, i32
  }
  func.func @transform_5(%arg0: i32) -> (i32, i32) {
    %c0_i32 = arith.constant 0 : i32
    %c0_i32_0 = arith.constant 0 : i32
    %c0_i32_1 = arith.constant 0 : i32
    return %c0_i32, %c0_i32_0 : i32, i32
  }
  func.func @transform_6(%arg0: i32) -> (i32, i32) {
    %c0_i32 = arith.constant 0 : i32
    %c0_i32_0 = arith.constant 0 : i32
    %c0_i32_1 = arith.constant 0 : i32
    return %c0_i32, %c0_i32_0 : i32, i32
  }
  func.func @transform_7(%arg0: i32) -> (i32, i32) {
    %c0_i32 = arith.constant 0 : i32
    %c0_i32_0 = arith.constant 0 : i32
    %c0_i32_1 = arith.constant 0 : i32
    return %c0_i32, %c0_i32_0 : i32, i32
  }
  func.func @transform_8(%arg0: i32) -> (i32, i32) {
    %c0_i32 = arith.constant 0 : i32
    %c0_i32_0 = arith.constant 0 : i32
    %c0_i32_1 = arith.constant 0 : i32
    return %c0_i32, %c0_i32_0 : i32, i32
  }
  func.func @transform_9(%arg0: i32) -> (i32, i32) {
    %c0_i32 = arith.constant 0 : i32
    %c0_i32_0 = arith.constant 0 : i32
    %c0_i32_1 = arith.constant 0 : i32
    return %c0_i32, %c0_i32_0 : i32, i32
  }
  func.func @transform_10(%arg0: i32) -> (i32, i32) {
    %c0_i32 = arith.constant 0 : i32
    %c0_i32_0 = arith.constant 0 : i32
    %c0_i32_1 = arith.constant 0 : i32
    return %c0_i32, %c0_i32_0 : i32, i32
  }
}

</mosaic_0001>

<bundles_post_ra>
// kernel: tpu_custom_call.1
= control target key start
LH: loop header
LB: loop body
LE: loop exit
PB: predicated region body
PF: predicated region fallthrough
CT: control target
= control target key end

     0   :  { %15 = vsyncpa [#allocation4], 0  ;;  %s14678_s0 = inlined_call_operand.hbm [shape: bf16[512,128], index: 0, kind: input, shape index: {}]   ;;  %s14679_s1 = inlined_call_operand.hbm [shape: bf16[128,128], index: 1, kind: input, shape index: {}]   ;;  %s14680_s2 = inlined_call_operand.hbm [shape: bf16[1152,128], index: 2, kind: input, shape index: {}]   ;;  %s14681_s3 = inlined_call_operand.hbm [shape: bf16[128,128], index: 3, kind: input, shape index: {}]   ;;  %s14682_s4 = inlined_call_operand.vmem [shape: f32[1,128], index: 4, kind: input, shape index: {}]   ;;  %s14683_s5 = inlined_call_operand.vmem [shape: f32[1,128], index: 5, kind: input, shape index: {}]   ;;  %s14684_s6 = inlined_call_operand.vmem [shape: f32[1,128], index: 6, kind: input, shape index: {}]   ;;  %s14685_s7 = inlined_call_operand.vmem [shape: f32[1,128], index: 7, kind: input, shape index: {}]   ;;  %s14686_s8 = inlined_call_operand.vmem [shape: f32[1,128], index: 8, kind: input, shape index: {}]   ;;  %s14687_s9 = inlined_call_operand.vmem [shape: f32[1,128], index: 9, kind: input, shape index: {}]   ;;  %s14688_s10 = inlined_call_operand.hbm [shape: f32[512,128], index: 10, kind: output, shape index: {}]  }
   0x1   :  { %16 = vsyncpa [#allocation7], 0 }
   0x2   :  { %17 = vsyncpa [#allocation10], 0 }
   0x3   :  { %18 = vsyncpa [#allocation5], 0  ;;  %s9699_s13 = smov [#allocation6]   ;;  %s9700_s15 = smov [#allocation3]  }
   0x4   :  { %s36_s14 = sshll.u32 %s9699_s13, 4  ;;  %s24_s16 = sshll.u32 %s9700_s15, 4  ;;  %s37_s14 = int_to_ptr.vmem [resolvable:$true] %s36_s14  ;;  %s9765_s16 = int_to_ptr.vmem [resolvable:$true] %s24_s16 }
   0x5   :  { %s9581_s19 = scalar_lea.hbm %s14679_s1, 1024 }
   0x6   :  { %p9582_p0 = scmp.ne.s32.totalorder %s14679_s1, %s9581_s19  ;;  %p9585_p1 = scmp.lt.u32.totalorder %s9581_s19, %s14679_s1 }
   0x8   :  { %p9587_p2 = pnand %p9585_p1, %p9582_p0 }
   0xa   :  { %9590 = shalt.err (!%p9587_p2)
}
   0xb   :  { %s9591_s24 = scalar_lea.vmem %s37_s14, 1024  ;;  %p9596_p4 = scmp.lt.s32.totalorder %s37_s14, %s37_s14 }
   0xc   :  { %p9592_p3 = scmp.ne.s32.totalorder %s37_s14, %s9591_s24  ;;  %p9597_p5 = scmp.lt.s32.totalorder %s9591_s24, %s9591_s24 }
   0xe   :  { %p9598_p6 = por %p9597_p5, %p9596_p4 }
  0x10   :  { %p9599_p7 = pnand %p9598_p6, %p9592_p3 }
  0x12   :  { %9602 = shalt.err (!%p9599_p7)
}
  0x13   :  { %s9701_s25 = smov 64   ;;  %s9702_s26 = smov 4  }
  0x14   :  { %42 = dma.hbm_to_vmem [thread:$0]  %s14679_s1, 1024, %s37_s14, [#allocation7], %s9701_s25, %s9701_s25, %s9702_s26  }
  0x15   :  { %s9603_s11 = scalar_lea.hbm %s14678_s0, 4096 }
  0x16   :  { %p9604_p8 = scmp.ne.s32.totalorder %s14678_s0, %s9603_s11  ;;  %p9607_p9 = scmp.lt.u32.totalorder %s9603_s11, %s14678_s0 }
  0x18   :  { %p9609_p10 = pnand %p9607_p9, %p9604_p8 }
  0x1a   :  { %9612 = shalt.err (!%p9609_p10)
}
  0x1b   :  { %s9613_s18 = scalar_lea.vmem %s9765_s16, 4096  ;;  %p9618_p12 = scmp.lt.s32.totalorder %s9765_s16, %s9765_s16 }
  0x1c   :  { %p9614_p11 = scmp.ne.s32.totalorder %s9765_s16, %s9613_s18  ;;  %p9619_p13 = scmp.lt.s32.totalorder %s9613_s18, %s9613_s18 }
  0x1e   :  { %p9620_p0 = por %p9619_p13, %p9618_p12 }
  0x20   :  { %p9621_p1 = pnand %p9620_p0, %p9614_p11 }
  0x22   :  { %9624 = shalt.err (!%p9621_p1)
}
  0x23   :  { %30 = dma.hbm_to_vmem [thread:$0]  %s14678_s0, 4096, %s9765_s16, [#allocation4], %s9701_s25, %s9701_s25, %s9702_s26  }
  0x24   :  { %s9703_s19 = smov [#allocation8]   ;;  %s9704_s21 = smov [#allocation9]  }
  0x25   :  { %s48_s20 = sshll.u32 %s9703_s19, 4  ;;  %s60_s22 = sshll.u32 %s9704_s21, 4  ;;  %s49_s20 = int_to_ptr.vmem [resolvable:$true] %s48_s20  ;;  %s9802_s22 = int_to_ptr.vmem [resolvable:$true] %s60_s22 }
  0x26   :  { %s9625_s27 = scalar_lea.hbm %s14680_s2, 9216 }
  0x27   :  { %p9626_p2 = scmp.ne.s32.totalorder %s14680_s2, %s9625_s27  ;;  %p9629_p3 = scmp.lt.u32.totalorder %s9625_s27, %s14680_s2 }
  0x29   :  { %p9631_p4 = pnand %p9629_p3, %p9626_p2 }
  0x2b   :  { %9634 = shalt.err (!%p9631_p4)
}
  0x2c   :  { %s9635_s0 = scalar_lea.vmem %s49_s20, 9216  ;;  %p9640_p6 = scmp.lt.s32.totalorder %s49_s20, %s49_s20 }
  0x2d   :  { %p9636_p5 = scmp.ne.s32.totalorder %s49_s20, %s9635_s0  ;;  %p9641_p7 = scmp.lt.s32.totalorder %s9635_s0, %s9635_s0 }
  0x2f   :  { %p9642_p8 = por %p9641_p7, %p9640_p6 }
  0x31   :  { %p9643_p9 = pnand %p9642_p8, %p9636_p5 }
  0x33   :  { %9646 = shalt.err (!%p9643_p9)
}
  0x34   :  { %54 = dma.hbm_to_vmem [thread:$0]  %s14680_s2, 9216, %s49_s20, [#allocation7], %s9701_s25, %s9701_s25, %s9702_s26  }
  0x35   :  { %s9647_s17 = scalar_lea.hbm %s14681_s3, 1024 }
  0x36   :  { %p9648_p10 = scmp.ne.s32.totalorder %s14681_s3, %s9647_s17  ;;  %p9651_p11 = scmp.lt.u32.totalorder %s9647_s17, %s14681_s3 }
  0x38   :  { %p9653_p12 = pnand %p9651_p11, %p9648_p10 }
  0x3a   :  { %9656 = shalt.err (!%p9653_p12)
}
  0x3b   :  { %s9657_s21 = scalar_lea.vmem %s9802_s22, 1024  ;;  %p9662_p0 = scmp.lt.s32.totalorder %s9802_s22, %s9802_s22 }
  0x3c   :  { %p9658_p13 = scmp.ne.s32.totalorder %s9802_s22, %s9657_s21  ;;  %p9663_p1 = scmp.lt.s32.totalorder %s9657_s21, %s9657_s21 }
  0x3e   :  { %p9664_p2 = por %p9663_p1, %p9662_p0 }
  0x40   :  { %p9665_p3 = pnand %p9664_p2, %p9658_p13 }
  0x42   :  { %9668 = shalt.err (!%p9665_p3)
}
  0x43   :  { %66 = dma.hbm_to_vmem [thread:$0]  %s14681_s3, 1024, %s9802_s22, [#allocation10], %s9701_s25, %s9701_s25, %s9702_s26  }
  0x44   :  { %9691 = dma.done.wait [#allocation4], 4096  }
  0x45   :  { %9692 = vsyncadd [#allocation4], 4294963200 }
  0x46   :  { %9693 = dma.done.wait [#allocation7], 10240  }
  0x47   :  { %9694 = vsyncadd [#allocation7], 4294957056 }
  0x48   :  { %9695 = dma.done.wait [#allocation10], 1024  }
  0x49   :  { %9696 = vsyncadd [#allocation10], 4294966272  ;;  %v9383_v0 = vld [vmem:[#allocation6] sm:$0xff]   ;;  %v9384_v1 = vld [vmem:[#allocation6 + $0x8] sm:$0xff]   ;;  %vm1564_vm0 = vcmask 1040384   ;;  %vm2591_vm1 = vcmask 1046528  }
  0x4a   :  { %7964 = vmatprep.subr.bf16.mxu0 %v9383_v0  ;;  %v9385_v2 = vld [vmem:[#allocation6 + $0x10] sm:$0xff]   ;;  %v9386_v3 = vld [vmem:[#allocation6 + $0x18] sm:$0xff]   ;;  %v92_v4 = vld [vmem:[#allocation3] sm:$0xff]  }
  0x4b   :  { %7965 = vmatpush3.bf16.msra.mxu0 %v9383_v0  ;;  %7980 = vmatprep.mubr.bf16.mxu0 %v92_v4  ;;  %v9387_v5 = vld [vmem:[#allocation6 + $0x20] sm:$0xff]   ;;  %v9388_v6 = vld [vmem:[#allocation6 + $0x28] sm:$0xff]   ;;  %v9389_v7 = vld [vmem:[#allocation6 + $0x30] sm:$0xff]  }
  0x4c   :  { %7966 = vmatprep.subr.bf16.mxu0 %v9384_v1  ;;  %v9390_v8 = vld [vmem:[#allocation6 + $0x38] sm:$0xff]   ;;  %v94_v9 = vld [vmem:[#allocation3 + $0x8] sm:$0xff]   ;;  %v96_v10 = vld [vmem:[#allocation3 + $0x10] sm:$0xff]  }
  0x4d   :  { %v98_v11 = vld [vmem:[#allocation3 + $0x18] sm:$0xff]   ;;  %v100_v12 = vld [vmem:[#allocation3 + $0x20] sm:$0xff]   ;;  %v102_v13 = vld [vmem:[#allocation3 + $0x28] sm:$0xff]  }
  0x4e   :  { %v104_v14 = vld [vmem:[#allocation3 + $0x30] sm:$0xff]   ;;  %v106_v15 = vld [vmem:[#allocation3 + $0x38] sm:$0xff]   ;;  %v108_v16 = vld [vmem:[#allocation3 + $0x40] sm:$0xff]  }
  0x4f   :  { %7967 = vmatpush3.bf16.msra.mxu0 %v9384_v1  ;;  %v110_v17 = vld [vmem:[#allocation3 + $0x48] sm:$0xff]   ;;  %v112_v18 = vld [vmem:[#allocation3 + $0x50] sm:$0xff]   ;;  %v114_v19 = vld [vmem:[#allocation3 + $0x58] sm:$0xff]  }
  0x50   :  { %7968 = vmatprep.subr.bf16.mxu0 %v9385_v2  ;;  %v116_v20 = vld [vmem:[#allocation3 + $0x60] sm:$0xff]   ;;  %v118_v21 = vld [vmem:[#allocation3 + $0x68] sm:$0xff]   ;;  %v120_v22 = vld [vmem:[#allocation3 + $0x70] sm:$0xff]  }
  0x51   :  { %v122_v23 = vld [vmem:[#allocation3 + $0x78] sm:$0xff]   ;;  %v124_v24 = vld [vmem:[#allocation3 + $0x80] sm:$0xff]   ;;  %v126_v25 = vld [vmem:[#allocation3 + $0x88] sm:$0xff]  }
  0x52   :  { %v128_v26 = vld [vmem:[#allocation3 + $0x90] sm:$0xff]   ;;  %v130_v27 = vld [vmem:[#allocation3 + $0x98] sm:$0xff]   ;;  %v132_v28 = vld [vmem:[#allocation3 + $0xa0] sm:$0xff]  }
  0x53   :  { %7969 = vmatpush3.bf16.msra.mxu0 %v9385_v2  ;;  %v134_v29 = vld [vmem:[#allocation3 + $0xa8] sm:$0xff]   ;;  %v136_v30 = vld [vmem:[#allocation3 + $0xb0] sm:$0xff]   ;;  %v138_v31 = vld [vmem:[#allocation3 + $0xb8] sm:$0xff]  }
  0x54   :  { %7970 = vmatprep.subr.bf16.mxu0 %v9386_v3  ;;  %v140_v32 = vld [vmem:[#allocation3 + $0xc0] sm:$0xff]   ;;  %v142_v33 = vld [vmem:[#allocation3 + $0xc8] sm:$0xff]   ;;  %v144_v34 = vld [vmem:[#allocation3 + $0xd0] sm:$0xff]  }
  0x55   :  { %v146_v35 = vld [vmem:[#allocation3 + $0xd8] sm:$0xff]   ;;  %v148_v36 = vld [vmem:[#allocation3 + $0xe0] sm:$0xff]   ;;  %v150_v37 = vld [vmem:[#allocation3 + $0xe8] sm:$0xff]  }
  0x56   :  { %v152_v38 = vld [vmem:[#allocation3 + $0xf0] sm:$0xff]   ;;  %v154_v39 = vld [vmem:[#allocation3 + $0xf8] sm:$0xff]  }
  0x57   :  { %7971 = vmatpush3.bf16.msra.mxu0 %v9386_v3 }
  0x58   :  { %7972 = vmatprep.subr.bf16.mxu0 %v9387_v5 }
  0x5b   :  { %7973 = vmatpush3.bf16.msra.mxu0 %v9387_v5 }
  0x5c   :  { %7974 = vmatprep.subr.bf16.mxu0 %v9388_v6 }
  0x5f   :  { %7975 = vmatpush3.bf16.msra.mxu0 %v9388_v6 }
  0x60   :  { %7976 = vmatprep.subr.bf16.mxu0 %v9389_v7 }
  0x63   :  { %7977 = vmatpush3.bf16.msra.mxu0 %v9389_v7 }
  0x64   :  { %7978 = vmatprep.subr.bf16.mxu0 %v9390_v8 }
  0x67   :  { %7979 = vmatpush3.bf16.msra.mxu0 %v9390_v8 }
  0x6a   :  { %7981 = vmatmul.mubr.bf16.vlgmr.msra.gmra.mrb[0].mxu0 %v94_v9 }
  0x6b   :  { %7984 = vmatprep.mubr.bf16.mxu0 %v96_v10 }
  0x72   :  { %7985 = vmatmul.mubr.bf16.gmra.mrb[4].mxu0 %v98_v11 }
  0x73   :  { %7988 = vmatprep.mubr.bf16.mxu0 %v100_v12 }
  0x7a   :  { %7989 = vmatmul.mubr.bf16.gmra.mrb[8].mxu0 %v102_v13 }
  0x7b   :  { %7992 = vmatprep.mubr.bf16.mxu0 %v104_v14 }
  0x82   :  { %7993 = vmatmul.mubr.bf16.gmra.mrb[12].mxu0 %v106_v15 }
  0x83   :  { %7996 = vmatprep.mubr.bf16.mxu0 %v108_v16 }
  0x8a   :  { %7997 = vmatmul.mubr.bf16.gmra.mrb[16].mxu0 %v110_v17 }
  0x8b   :  { %8000 = vmatprep.mubr.bf16.mxu0 %v112_v18 }
  0x92   :  { %8001 = vmatmul.mubr.bf16.gmra.mrb[20].mxu0 %v114_v19 }
  0x93   :  { %8004 = vmatprep.mubr.bf16.mxu0 %v116_v20 }
  0x9a   :  { %8005 = vmatmul.mubr.bf16.gmra.mrb[24].mxu0 %v118_v21 }
  0x9b   :  { %8008 = vmatprep.mubr.bf16.mxu0 %v120_v22 }
  0xa2   :  { %8009 = vmatmul.mubr.bf16.gmra.mrb[28].mxu0 %v122_v23 }
  0xa3   :  { %8012 = vmatprep.mubr.bf16.mxu0 %v124_v24 }
  0xaa   :  { %8013 = vmatmul.mubr.bf16.gmra.mrb[32].mxu0 %v126_v25 }
  0xab   :  { %8016 = vmatprep.mubr.bf16.mxu0 %v128_v26 }
  0xb2   :  { %8017 = vmatmul.mubr.bf16.gmra.mrb[36].mxu0 %v130_v27 }
  0xb3   :  { %8020 = vmatprep.mubr.bf16.mxu0 %v132_v28 }
  0xba   :  { %8021 = vmatmul.mubr.bf16.gmra.mrb[40].mxu0 %v134_v29 }
  0xbb   :  { %8024 = vmatprep.mubr.bf16.mxu0 %v136_v30 }
  0xc2   :  { %8025 = vmatmul.mubr.bf16.gmra.mrb[44].mxu0 %v138_v31 }
  0xc3   :  { %8028 = vmatprep.mubr.bf16.mxu0 %v140_v32 }
  0xca   :  { %8029 = vmatmul.mubr.bf16.gmra.mrb[48].mxu0 %v142_v33 }
  0xcb   :  { %8032 = vmatprep.mubr.bf16.mxu0 %v144_v34 }
  0xd2   :  { %8033 = vmatmul.mubr.bf16.gmra.mrb[52].mxu0 %v146_v35 }
  0xd3   :  { %8036 = vmatprep.mubr.bf16.mxu0 %v148_v36 }
  0xda   :  { %8037 = vmatmul.mubr.bf16.gmra.mrb[56].mxu0 %v150_v37 }
  0xdb   :  { %8040 = vmatprep.mubr.bf16.mxu0 %v152_v38 }
  0xe2   :  { %8041 = vmatmul.mubr.bf16.gmra.mrb[60].mxu0 %v154_v39 }
 0x13d   :  { %v9839_v40 = vpop.f32.mrb[0].mxu0 }
 0x13e   :  { %v9841_v41 = vpop.f32.mrb[1].mxu0 }
 0x13f   :  { %v9843_v42 = vpop.f32.mrb[2].mxu0 }
 0x140   :  { %v9845_v43 = vpop.f32.mrb[3].mxu0 }
 0x141   :  { %v703_v44 = vadd.f32 %v9845_v43, %v9841_v41 }
 0x143   :  { %v704_v45 = vadd.f32 %v9839_v40, %v703_v44 }
 0x145   :  { %v9850_v46 = vpop.f32.mrb[4].mxu0  ;;  %v705_v47 = vadd.f32 %v9843_v42, %v704_v45 }
 0x146   :  { %v9853_v48 = vpop.f32.mrb[5].mxu0 }
 0x147   :  { %v706_v49 = vadd.f32 %v705_v47, %v9853_v48  ;;  %v9856_v50 = vpop.f32.mrb[6].mxu0 }
 0x148   :  { %v9858_v51 = vpop.f32.mrb[7].mxu0 }
 0x149   :  { %v707_v52 = vadd.f32 %v706_v49, %v9858_v51 }
 0x14b   :  { %v708_v53 = vadd.f32 %v9850_v46, %v707_v52 }
 0x14d   :  { %v9862_v54 = vpop.f32.mrb[8].mxu0  ;;  %v709_v55 = vadd.f32 %v9856_v50, %v708_v53 }
 0x14e   :  { %v9865_v56 = vpop.f32.mrb[9].mxu0 }
 0x14f   :  { %v710_v57 = vadd.f32 %v709_v55, %v9865_v56  ;;  %v9868_v58 = vpop.f32.mrb[10].mxu0 }
 0x150   :  { %v9870_v59 = vpop.f32.mrb[11].mxu0 }
 0x151   :  { %v711_v60 = vadd.f32 %v710_v57, %v9870_v59 }
 0x153   :  { %v712_v61 = vadd.f32 %v9862_v54, %v711_v60 }
 0x155   :  { %v9874_v62 = vpop.f32.mrb[12].mxu0  ;;  %v713_v63 = vadd.f32 %v9868_v58, %v712_v61 }
 0x156   :  { %v9877_v0 = vpop.f32.mrb[13].mxu0 }
 0x157   :  { %v714_v1 = vadd.f32 %v713_v63, %v9877_v0  ;;  %v9880_v2 = vpop.f32.mrb[14].mxu0 }
 0x158   :  { %v9882_v3 = vpop.f32.mrb[15].mxu0 }
 0x159   :  { %v715_v4 = vadd.f32 %v714_v1, %v9882_v3 }
 0x15b   :  { %v716_v5 = vadd.f32 %v9874_v62, %v715_v4 }
 0x15d   :  { %v9886_v6 = vpop.f32.mrb[16].mxu0  ;;  %v717_v7 = vadd.f32 %v9880_v2, %v716_v5 }
 0x15e   :  { %v9889_v8 = vpop.f32.mrb[17].mxu0 }
 0x15f   :  { %v718_v9 = vadd.f32 %v717_v7, %v9889_v8  ;;  %v9892_v10 = vpop.f32.mrb[18].mxu0 }
 0x160   :  { %v9894_v11 = vpop.f32.mrb[19].mxu0 }
 0x161   :  { %v719_v12 = vadd.f32 %v718_v9, %v9894_v11 }
 0x163   :  { %v720_v13 = vadd.f32 %v9886_v6, %v719_v12 }
 0x165   :  { %v9898_v14 = vpop.f32.mrb[20].mxu0  ;;  %v721_v15 = vadd.f32 %v9892_v10, %v720_v13 }
 0x166   :  { %v9901_v16 = vpop.f32.mrb[21].mxu0 }
 0x167   :  { %v722_v17 = vadd.f32 %v721_v15, %v9901_v16  ;;  %v9904_v18 = vpop.f32.mrb[22].mxu0 }
 0x168   :  { %v9906_v19 = vpop.f32.mrb[23].mxu0 }
 0x169   :  { %v723_v20 = vadd.f32 %v722_v17, %v9906_v19 }
 0x16b   :  { %v724_v21 = vadd.f32 %v9898_v14, %v723_v20 }
 0x16d   :  { %v9910_v22 = vpop.f32.mrb[24].mxu0  ;;  %v725_v23 = vadd.f32 %v9904_v18, %v724_v21 }
 0x16e   :  { %v9913_v24 = vpop.f32.mrb[25].mxu0 }
 0x16f   :  { %v726_v25 = vadd.f32 %v725_v23, %v9913_v24  ;;  %v9916_v26 = vpop.f32.mrb[26].mxu0 }
 0x170   :  { %v9918_v27 = vpop.f32.mrb[27].mxu0 }
 0x171   :  { %v727_v28 = vadd.f32 %v726_v25, %v9918_v27 }
 0x173   :  { %v728_v29 = vadd.f32 %v9910_v22, %v727_v28 }
 0x175   :  { %v9922_v30 = vpop.f32.mrb[28].mxu0  ;;  %v729_v31 = vadd.f32 %v9916_v26, %v728_v29 }
 0x176   :  { %v9925_v32 = vpop.f32.mrb[29].mxu0 }
 0x177   :  { %v730_v33 = vadd.f32 %v729_v31, %v9925_v32  ;;  %v9928_v34 = vpop.f32.mrb[30].mxu0 }
 0x178   :  { %v9930_v35 = vpop.f32.mrb[31].mxu0 }
 0x179   :  { %v731_v36 = vadd.f32 %v730_v33, %v9930_v35 }
 0x17b   :  { %v732_v37 = vadd.f32 %v9922_v30, %v731_v36 }
 0x17d   :  { %v9934_v38 = vpop.f32.mrb[32].mxu0  ;;  %v733_v39 = vadd.f32 %v9928_v34, %v732_v37 }
 0x17e   :  { %v9937_v44 = vpop.f32.mrb[33].mxu0 }
 0x17f   :  { %v734_v45 = vadd.f32 %v733_v39, %v9937_v44  ;;  %v9940_v47 = vpop.f32.mrb[34].mxu0 }
 0x180   :  { %v9942_v49 = vpop.f32.mrb[35].mxu0 }
 0x181   :  { %v735_v52 = vadd.f32 %v734_v45, %v9942_v49 }
 0x183   :  { %v736_v53 = vadd.f32 %v9934_v38, %v735_v52 }
 0x185   :  { %v9946_v55 = vpop.f32.mrb[36].mxu0  ;;  %v737_v57 = vadd.f32 %v9940_v47, %v736_v53 }
 0x186   :  { %v9949_v60 = vpop.f32.mrb[37].mxu0 }
 0x187   :  { %v738_v61 = vadd.f32 %v737_v57, %v9949_v60  ;;  %v9952_v63 = vpop.f32.mrb[38].mxu0 }
 0x188   :  { %v9954_v1 = vpop.f32.mrb[39].mxu0 }
 0x189   :  { %v739_v4 = vadd.f32 %v738_v61, %v9954_v1 }
 0x18b   :  { %v740_v5 = vadd.f32 %v9946_v55, %v739_v4 }
 0x18d   :  { %v9958_v7 = vpop.f32.mrb[40].mxu0  ;;  %v741_v9 = vadd.f32 %v9952_v63, %v740_v5 }
 0x18e   :  { %v9961_v12 = vpop.f32.mrb[41].mxu0 }
 0x18f   :  { %v742_v13 = vadd.f32 %v741_v9, %v9961_v12  ;;  %v9964_v15 = vpop.f32.mrb[42].mxu0 }
 0x190   :  { %v9966_v17 = vpop.f32.mrb[43].mxu0 }
 0x191   :  { %v743_v20 = vadd.f32 %v742_v13, %v9966_v17 }
 0x193   :  { %v744_v21 = vadd.f32 %v9958_v7, %v743_v20 }
 0x195   :  { %v9970_v23 = vpop.f32.mrb[44].mxu0  ;;  %v745_v25 = vadd.f32 %v9964_v15, %v744_v21 }
 0x196   :  { %v9973_v28 = vpop.f32.mrb[45].mxu0 }
 0x197   :  { %v746_v29 = vadd.f32 %v745_v25, %v9973_v28  ;;  %v9976_v31 = vpop.f32.mrb[46].mxu0 }
 0x198   :  { %v9978_v33 = vpop.f32.mrb[47].mxu0 }
 0x199   :  { %v747_v36 = vadd.f32 %v746_v29, %v9978_v33 }
 0x19b   :  { %v748_v37 = vadd.f32 %v9970_v23, %v747_v36 }
 0x19d   :  { %v9982_v39 = vpop.f32.mrb[48].mxu0  ;;  %v749_v45 = vadd.f32 %v9976_v31, %v748_v37 }
 0x19e   :  { %15044 = vst [vmem:[#allocation16_spill] sm:$0xff] %v9982_v39  ;;  %v9985_v52 = vpop.f32.mrb[49].mxu0 }
 0x19f   :  { %15045 = vst [vmem:[#allocation17_spill] sm:$0xff] %v9985_v52  ;;  %v750_v53 = vadd.f32 %v749_v45, %v9985_v52  ;;  %v9988_v57 = vpop.f32.mrb[50].mxu0 }
 0x1a0   :  { %15046 = vst [vmem:[#allocation18_spill] sm:$0xff] %v9988_v57  ;;  %v9990_v61 = vpop.f32.mrb[51].mxu0 }
 0x1a1   :  { %15047 = vst [vmem:[#allocation19_spill] sm:$0xff] %v9990_v61  ;;  %v751_v4 = vadd.f32 %v750_v53, %v9990_v61 }
 0x1a3   :  { %v752_v5 = vadd.f32 %v9982_v39, %v751_v4 }
 0x1a5   :  { %v9994_v9 = vpop.f32.mrb[52].mxu0  ;;  %v753_v13 = vadd.f32 %v9988_v57, %v752_v5 }
 0x1a6   :  { %15048 = vst [vmem:[#allocation20_spill] sm:$0xff] %v9994_v9  ;;  %v9997_v20 = vpop.f32.mrb[53].mxu0 }
 0x1a7   :  { %15049 = vst [vmem:[#allocation21_spill] sm:$0xff] %v9997_v20  ;;  %v754_v21 = vadd.f32 %v753_v13, %v9997_v20  ;;  %v10000_v25 = vpop.f32.mrb[54].mxu0 }
 0x1a8   :  { %15050 = vst [vmem:[#allocation22_spill] sm:$0xff] %v10000_v25  ;;  %v10002_v29 = vpop.f32.mrb[55].mxu0 }
 0x1a9   :  { %15051 = vst [vmem:[#allocation23_spill] sm:$0xff] %v10002_v29  ;;  %v755_v36 = vadd.f32 %v754_v21, %v10002_v29 }
 0x1ab   :  { %v756_v37 = vadd.f32 %v9994_v9, %v755_v36 }
 0x1ad   :  { %v10006_v45 = vpop.f32.mrb[56].mxu0  ;;  %v757_v53 = vadd.f32 %v10000_v25, %v756_v37 }
 0x1ae   :  { %15052 = vst [vmem:[#allocation24_spill] sm:$0xff] %v10006_v45  ;;  %v10009_v4 = vpop.f32.mrb[57].mxu0 }
 0x1af   :  { %15053 = vst [vmem:[#allocation25_spill] sm:$0xff] %v10009_v4  ;;  %v758_v5 = vadd.f32 %v757_v53, %v10009_v4  ;;  %v10012_v57 = vpop.f32.mrb[58].mxu0 }
 0x1b0   :  { %15054 = vst [vmem:[#allocation26_spill] sm:$0xff] %v10012_v57  ;;  %v10014_v39 = vpop.f32.mrb[59].mxu0 }
 0x1b1   :  { %15055 = vst [vmem:[#allocation27_spill] sm:$0xff] %v10014_v39  ;;  %v759_v13 = vadd.f32 %v758_v5, %v10014_v39 }
 0x1b3   :  { %v760_v20 = vadd.f32 %v10006_v45, %v759_v13 }
 0x1b5   :  { %v10018_v61 = vpop.f32.mrb[60].mxu0  ;;  %v761_v21 = vadd.f32 %v10012_v57, %v760_v20 }
 0x1b6   :  { %v10021_v36 = vpop.f32.mrb[61].mxu0 }
 0x1b7   :  { %15056 = vst [vmem:[#allocation28_spill] sm:$0xff] %v10021_v36  ;;  %v762_v37 = vadd.f32 %v761_v21, %v10021_v36  ;;  %v10024_v25 = vpop.f32.mrb[62].mxu0 }
 0x1b8   :  { %v10026_v9 = vpop.f32.mrb[63].mxu0 }
 0x1b9   :  { %v763_v53 = vadd.f32 %v762_v37, %v10026_v9 }
 0x1bb   :  { %v764_v4 = vadd.f32 %v10018_v61, %v763_v53  ;;  %v15070_v53 = vld [vmem:[#allocation18_spill] sm:$0xff] }
 0x1bd   :  { %v765_v5 = vadd.f32 %v10024_v25, %v764_v4  ;;  %v15068_v4 = vld [vmem:[#allocation16_spill] sm:$0xff] }
 0x1bf   :  { %v766_v39 = vrot.slane %v765_v5, 4 }
 0x1c1   :  { %v767_v13 = vadd.f32 %v766_v39, %v765_v5  ;;  %v15072_v5 = vld [vmem:[#allocation21_spill] sm:$0xff] }
 0x1c3   :  { %v768_v45 = vrot.slane %v767_v13, 2 }
 0x1c5   :  { %v769_v29 = vadd.f32 %v768_v45, %v767_v13  ;;  %v15066_v45 = vld [vmem:[#allocation19_spill] sm:$0xff] }
 0x1c6   :  { %v15074_v13 = vld [vmem:[#allocation23_spill] sm:$0xff] }
 0x1c7   :  { %v770_v52 = vrot.slane %v769_v29, 1 }
 0x1c9   :  { %v771_v20 = vadd.f32 %v770_v52, %v769_v29  ;;  %v15064_v29 = vld [vmem:[#allocation17_spill] sm:$0xff] }
 0x1cb   :  { %v10031_v57 = vmul.f32 0.001953125, %v771_v20 }
 0x1cd   :  { %v10035_v21 = vsub.f32 %v9841_v41, %v10031_v57  ;;  %v10039_v36 = vsub.f32 %v9845_v43, %v10031_v57  ;;  %v10043_v37 = vsub.f32 %v9839_v40, %v10031_v57  ;;  %v10047_v39 = vsub.f32 %v9843_v42, %v10031_v57 }
 0x1ce   :  { %v10051_v52 = vsub.f32 %v9853_v48, %v10031_v57  ;;  %v10055_v41 = vsub.f32 %v9858_v51, %v10031_v57  ;;  %v10059_v43 = vsub.f32 %v9850_v46, %v10031_v57  ;;  %v10063_v40 = vsub.f32 %v9856_v50, %v10031_v57 }
 0x1cf   :  { %15057 = vst [vmem:[#allocation29_spill] sm:$0xff] %v10035_v21  ;;  %15058 = vst [vmem:[#allocation30_spill] sm:$0xff] %v10039_v36  ;;  %v10067_v42 = vsub.f32 %v9865_v56, %v10031_v57  ;;  %v10071_v48 = vsub.f32 %v9870_v59, %v10031_v57  ;;  %v10075_v51 = vsub.f32 %v9862_v54, %v10031_v57 }
 0x1d0   :  { %15059 = vst [vmem:[#allocation31_spill] sm:$0xff] %v10043_v37  ;;  %v10079_v46 = vsub.f32 %v9868_v58, %v10031_v57  ;;  %v10083_v50 = vsub.f32 %v9877_v0, %v10031_v57  ;;  %v10087_v56 = vsub.f32 %v9882_v3, %v10031_v57  ;;  %v10091_v59 = vsub.f32 %v9874_v62, %v10031_v57 }
 0x1d1   :  { %v10095_v54 = vsub.f32 %v9880_v2, %v10031_v57  ;;  %v10099_v58 = vsub.f32 %v9889_v8, %v10031_v57  ;;  %v10103_v0 = vsub.f32 %v9894_v11, %v10031_v57  ;;  %v10107_v3 = vsub.f32 %v9886_v6, %v10031_v57 }
 0x1d2   :  { %v10111_v62 = vsub.f32 %v9892_v10, %v10031_v57  ;;  %v10115_v2 = vsub.f32 %v9901_v16, %v10031_v57  ;;  %v10119_v8 = vsub.f32 %v9906_v19, %v10031_v57  ;;  %v10123_v11 = vsub.f32 %v9898_v14, %v10031_v57 }
 0x1d3   :  { %v10127_v6 = vsub.f32 %v9904_v18, %v10031_v57  ;;  %v10131_v10 = vsub.f32 %v9913_v24, %v10031_v57  ;;  %v10135_v16 = vsub.f32 %v9918_v27, %v10031_v57  ;;  %v10139_v19 = vsub.f32 %v9910_v22, %v10031_v57 }
 0x1d4   :  { %v10143_v14 = vsub.f32 %v9916_v26, %v10031_v57  ;;  %v10147_v18 = vsub.f32 %v9925_v32, %v10031_v57  ;;  %v10151_v24 = vsub.f32 %v9930_v35, %v10031_v57  ;;  %v10155_v27 = vsub.f32 %v9922_v30, %v10031_v57 }
 0x1d5   :  { %v10159_v22 = vsub.f32 %v9928_v34, %v10031_v57  ;;  %v10163_v26 = vsub.f32 %v9937_v44, %v10031_v57  ;;  %v10167_v32 = vsub.f32 %v9942_v49, %v10031_v57  ;;  %v10171_v35 = vsub.f32 %v9934_v38, %v10031_v57 }
 0x1d6   :  { %v10175_v30 = vsub.f32 %v9940_v47, %v10031_v57  ;;  %v10179_v34 = vsub.f32 %v9949_v60, %v10031_v57  ;;  %v10183_v44 = vsub.f32 %v9954_v1, %v10031_v57  ;;  %v10187_v49 = vsub.f32 %v9946_v55, %v10031_v57 }
 0x1d7   :  { %v10191_v38 = vsub.f32 %v9952_v63, %v10031_v57  ;;  %v10195_v47 = vsub.f32 %v9961_v12, %v10031_v57  ;;  %v10199_v60 = vsub.f32 %v9966_v17, %v10031_v57  ;;  %v10203_v1 = vsub.f32 %v9958_v7, %v10031_v57 }
 0x1d8   :  { %v10207_v55 = vsub.f32 %v9964_v15, %v10031_v57  ;;  %v10211_v63 = vsub.f32 %v9973_v28, %v10031_v57  ;;  %v10215_v12 = vsub.f32 %v9978_v33, %v10031_v57  ;;  %v10219_v17 = vsub.f32 %v9970_v23, %v10031_v57 }
 0x1d9   :  { %v10223_v7 = vsub.f32 %v9976_v31, %v10031_v57  ;;  %v10227_v15 = vsub.f32 %v15064_v29, %v10031_v57  ;;  %v10231_v28 = vsub.f32 %v15066_v45, %v10031_v57  ;;  %v10235_v33 = vsub.f32 %v15068_v4, %v10031_v57  ;;  %v15076_v29 = vld [vmem:[#allocation20_spill] sm:$0xff] }
 0x1da   :  { %15060 = vst [vmem:[#allocation32_spill] sm:$0xff] %v10211_v63  ;;  %15061 = vst [vmem:[#allocation33_spill] sm:$0xff] %v10215_v12  ;;  %v10239_v23 = vsub.f32 %v15070_v53, %v10031_v57  ;;  %v10243_v31 = vsub.f32 %v15072_v5, %v10031_v57  ;;  %v10247_v20 = vsub.f32 %v15074_v13, %v10031_v57 }
 0x1db   :  { %15062 = vst [vmem:[#allocation34_spill] sm:$0xff] %v10219_v17  ;;  %15063 = vst [vmem:[#allocation35_spill] sm:$0xff] %v10223_v7  ;;  %v10251_v45 = vsub.f32 %v15076_v29, %v10031_v57 }
 0x1dc   :  { %15065 = vst [vmem:[#allocation17_spill] sm:$0xff] %v10227_v15  ;;  %15067 = vst [vmem:[#allocation19_spill] sm:$0xff] %v10231_v28  ;;  %v15078_v28 = vld [vmem:[#allocation22_spill] sm:$0xff] }
 0x1dd   :  { %15069 = vst [vmem:[#allocation16_spill] sm:$0xff] %v10235_v33  ;;  %15071 = vst [vmem:[#allocation18_spill] sm:$0xff] %v10239_v23  ;;  %v10255_v4 = vsub.f32 %v15078_v28, %v10031_v57  ;;  %v15080_v33 = vld [vmem:[#allocation25_spill] sm:$0xff]  ;;  %v15082_v23 = vld [vmem:[#allocation27_spill] sm:$0xff] }
 0x1de   :  { %15073 = vst [vmem:[#allocation21_spill] sm:$0xff] %v10243_v31  ;;  %15075 = vst [vmem:[#allocation23_spill] sm:$0xff] %v10247_v20  ;;  %v10259_v53 = vsub.f32 %v15080_v33, %v10031_v57  ;;  %v10263_v5 = vsub.f32 %v15082_v23, %v10031_v57  ;;  %v15084_v31 = vld [vmem:[#allocation24_spill] sm:$0xff]  ;;  %v15086_v20 = vld [vmem:[#allocation26_spill] sm:$0xff]  ;;  %v10279_v33 = vsub.f32 %v10026_v9, %v10031_v57 }
 0x1df   :  { %15077 = vst [vmem:[#allocation20_spill] sm:$0xff] %v10251_v45  ;;  %15079 = vst [vmem:[#allocation22_spill] sm:$0xff] %v10255_v4  ;;  %v10267_v13 = vsub.f32 %v15084_v31, %v10031_v57  ;;  %v10271_v29 = vsub.f32 %v15086_v20, %v10031_v57  ;;  %v15088_v45 = vld [vmem:[#allocation28_spill] sm:$0xff]  ;;  %v10283_v23 = vsub.f32 %v10018_v61, %v10031_v57 }
 0x1e0   :  { %15081 = vst [vmem:[#allocation25_spill] sm:$0xff] %v10259_v53  ;;  %15083 = vst [vmem:[#allocation27_spill] sm:$0xff] %v10263_v5  ;;  %v10275_v28 = vsub.f32 %v15088_v45, %v10031_v57  ;;  %v10287_v31 = vsub.f32 %v10024_v25, %v10031_v57  ;;  %v837_v20 = vmul.f32 %v10035_v21, %v10035_v21 }
 0x1e1   :  { %15085 = vst [vmem:[#allocation24_spill] sm:$0xff] %v10267_v13  ;;  %15087 = vst [vmem:[#allocation26_spill] sm:$0xff] %v10271_v29  ;;  %v838_v29 = vmul.f32 %v10039_v36, %v10039_v36  ;;  %v839_v45 = vmul.f32 %v10043_v37, %v10043_v37  ;;  %v840_v9 = vmul.f32 %v10047_v39, %v10047_v39 }
 0x1e2   :  { %15089 = vst [vmem:[#allocation28_spill] sm:$0xff] %v10275_v28  ;;  %15090 = vst [vmem:[#allocation36_spill] sm:$0xff] %v10279_v33  ;;  %v841_v61 = vmul.f32 %v10051_v52, %v10051_v52  ;;  %v842_v57 = vmul.f32 %v10055_v41, %v10055_v41  ;;  %v843_v21 = vmul.f32 %v10059_v43, %v10059_v43 }
 0x1e3   :  { %15091 = vst [vmem:[#allocation37_spill] sm:$0xff] %v10283_v23  ;;  %v901_v28 = vadd.f32 %v838_v29, %v837_v20  ;;  %v844_v37 = vmul.f32 %v10063_v40, %v10063_v40  ;;  %v845_v20 = vmul.f32 %v10067_v42, %v10067_v42 }
 0x1e5   :  { %v902_v33 = vadd.f32 %v901_v28, %v839_v45  ;;  %v846_v45 = vmul.f32 %v10071_v48, %v10071_v48 }
 0x1e7   :  { %v903_v23 = vadd.f32 %v902_v33, %v840_v9  ;;  %v847_v9 = vmul.f32 %v10075_v51, %v10075_v51 }
 0x1e9   :  { %v904_v25 = vadd.f32 %v903_v23, %v841_v61  ;;  %v848_v61 = vmul.f32 %v10079_v46, %v10079_v46 }
 0x1eb   :  { %v905_v36 = vadd.f32 %v904_v25, %v842_v57  ;;  %v849_v25 = vmul.f32 %v10083_v50, %v10083_v50 }
 0x1ed   :  { %v906_v29 = vadd.f32 %v905_v36, %v843_v21  ;;  %v850_v21 = vmul.f32 %v10087_v56, %v10087_v56 }
 0x1ef   :  { %v907_v28 = vadd.f32 %v906_v29, %v844_v37  ;;  %v851_v29 = vmul.f32 %v10091_v59, %v10091_v59 }
 0x1f1   :  { %v908_v33 = vadd.f32 %v907_v28, %v845_v20  ;;  %v852_v28 = vmul.f32 %v10095_v54, %v10095_v54 }
 0x1f3   :  { %v909_v23 = vadd.f32 %v908_v33, %v846_v45  ;;  %v853_v33 = vmul.f32 %v10099_v58, %v10099_v58 }
 0x1f5   :  { %v910_v57 = vadd.f32 %v909_v23, %v847_v9  ;;  %v854_v23 = vmul.f32 %v10103_v0, %v10103_v0 }
 0x1f7   :  { %v911_v36 = vadd.f32 %v910_v57, %v848_v61  ;;  %v855_v57 = vmul.f32 %v10107_v3, %v10107_v3 }
 0x1f9   :  { %v912_v37 = vadd.f32 %v911_v36, %v849_v25  ;;  %v856_v36 = vmul.f32 %v10111_v62, %v10111_v62 }
 0x1fb   :  { %v913_v20 = vadd.f32 %v912_v37, %v850_v21  ;;  %v857_v37 = vmul.f32 %v10115_v2, %v10115_v2 }
 0x1fd   :  { %v914_v45 = vadd.f32 %v913_v20, %v851_v29  ;;  %v858_v20 = vmul.f32 %v10119_v8, %v10119_v8 }
 0x1ff   :  { %v915_v9 = vadd.f32 %v914_v45, %v852_v28  ;;  %v859_v45 = vmul.f32 %v10123_v11, %v10123_v11 }
 0x201   :  { %v916_v61 = vadd.f32 %v915_v9, %v853_v33  ;;  %v860_v9 = vmul.f32 %v10127_v6, %v10127_v6 }
 0x203   :  { %v917_v25 = vadd.f32 %v916_v61, %v854_v23  ;;  %v861_v61 = vmul.f32 %v10131_v10, %v10131_v10 }
 0x205   :  { %v918_v21 = vadd.f32 %v917_v25, %v855_v57  ;;  %v862_v25 = vmul.f32 %v10135_v16, %v10135_v16 }
 0x207   :  { %v919_v29 = vadd.f32 %v918_v21, %v856_v36  ;;  %v9423_v21 = vld [vmem:[#allocation8 + $0x40] sm:$0xff]  }
 0x208   :  { %8044 = vmatprep.subr.bf16.mxu0 %v9423_v21 }
 0x209   :  { %v920_v28 = vadd.f32 %v919_v29, %v857_v37  ;;  %v863_v37 = vmul.f32 %v10139_v19, %v10139_v19  ;;  %8045 = vmatpush3.bf16.msra.mxu0 %v9423_v21  ;;  %v867_v21 = vmul.f32 %v10155_v27, %v10155_v27 }
 0x20b   :  { %v921_v33 = vadd.f32 %v920_v28, %v858_v20  ;;  %v864_v20 = vmul.f32 %v10143_v14, %v10143_v14 }
 0x20d   :  { %v922_v23 = vadd.f32 %v921_v33, %v859_v45  ;;  %v9424_v45 = vld [vmem:[#allocation8 + $0xc0] sm:$0xff]   ;;  %v9425_v33 = vld [vmem:[#allocation8 + $0x48] sm:$0xff]  }
 0x20e   :  { %8844 = vmatprep.subr.bf16.mxu1 %v9424_v45  ;;  %8046 = vmatprep.subr.bf16.mxu0 %v9425_v33 }
 0x20f   :  { %v923_v57 = vadd.f32 %v922_v23, %v860_v9  ;;  %v865_v9 = vmul.f32 %v10147_v18, %v10147_v18  ;;  %8852 = vmatpush3.bf16.msra.mxu1 %v9424_v45  ;;  %8047 = vmatpush3.bf16.msra.mxu0 %v9425_v33  ;;  %v9429_v45 = vld [vmem:[#allocation8 + $0x58] sm:$0xff]   ;;  %v869_v33 = vmul.f32 %v10163_v26, %v10163_v26 }
 0x211   :  { %v924_v36 = vadd.f32 %v923_v57, %v861_v61  ;;  %v866_v61 = vmul.f32 %v10151_v24, %v10151_v24 }
 0x213   :  { %v925_v29 = vadd.f32 %v924_v36, %v862_v25  ;;  %v9426_v25 = vld [vmem:[#allocation8 + $0xc8] sm:$0xff]   ;;  %v9427_v36 = vld [vmem:[#allocation8 + $0x50] sm:$0xff]  }
 0x214   :  { %8845 = vmatprep.subr.bf16.mxu1 %v9426_v25  ;;  %8048 = vmatprep.subr.bf16.mxu0 %v9427_v36 }
 0x215   :  { %v926_v28 = vadd.f32 %v925_v29, %v863_v37  ;;  %8853 = vmatpush3.bf16.msra.mxu1 %v9426_v25  ;;  %8049 = vmatpush3.bf16.msra.mxu0 %v9427_v36  ;;  %v868_v29 = vmul.f32 %v10159_v22, %v10159_v22  ;;  %v9431_v25 = vld [vmem:[#allocation8 + $0x60] sm:$0xff]   ;;  %v871_v36 = vmul.f32 %v10171_v35, %v10171_v35 }
 0x216   :  { %8050 = vmatprep.subr.bf16.mxu0 %v9429_v45 }
 0x217   :  { %v927_v23 = vadd.f32 %v926_v28, %v864_v20  ;;  %v9428_v28 = vld [vmem:[#allocation8 + $0xd0] sm:$0xff]  }
 0x218   :  { %8846 = vmatprep.subr.bf16.mxu1 %v9428_v28 }
 0x219   :  { %v928_v57 = vadd.f32 %v927_v23, %v865_v9  ;;  %8854 = vmatpush3.bf16.msra.mxu1 %v9428_v28  ;;  %8051 = vmatpush3.bf16.msra.mxu0 %v9429_v45  ;;  %v870_v23 = vmul.f32 %v10167_v32, %v10167_v32  ;;  %v9433_v28 = vld [vmem:[#allocation8 + $0x68] sm:$0xff]   ;;  %v873_v45 = vmul.f32 %v10179_v34, %v10179_v34 }
 0x21a   :  { %8052 = vmatprep.subr.bf16.mxu0 %v9431_v25 }
 0x21b   :  { %v929_v37 = vadd.f32 %v928_v57, %v866_v61  ;;  %v9430_v57 = vld [vmem:[#allocation8 + $0xd8] sm:$0xff]  }
 0x21c   :  { %8847 = vmatprep.subr.bf16.mxu1 %v9430_v57 }
 0x21d   :  { %v930_v20 = vadd.f32 %v929_v37, %v867_v21  ;;  %8855 = vmatpush3.bf16.msra.mxu1 %v9430_v57  ;;  %8053 = vmatpush3.bf16.msra.mxu0 %v9431_v25  ;;  %v872_v37 = vmul.f32 %v10175_v30, %v10175_v30  ;;  %v9435_v57 = vld [vmem:[#allocation8 + $0x70] sm:$0xff]   ;;  %v875_v25 = vmul.f32 %v10187_v49, %v10187_v49 }
 0x21e   :  { %8054 = vmatprep.subr.bf16.mxu0 %v9433_v28 }
 0x21f   :  { %v931_v9 = vadd.f32 %v930_v20, %v868_v29  ;;  %v9432_v20 = vld [vmem:[#allocation8 + $0xe0] sm:$0xff]  }
 0x220   :  { %8848 = vmatprep.subr.bf16.mxu1 %v9432_v20 }
 0x221   :  { %v932_v61 = vadd.f32 %v931_v9, %v869_v33  ;;  %8856 = vmatpush3.bf16.msra.mxu1 %v9432_v20  ;;  %8055 = vmatpush3.bf16.msra.mxu0 %v9433_v28  ;;  %v874_v9 = vmul.f32 %v10183_v44, %v10183_v44  ;;  %v9437_v20 = vld [vmem:[#allocation8 + $0x78] sm:$0xff]   ;;  %v877_v28 = vmul.f32 %v10195_v47, %v10195_v47 }
 0x222   :  { %8056 = vmatprep.subr.bf16.mxu0 %v9435_v57 }
 0x223   :  { %v933_v21 = vadd.f32 %v932_v61, %v870_v23  ;;  %v9434_v61 = vld [vmem:[#allocation8 + $0xe8] sm:$0xff]  }
 0x224   :  { %8849 = vmatprep.subr.bf16.mxu1 %v9434_v61 }
 0x225   :  { %v934_v29 = vadd.f32 %v933_v21, %v871_v36  ;;  %8857 = vmatpush3.bf16.msra.mxu1 %v9434_v61  ;;  %8057 = vmatpush3.bf16.msra.mxu0 %v9435_v57  ;;  %v876_v21 = vmul.f32 %v10191_v38, %v10191_v38  ;;  %v14715_v61 = vmov 0.0|0.0   ;;  %v879_v57 = vmul.f32 %v10203_v1, %v10203_v1 }
 0x226   :  { %8058 = vmatprep.subr.bf16.mxu0 %v9437_v20  ;;  %8060 = vmatprep.mubr.bf16.mxu0 %v14715_v61 }
 0x227   :  { %v935_v33 = vadd.f32 %v934_v29, %v872_v37  ;;  %v9436_v29 = vld [vmem:[#allocation8 + $0xf0] sm:$0xff]  }
 0x228   :  { %8850 = vmatprep.subr.bf16.mxu1 %v9436_v29 }
 0x229   :  { %v936_v23 = vadd.f32 %v935_v33, %v873_v45  ;;  %8858 = vmatpush3.bf16.msra.mxu1 %v9436_v29  ;;  %8059 = vmatpush3.bf16.msra.mxu0 %v9437_v20  ;;  %v878_v33 = vmul.f32 %v10199_v60, %v10199_v60  ;;  %v881_v29 = vmul.f32 %v10211_v63, %v10211_v63  ;;  %v15093_v63 = vld [vmem:[#allocation19_spill] sm:$0xff] }
 0x22b   :  { %v937_v36 = vadd.f32 %v936_v23, %v874_v9  ;;  %v9438_v23 = vld [vmem:[#allocation8 + $0xf8] sm:$0xff]  }
 0x22c   :  { %8851 = vmatprep.subr.bf16.mxu1 %v9438_v23 }
 0x22d   :  { %v938_v37 = vadd.f32 %v937_v36, %v875_v25  ;;  %8859 = vmatpush3.bf16.msra.mxu1 %v9438_v23  ;;  %v880_v36 = vmul.f32 %v10207_v55, %v10207_v55  ;;  %v884_v23 = vmul.f32 %v10223_v7, %v10223_v7 }
 0x22f   :  { %v939_v45 = vadd.f32 %v938_v37, %v876_v21  ;;  %v10378_v37 = vld [vmem:[#allocation8 + $0x100] sm:$0xff]  }
 0x230   :  { %15092 = vst [vmem:[#allocation38_spill] sm:$0xff] %v10378_v37  ;;  %8364 = vmatprep.subr.bf16.mxu1 %v10378_v37  ;;  %v15094_v37 = vld [vmem:[#allocation16_spill] sm:$0xff] }
 0x231   :  { %v940_v9 = vadd.f32 %v939_v45, %v877_v28  ;;  %v882_v28 = vmul.f32 %v10215_v12, %v10215_v12  ;;  %v887_v12 = vmul.f32 %v15094_v37, %v15094_v37 }
 0x233   :  { %v941_v25 = vadd.f32 %v940_v9, %v878_v33  ;;  %v883_v33 = vmul.f32 %v10219_v17, %v10219_v17 }
 0x235   :  { %v942_v21 = vadd.f32 %v941_v25, %v879_v57  ;;  %v885_v25 = vmul.f32 %v10227_v15, %v10227_v15 }
 0x237   :  { %v943_v20 = vadd.f32 %v942_v21, %v880_v36  ;;  %v886_v36 = vmul.f32 %v15093_v63, %v15093_v63 }
 0x239   :  { %v944_v45 = vadd.f32 %v943_v20, %v881_v29  ;;  %v15095_v20 = vld [vmem:[#allocation18_spill] sm:$0xff] }
 0x23a   :  { %v888_v17 = vmul.f32 %v15095_v20, %v15095_v20 }
 0x23b   :  { %v945_v9 = vadd.f32 %v944_v45, %v882_v28  ;;  %v15096_v45 = vld [vmem:[#allocation21_spill] sm:$0xff] }
 0x23c   :  { %v889_v7 = vmul.f32 %v15096_v45, %v15096_v45  ;;  %v975_v45 = vlaneseq }
 0x23d   :  { %v946_v57 = vadd.f32 %v945_v9, %v883_v33  ;;  %v15097_v9 = vld [vmem:[#allocation23_spill] sm:$0xff] }
 0x23e   :  { %v890_v15 = vmul.f32 %v15097_v9, %v15097_v9 }
 0x23f   :  { %v947_v61 = vadd.f32 %v946_v57, %v884_v23  ;;  %v15098_v57 = vld [vmem:[#allocation20_spill] sm:$0xff] }
 0x240   :  { %v891_v63 = vmul.f32 %v15098_v57, %v15098_v57 }
 0x241   :  { %v948_v21 = vadd.f32 %v947_v61, %v885_v25  ;;  %v892_v25 = vmul.f32 %v10255_v4, %v10255_v4 }
 0x243   :  { %v949_v29 = vadd.f32 %v948_v21, %v886_v36  ;;  %v893_v21 = vmul.f32 %v10259_v53, %v10259_v53 }
 0x245   :  { %v950_v28 = vadd.f32 %v949_v29, %v887_v12  ;;  %v894_v29 = vmul.f32 %v10263_v5, %v10263_v5 }
 0x247   :  { %v951_v33 = vadd.f32 %v950_v28, %v888_v17  ;;  %v895_v28 = vmul.f32 %v10267_v13, %v10267_v13 }
 0x249   :  { %v952_v23 = vadd.f32 %v951_v33, %v889_v7  ;;  %v15099_v33 = vld [vmem:[#allocation26_spill] sm:$0xff] }
 0x24a   :  { %v896_v57 = vmul.f32 %v15099_v33, %v15099_v33 }
 0x24b   :  { %v953_v61 = vadd.f32 %v952_v23, %v890_v15  ;;  %v15100_v23 = vld [vmem:[#allocation28_spill] sm:$0xff] }
 0x24c   :  { %v897_v4 = vmul.f32 %v15100_v23, %v15100_v23 }
 0x24d   :  { %v954_v36 = vadd.f32 %v953_v61, %v891_v63  ;;  %v15101_v61 = vld [vmem:[#allocation36_spill] sm:$0xff] }
 0x24e   :  { %v898_v53 = vmul.f32 %v15101_v61, %v15101_v61 }
 0x24f   :  { %v955_v12 = vadd.f32 %v954_v36, %v892_v25  ;;  %v15102_v36 = vld [vmem:[#allocation37_spill] sm:$0xff] }
 0x250   :  { %v899_v5 = vmul.f32 %v15102_v36, %v15102_v36 }
 0x251   :  { %v956_v17 = vadd.f32 %v955_v12, %v893_v21  ;;  %v900_v12 = vmul.f32 %v10287_v31, %v10287_v31 }
 0x253   :  { %v957_v7 = vadd.f32 %v956_v17, %v894_v29 }
 0x255   :  { %v958_v15 = vadd.f32 %v957_v7, %v895_v28 }
 0x257   :  { %v959_v63 = vadd.f32 %v958_v15, %v896_v57 }
 0x259   :  { %v960_v25 = vadd.f32 %v959_v63, %v897_v4  ;;  %v976_v4 = vshrl.u32 %v975_v45, 7  ;;  %v9706_v45 = vmov 0.0  }
 0x25b   :  { %v961_v21 = vadd.f32 %v960_v25, %v898_v53  ;;  %v701_v53 = vld [vmem:[%s14682_s4] sm:$0x1]  ;;  %v10424_v63 = vsub.s32 0, %v976_v4 }
 0x25d   :  { %v962_v29 = vadd.f32 %v961_v21, %v899_v5  ;;  %15103 = vst [vmem:[#allocation16_spill] sm:$0xff] %v10424_v63 }
 0x25f   :  { %v963_v17 = vadd.f32 %v962_v29, %v900_v12  ;;  %v15106_v29 = vld [vmem:[#allocation30_spill] sm:$0xff] }
 0x261   :  { %v964_v13 = vrot.slane %v963_v17, 4 }
 0x263   :  { %v965_v33 = vadd.f32 %v964_v13, %v963_v17  ;;  %v10432_v13 = vld [vmem:[%s14683_s5] ss:$0 sm:$0xff] }
 0x265   :  { %v966_v28 = vrot.slane %v965_v33, 2 }
 0x267   :  { %v967_v7 = vadd.f32 %v966_v28, %v965_v33  ;;  %v10436_v33 = vrot.slane %v9706_v45, 7  ;;  %v15107_v28 = vld [vmem:[#allocation31_spill] sm:$0xff] }
 0x269   :  { %v968_v9 = vrot.slane %v967_v7, 1  ;;  %15104 = vst [vmem:[#allocation18_spill] sm:$0xff] %v10436_v33  ;;  %v15123_v33 = vld [vmem:[#allocation20_spill] sm:$0xff] }
 0x26b   :  { %v969_v23 = vadd.f32 %v968_v9, %v967_v7 }
 0x26d   :  { %v970_v57 = vmul.f32 0.001953125, %v969_v23  ;;  %v15105_v23 = vld [vmem:[#allocation29_spill] sm:$0xff] }
 0x26f   :  { %v971_v15 = vadd.f32 1e-05, %v970_v57  ;;  %v10450_v57 = vrot.slane %v9706_v45, 1  ;;  %v15110_v45 = vld [vmem:[#allocation32_spill] sm:$0xff] }
 0x271   :  { %9535 = vrsqrt.f32 %v971_v15  ;;  %15108 = vst [vmem:[#allocation36_spill] sm:$0xff] %v10450_v57  ;;  %v15119_v57 = vld [vmem:[#allocation21_spill] sm:$0xff] }
 0x27b   :  { %v9536_v25 = vpop.eup %9535 }
 0x27c   :  { %v973_v5 = vmul.f32 %v9536_v25, %v701_v53 }
 0x27e   :  { %v10427_v21 = vrot.slane %v973_v5, %v10424_v63  ;;  %v15115_v63 = vld [vmem:[#allocation19_spill] sm:$0xff] }
 0x280   :  { %v1041_v9 = vmul.f32 %v10427_v21, %v15101_v61  ;;  %v10440_v12 = vmul.f32 %v10427_v21, %v15105_v23  ;;  %v10444_v17 = vmul.f32 %v10427_v21, %v15106_v29  ;;  %v10448_v7 = vmul.f32 %v10427_v21, %v15107_v28  ;;  %v15111_v23 = vld [vmem:[#allocation33_spill] sm:$0xff]  ;;  %v15112_v29 = vld [vmem:[#allocation34_spill] sm:$0xff]  ;;  %v15113_v28 = vld [vmem:[#allocation35_spill] sm:$0xff] }
 0x281   :  { %v10455_v61 = vmul.f32 %v10427_v21, %v10047_v39  ;;  %v10459_v4 = vmul.f32 %v10427_v21, %v10051_v52  ;;  %v10463_v53 = vmul.f32 %v10427_v21, %v10055_v41  ;;  %v10467_v25 = vmul.f32 %v10427_v21, %v10059_v43 }
 0x282   :  { %v1111_v15 = vadd.f32 %v10432_v13, %v1041_v9  ;;  %v10471_v5 = vmul.f32 %v10427_v21, %v10063_v40  ;;  %v10475_v39 = vmul.f32 %v10427_v21, %v10067_v42  ;;  %v10479_v52 = vmul.f32 %v10427_v21, %v10071_v48 }
 0x283   :  { %v10483_v41 = vmul.f32 %v10427_v21, %v10075_v51  ;;  %v10487_v43 = vmul.f32 %v10427_v21, %v10079_v46  ;;  %v10491_v40 = vmul.f32 %v10427_v21, %v10083_v50  ;;  %v10495_v42 = vmul.f32 %v10427_v21, %v10087_v56 }
 0x284   :  { %v10497_v9 = vmax.f32 %v1111_v15, 0.0  ;;  %v10501_v48 = vmul.f32 %v10427_v21, %v10091_v59  ;;  %v10505_v51 = vmul.f32 %v10427_v21, %v10095_v54  ;;  %v10509_v46 = vmul.f32 %v10427_v21, %v10099_v58  ;;  %v15114_v15 = vld [vmem:[#allocation17_spill] sm:$0xff] }
 0x285   :  { %v10513_v50 = vmul.f32 %v10427_v21, %v10103_v0  ;;  %v10517_v56 = vmul.f32 %v10427_v21, %v10107_v3  ;;  %v10521_v59 = vmul.f32 %v10427_v21, %v10111_v62  ;;  %v10525_v54 = vmul.f32 %v10427_v21, %v10115_v2 }
 0x286   :  { %15109 = vst [vmem:[#allocation37_spill] sm:$0xff] %v10497_v9  ;;  %v10529_v58 = vmul.f32 %v10427_v21, %v10119_v8  ;;  %v10533_v0 = vmul.f32 %v10427_v21, %v10123_v11  ;;  %v10537_v3 = vmul.f32 %v10427_v21, %v10127_v6  ;;  %v10541_v62 = vmul.f32 %v10427_v21, %v10131_v10  ;;  %v15121_v9 = vld [vmem:[#allocation23_spill] sm:$0xff] }
 0x287   :  { %v10545_v2 = vmul.f32 %v10427_v21, %v10135_v16  ;;  %v10549_v8 = vmul.f32 %v10427_v21, %v10139_v19  ;;  %v10553_v11 = vmul.f32 %v10427_v21, %v10143_v14  ;;  %v10557_v6 = vmul.f32 %v10427_v21, %v10147_v18 }
 0x288   :  { %v10561_v10 = vmul.f32 %v10427_v21, %v10151_v24  ;;  %v10565_v16 = vmul.f32 %v10427_v21, %v10155_v27  ;;  %v10569_v19 = vmul.f32 %v10427_v21, %v10159_v22  ;;  %v10573_v14 = vmul.f32 %v10427_v21, %v10163_v26 }
 0x289   :  { %v10577_v18 = vmul.f32 %v10427_v21, %v10167_v32  ;;  %v10581_v24 = vmul.f32 %v10427_v21, %v10171_v35  ;;  %v10585_v27 = vmul.f32 %v10427_v21, %v10175_v30  ;;  %v10589_v22 = vmul.f32 %v10427_v21, %v10179_v34 }
 0x28a   :  { %v10593_v26 = vmul.f32 %v10427_v21, %v10183_v44  ;;  %v10597_v32 = vmul.f32 %v10427_v21, %v10187_v49  ;;  %v10601_v35 = vmul.f32 %v10427_v21, %v10191_v38  ;;  %v10605_v30 = vmul.f32 %v10427_v21, %v10195_v47 }
 0x28b   :  { %v10609_v34 = vmul.f32 %v10427_v21, %v10199_v60  ;;  %v10613_v44 = vmul.f32 %v10427_v21, %v10203_v1  ;;  %v10617_v49 = vmul.f32 %v10427_v21, %v10207_v55  ;;  %v10621_v38 = vmul.f32 %v10427_v21, %v15110_v45 }
 0x28c   :  { %v10625_v47 = vmul.f32 %v10427_v21, %v15111_v23  ;;  %v10629_v60 = vmul.f32 %v10427_v21, %v15112_v29  ;;  %v10633_v1 = vmul.f32 %v10427_v21, %v15113_v28  ;;  %v10637_v55 = vmul.f32 %v10427_v21, %v15114_v15 }
 0x28d   :  { %v10641_v45 = vmul.f32 %v10427_v21, %v15115_v63  ;;  %v10645_v23 = vmul.f32 %v10427_v21, %v15094_v37  ;;  %v10649_v29 = vmul.f32 %v10427_v21, %v15095_v20  ;;  %v10653_v28 = vmul.f32 %v10427_v21, %v15119_v57 }
 0x28e   :  { %v10657_v15 = vmul.f32 %v10427_v21, %v15121_v9  ;;  %v10661_v63 = vmul.f32 %v10427_v21, %v15123_v33 }
 0x28f   :  { %15116 = vst [vmem:[#allocation29_spill] sm:$0xff] %v10641_v45  ;;  %15117 = vst [vmem:[#allocation30_spill] sm:$0xff] %v10645_v23  ;;  %v15125_v45 = vld [vmem:[#allocation22_spill] sm:$0xff]  ;;  %v15126_v23 = vld [vmem:[#allocation25_spill] sm:$0xff] }
 0x290   :  { %15118 = vst [vmem:[#allocation31_spill] sm:$0xff] %v10649_v29  ;;  %15120 = vst [vmem:[#allocation32_spill] sm:$0xff] %v10653_v28  ;;  %v10665_v37 = vmul.f32 %v10427_v21, %v15125_v45  ;;  %v10669_v20 = vmul.f32 %v10427_v21, %v15126_v23  ;;  %v15127_v29 = vld [vmem:[#allocation27_spill] sm:$0xff]  ;;  %v15128_v28 = vld [vmem:[#allocation24_spill] sm:$0xff]  ;;  %v10689_v23 = vmul.f32 %v10427_v21, %v15102_v36 }
 0x291   :  { %15122 = vst [vmem:[#allocation33_spill] sm:$0xff] %v10657_v15  ;;  %15124 = vst [vmem:[#allocation34_spill] sm:$0xff] %v10661_v63  ;;  %v10673_v57 = vmul.f32 %v10427_v21, %v15127_v29  ;;  %v10677_v9 = vmul.f32 %v10427_v21, %v15128_v28  ;;  %v15129_v15 = vld [vmem:[#allocation26_spill] sm:$0xff]  ;;  %v15130_v63 = vld [vmem:[#allocation28_spill] sm:$0xff]  ;;  %v10693_v29 = vmul.f32 %v10427_v21, %v10287_v31 }
 0x292   :  { %v10681_v33 = vmul.f32 %v10427_v21, %v15129_v15  ;;  %v10685_v45 = vmul.f32 %v10427_v21, %v15130_v63  ;;  %v10697_v28 = vadd.f32 %v10432_v13, %v10440_v12  ;;  %v10701_v15 = vadd.f32 %v10432_v13, %v10444_v17  ;;  %v10719_v12 = vld [vmem:[#allocation8] sm:$0xff]  }
 0x293   :  { %v10705_v63 = vadd.f32 %v10432_v13, %v10448_v7  ;;  %v10709_v36 = vadd.f32 %v10432_v13, %v10455_v61  ;;  %v10713_v31 = vadd.f32 %v10432_v13, %v10459_v4  ;;  %v10717_v21 = vadd.f32 %v10432_v13, %v10463_v53  ;;  %15131 = vst [vmem:[#allocation35_spill] sm:$0xff] %v10719_v12 }
 0x294   :  { %v10723_v17 = vadd.f32 %v10432_v13, %v10467_v25  ;;  %v10727_v7 = vadd.f32 %v10432_v13, %v10471_v5  ;;  %v10731_v61 = vadd.f32 %v10432_v13, %v10475_v39  ;;  %v10735_v4 = vadd.f32 %v10432_v13, %v10479_v52  ;;  %8124 = vmatprep.subr.bf16.mxu0 %v10719_v12 }
 0x295   :  { %v10739_v53 = vadd.f32 %v10432_v13, %v10483_v41  ;;  %v10743_v25 = vadd.f32 %v10432_v13, %v10487_v43  ;;  %v10747_v5 = vadd.f32 %v10432_v13, %v10491_v40  ;;  %v10751_v39 = vadd.f32 %v10432_v13, %v10495_v42 }
 0x296   :  { %v1064_v52 = vadd.f32 %v10432_v13, %v10501_v48  ;;  %v1065_v41 = vadd.f32 %v10432_v13, %v10505_v51  ;;  %v1066_v43 = vadd.f32 %v10432_v13, %v10509_v46  ;;  %v1068_v40 = vadd.f32 %v10432_v13, %v10517_v56 }
 0x297   :  { %15132 = vst [vmem:[#allocation17_spill] sm:$0xff] %v10743_v25  ;;  %v1067_v25 = vadd.f32 %v10432_v13, %v10513_v50  ;;  %v1069_v42 = vadd.f32 %v10432_v13, %v10521_v59  ;;  %v1070_v12 = vadd.f32 %v10432_v13, %v10525_v54  ;;  %v1071_v48 = vadd.f32 %v10432_v13, %v10529_v58 }
 0x298   :  { %v1072_v51 = vadd.f32 %v10432_v13, %v10533_v0  ;;  %v1073_v46 = vadd.f32 %v10432_v13, %v10537_v3  ;;  %v1074_v50 = vadd.f32 %v10432_v13, %v10541_v62  ;;  %v1075_v56 = vadd.f32 %v10432_v13, %v10545_v2 }
 0x299   :  { %v1076_v59 = vadd.f32 %v10432_v13, %v10549_v8  ;;  %v1077_v54 = vadd.f32 %v10432_v13, %v10553_v11  ;;  %v10784_v58 = vadd.f32 %v10432_v13, %v10565_v16  ;;  %v10788_v0 = vadd.f32 %v10432_v13, %v10569_v19 }
 0x29a   :  { %v1078_v3 = vadd.f32 %v10432_v13, %v10557_v6  ;;  %v1079_v62 = vadd.f32 %v10432_v13, %v10561_v10  ;;  %v10796_v2 = vadd.f32 %v10432_v13, %v10573_v14  ;;  %v10800_v8 = vadd.f32 %v10432_v13, %v10577_v18 }
 0x29b   :  { %v10804_v11 = vadd.f32 %v10432_v13, %v10581_v24  ;;  %v10808_v16 = vadd.f32 %v10432_v13, %v10585_v27  ;;  %v10812_v6 = vadd.f32 %v10432_v13, %v10589_v22  ;;  %v10816_v10 = vadd.f32 %v10432_v13, %v10593_v26 }
 0x29c   :  { %v10820_v19 = vadd.f32 %v10432_v13, %v10597_v32  ;;  %v10824_v14 = vadd.f32 %v10432_v13, %v10601_v35  ;;  %v10828_v18 = vadd.f32 %v10432_v13, %v10605_v30  ;;  %v10832_v24 = vadd.f32 %v10432_v13, %v10609_v34 }
 0x29d   :  { %v10836_v27 = vadd.f32 %v10432_v13, %v10613_v44  ;;  %v10840_v22 = vadd.f32 %v10432_v13, %v10617_v49  ;;  %v10844_v26 = vadd.f32 %v10432_v13, %v10621_v38  ;;  %v10848_v32 = vadd.f32 %v10432_v13, %v10625_v47  ;;  %v15137_v44 = vld [vmem:[#allocation29_spill] sm:$0xff]  ;;  %v15138_v38 = vld [vmem:[#allocation30_spill] sm:$0xff] }
 0x29e   :  { %v10852_v35 = vadd.f32 %v10432_v13, %v10629_v60  ;;  %v10856_v30 = vadd.f32 %v10432_v13, %v10633_v1  ;;  %v10860_v34 = vadd.f32 %v10432_v13, %v10637_v55  ;;  %v10864_v49 = vadd.f32 %v10432_v13, %v15137_v44 }
 0x29f   :  { %15133 = vst [vmem:[#allocation19_spill] sm:$0xff] %v10848_v32  ;;  %v10868_v47 = vadd.f32 %v10432_v13, %v15138_v38  ;;  %v15139_v32 = vld [vmem:[#allocation31_spill] sm:$0xff]  ;;  %v10888_v38 = vadd.f32 %v10432_v13, %v10665_v37  ;;  %v10908_v37 = vadd.f32 %v10432_v13, %v10685_v45  ;;  %v10928_v45 = vmax.f32 %v10709_v36, 0.0  ;;  %v15151_v36 = vld [vmem:[#allocation17_spill] sm:$0xff] }
 0x2a0   :  { %15134 = vst [vmem:[#allocation21_spill] sm:$0xff] %v10852_v35  ;;  %15135 = vst [vmem:[#allocation23_spill] sm:$0xff] %v10856_v30  ;;  %v10872_v60 = vadd.f32 %v10432_v13, %v15139_v32  ;;  %v15140_v35 = vld [vmem:[#allocation32_spill] sm:$0xff]  ;;  %v15141_v30 = vld [vmem:[#allocation33_spill] sm:$0xff]  ;;  %v10892_v32 = vadd.f32 %v10432_v13, %v10669_v20  ;;  %v10912_v20 = vadd.f32 %v10432_v13, %v10689_v23  ;;  %v10934_v23 = vmax.f32 %v10717_v21, 0.0 }
 0x2a1   :  { %15136 = vst [vmem:[#allocation20_spill] sm:$0xff] %v10860_v34  ;;  %v10876_v1 = vadd.f32 %v10432_v13, %v15140_v35  ;;  %v10880_v55 = vadd.f32 %v10432_v13, %v15141_v30  ;;  %v15142_v34 = vld [vmem:[#allocation34_spill] sm:$0xff]  ;;  %v10896_v35 = vadd.f32 %v10432_v13, %v10673_v57  ;;  %v10900_v30 = vadd.f32 %v10432_v13, %v10677_v9 }
 0x2a2   :  { %v10884_v44 = vadd.f32 %v10432_v13, %v15142_v34  ;;  %v10904_v34 = vadd.f32 %v10432_v13, %v10681_v33  ;;  %15144 = vst [vmem:[#allocation25_spill] sm:$0xff] %v10908_v37  ;;  %v10916_v57 = vadd.f32 %v10432_v13, %v10693_v29  ;;  %v10922_v9 = vmax.f32 %v10701_v15, 0.0  ;;  %15147 = vst [vmem:[#allocation26_spill] sm:$0xff] %v10928_v45 }
 0x2a3   :  { %15143 = vst [vmem:[#allocation22_spill] sm:$0xff] %v10896_v35  ;;  %v10919_v35 = vmax.f32 %v10697_v28, 0.0  ;;  %v10925_v33 = vmax.f32 %v10705_v63, 0.0  ;;  %v10931_v37 = vmax.f32 %v10713_v31, 0.0  ;;  %v10937_v13 = vmax.f32 %v10723_v17, 0.0 }
 0x2a4   :  { %15146 = vst [vmem:[#allocation24_spill] sm:$0xff] %v10922_v9  ;;  %v10940_v29 = vmax.f32 %v10727_v7, 0.0  ;;  %v10943_v28 = vmax.f32 %v10731_v61, 0.0  ;;  %v10946_v15 = vmax.f32 %v10735_v4, 0.0  ;;  %v10949_v63 = vmax.f32 %v10739_v53, 0.0 }
 0x2a5   :  { %15145 = vst [vmem:[#allocation27_spill] sm:$0xff] %v10919_v35  ;;  %v10952_v31 = vmax.f32 %v15151_v36, 0.0  ;;  %v10955_v21 = vmax.f32 %v10747_v5, 0.0  ;;  %v10958_v17 = vmax.f32 %v10751_v39, 0.0  ;;  %v10960_v7 = vmax.f32 %v1064_v52, 0.0 }
 0x2a6   :  { %15148 = vst [vmem:[#allocation28_spill] sm:$0xff] %v10940_v29  ;;  %15149 = vst [vmem:[#allocation29_spill] sm:$0xff] %v10946_v15  ;;  %v10962_v29 = vmax.f32 %v1065_v41, 0.0  ;;  %v10964_v61 = vmax.f32 %v1066_v43, 0.0  ;;  %v10966_v4 = vmax.f32 %v1067_v25, 0.0  ;;  %v10968_v15 = vmax.f32 %v1068_v40, 0.0 }
 0x2a7   :  { %15150 = vst [vmem:[#allocation30_spill] sm:$0xff] %v10949_v63  ;;  %15152 = vst [vmem:[#allocation31_spill] sm:$0xff] %v10952_v31  ;;  %v10970_v53 = vmax.f32 %v1069_v42, 0.0  ;;  %v10972_v36 = vmax.f32 %v1070_v12, 0.0  ;;  %v10974_v31 = vmax.f32 %v1071_v48, 0.0  ;;  %v10976_v5 = vmax.f32 %v1072_v51, 0.0 }
 0x2a8   :  { %15153 = vst [vmem:[#allocation32_spill] sm:$0xff] %v10955_v21  ;;  %15154 = vst [vmem:[#allocation33_spill] sm:$0xff] %v10958_v17  ;;  %v10978_v39 = vmax.f32 %v1073_v46, 0.0  ;;  %v10980_v52 = vmax.f32 %v1074_v50, 0.0  ;;  %v10982_v41 = vmax.f32 %v1075_v56, 0.0  ;;  %v10984_v43 = vmax.f32 %v1076_v59, 0.0 }
 0x2a9   :  { %15155 = vst [vmem:[#allocation34_spill] sm:$0xff] %v10960_v7  ;;  %15156 = vst [vmem:[#allocation17_spill] sm:$0xff] %v10962_v29  ;;  %v10986_v25 = vmax.f32 %v1077_v54, 0.0  ;;  %v10988_v40 = vmax.f32 %v1078_v3, 0.0  ;;  %v10990_v42 = vmax.f32 %v1079_v62, 0.0  ;;  %v10993_v12 = vmax.f32 %v10784_v58, 0.0 }
 0x2aa   :  { %15157 = vst [vmem:[#allocation39_spill] sm:$0xff] %v10966_v4  ;;  %15158 = vst [vmem:[#allocation40_spill] sm:$0xff] %v10968_v15  ;;  %v10996_v48 = vmax.f32 %v10788_v0, 0.0  ;;  %v10999_v51 = vmax.f32 %v10796_v2, 0.0  ;;  %v11002_v46 = vmax.f32 %v10800_v8, 0.0  ;;  %v11005_v50 = vmax.f32 %v10804_v11, 0.0 }
 0x2ab   :  { %15159 = vst [vmem:[#allocation41_spill] sm:$0xff] %v10970_v53  ;;  %15160 = vst [vmem:[#allocation42_spill] sm:$0xff] %v10974_v31  ;;  %v11008_v56 = vmax.f32 %v10808_v16, 0.0  ;;  %v11011_v59 = vmax.f32 %v10812_v6, 0.0  ;;  %v11014_v54 = vmax.f32 %v10816_v10, 0.0  ;;  %v11017_v58 = vmax.f32 %v10820_v19, 0.0 }
 0x2ac   :  { %15161 = vst [vmem:[#allocation43_spill] sm:$0xff] %v10976_v5  ;;  %15162 = vst [vmem:[#allocation44_spill] sm:$0xff] %v10978_v39  ;;  %v11020_v0 = vmax.f32 %v10824_v14, 0.0  ;;  %v11023_v3 = vmax.f32 %v10828_v18, 0.0  ;;  %v11026_v62 = vmax.f32 %v10832_v24, 0.0  ;;  %v11029_v2 = vmax.f32 %v10836_v27, 0.0 }
 0x2ad   :  { %15163 = vst [vmem:[#allocation45_spill] sm:$0xff] %v10982_v41  ;;  %15164 = vst [vmem:[#allocation46_spill] sm:$0xff] %v10984_v43  ;;  %v11032_v8 = vmax.f32 %v10840_v22, 0.0  ;;  %v11035_v11 = vmax.f32 %v10844_v26, 0.0  ;;  %v15181_v16 = vld [vmem:[#allocation19_spill] sm:$0xff]  ;;  %v15183_v10 = vld [vmem:[#allocation21_spill] sm:$0xff] }
 0x2ae   :  { %15165 = vst [vmem:[#allocation47_spill] sm:$0xff] %v10986_v25  ;;  %15166 = vst [vmem:[#allocation48_spill] sm:$0xff] %v10988_v40  ;;  %v11038_v6 = vmax.f32 %v15181_v16, 0.0  ;;  %v11041_v19 = vmax.f32 %v15183_v10, 0.0  ;;  %v15185_v14 = vld [vmem:[#allocation23_spill] sm:$0xff]  ;;  %v15187_v24 = vld [vmem:[#allocation20_spill] sm:$0xff] }
 0x2af   :  { %15167 = vst [vmem:[#allocation49_spill] sm:$0xff] %v10990_v42  ;;  %15168 = vst [vmem:[#allocation50_spill] sm:$0xff] %v10993_v12  ;;  %v11044_v18 = vmax.f32 %v15185_v14, 0.0  ;;  %v11050_v27 = vmax.f32 %v10864_v49, 0.0  ;;  %v11053_v22 = vmax.f32 %v10868_v47, 0.0  ;;  %v11056_v26 = vmax.f32 %v10872_v60, 0.0 }
 0x2b0   :  { %15169 = vst [vmem:[#allocation51_spill] sm:$0xff] %v10996_v48  ;;  %15170 = vst [vmem:[#allocation52_spill] sm:$0xff] %v10999_v51  ;;  %v11047_v48 = vmax.f32 %v15187_v24, 0.0  ;;  %v11059_v16 = vmax.f32 %v10876_v1, 0.0  ;;  %v11062_v10 = vmax.f32 %v10880_v55, 0.0  ;;  %v11065_v14 = vmax.f32 %v10884_v44, 0.0 }
 0x2b1   :  { %15171 = vst [vmem:[#allocation53_spill] sm:$0xff] %v11002_v46  ;;  %15172 = vst [vmem:[#allocation54_spill] sm:$0xff] %v11008_v56  ;;  %v11068_v24 = vmax.f32 %v10888_v38, 0.0  ;;  %v11071_v49 = vmax.f32 %v10892_v32, 0.0  ;;  %v15197_v47 = vld [vmem:[#allocation22_spill] sm:$0xff]  ;;  %v11077_v60 = vmax.f32 %v10900_v30, 0.0  ;;  %v11090_v38 = vpack.c.bf16 %v10922_v9, %v10919_v35 }
 0x2b2   :  { %15173 = vst [vmem:[#allocation55_spill] sm:$0xff] %v11011_v59  ;;  %15174 = vst [vmem:[#allocation56_spill] sm:$0xff] %v11014_v54  ;;  %v11074_v12 = vmax.f32 %v15197_v47, 0.0  ;;  %v11080_v1 = vmax.f32 %v10904_v34, 0.0  ;;  %v15201_v55 = vld [vmem:[#allocation25_spill] sm:$0xff]  ;;  %v11086_v44 = vmax.f32 %v10912_v20, 0.0  ;;  %v11097_v30 = vpack.c.bf16 %v10928_v45, %v10925_v33 }
 0x2b3   :  { %15175 = vst [vmem:[#allocation57_spill] sm:$0xff] %v11017_v58  ;;  %15176 = vst [vmem:[#allocation58_spill] sm:$0xff] %v11020_v0  ;;  %v11083_v42 = vmax.f32 %v15201_v55, 0.0  ;;  %v11093_v32 = vmax.f32 %v10916_v57, 0.0  ;;  %v1651_v34 = vrot.slane %v10999_v51, 7  ;;  %v1653_v47 = vrot.slane %v11002_v46, 7  ;;  %8061 = vmatmul.mubr.bf16.vlgmr.msra.gmra.mrb[64].mxu0 %v11090_v38 }
 0x2b4   :  { %15177 = vst [vmem:[#allocation59_spill] sm:$0xff] %v11023_v3  ;;  %15178 = vst [vmem:[#allocation60_spill] sm:$0xff] %v11026_v62  ;;  %v9451_v55 = vld [vmem:[#allocation8 + $0x8] sm:$0xff]   ;;  %v1656_v20 = vrot.slane %v11005_v50, 7  ;;  %v1658_v40 = vrot.slane %v11008_v56, 7  ;;  %v1663_v57 = vrot.slane %v11014_v54, 7  ;;  %8064 = vmatprep.mubr.bf16.mxu0 %v11097_v30 }
 0x2b5   :  { %15179 = vst [vmem:[#allocation61_spill] sm:$0xff] %v11032_v8  ;;  %15180 = vst [vmem:[#allocation62_spill] sm:$0xff] %v11035_v11  ;;  %v15207_v51 = vld [vmem:[#allocation18_spill] sm:$0xff]  ;;  %v9440_v9 = vld [vmem:[#allocation8 + $0x108] sm:$0xff]   ;;  %v1666_v35 = vrot.slane %v11017_v58, 7 }
 0x2b6   :  { %15182 = vst [vmem:[#allocation19_spill] sm:$0xff] %v11038_v6  ;;  %15184 = vst [vmem:[#allocation21_spill] sm:$0xff] %v11041_v19  ;;  %v1652_v46 = vsel %vm1564_vm0, %v15207_v51, %v1651_v34  ;;  %v1657_v56 = vsel %vm1564_vm0, %v15207_v51, %v1656_v20 }
 0x2b7   :  { %15186 = vst [vmem:[#allocation23_spill] sm:$0xff] %v11044_v18  ;;  %15188 = vst [vmem:[#allocation20_spill] sm:$0xff] %v11047_v48 }
 0x2b8   :  { %15189 = vst [vmem:[#allocation63_spill] sm:$0xff] %v11050_v27  ;;  %15190 = vst [vmem:[#allocation64_spill] sm:$0xff] %v11053_v22 }
 0x2b9   :  { %15191 = vst [vmem:[#allocation65_spill] sm:$0xff] %v11056_v26  ;;  %15192 = vst [vmem:[#allocation66_spill] sm:$0xff] %v11059_v16 }
 0x2ba   :  { %15193 = vst [vmem:[#allocation67_spill] sm:$0xff] %v11062_v10  ;;  %15194 = vst [vmem:[#allocation68_spill] sm:$0xff] %v11065_v14 }
 0x2bb   :  { %15195 = vst [vmem:[#allocation69_spill] sm:$0xff] %v11068_v24  ;;  %15196 = vst [vmem:[#allocation70_spill] sm:$0xff] %v11071_v49 }
 0x2bc   :  { %15198 = vst [vmem:[#allocation22_spill] sm:$0xff] %v11074_v12  ;;  %15199 = vst [vmem:[#allocation71_spill] sm:$0xff] %v11077_v60 }
 0x2bd   :  { %15200 = vst [vmem:[#allocation72_spill] sm:$0xff] %v11080_v1  ;;  %15202 = vst [vmem:[#allocation25_spill] sm:$0xff] %v11083_v42  ;;  %v1654_v42 = vsel %vm1564_vm0, %v1651_v34, %v1653_v47  ;;  %v1671_v34 = vrot.slane %v11023_v3, 7  ;;  %v1681_v3 = vrot.slane %v11035_v11, 7 }
 0x2be   :  { %15203 = vst [vmem:[#allocation73_spill] sm:$0xff] %v11086_v44  ;;  %15204 = vst [vmem:[#allocation74_spill] sm:$0xff] %v11090_v38  ;;  %v1661_v44 = vrot.slane %v11011_v59, 7  ;;  %v11112_v38 = vpack.c.bf16 %v1654_v42, %v1652_v46  ;;  %v1659_v59 = vsel %vm1564_vm0, %v1656_v20, %v1658_v40  ;;  %v1668_v42 = vrot.slane %v11020_v0, 7 }
 0x2bf   :  { %15205 = vst [vmem:[#allocation75_spill] sm:$0xff] %v11093_v32  ;;  %15206 = vst [vmem:[#allocation76_spill] sm:$0xff] %v11097_v30  ;;  %v15209_v32 = vld [vmem:[#allocation35_spill] sm:$0xff]  ;;  %v11120_v45 = vpack.c.bf16 %v1659_v59, %v1657_v56  ;;  %v9452_v56 = vld [vmem:[#allocation8 + $0x10] sm:$0xff]   ;;  %v11134_v59 = vpack.c.bf16 %v10934_v23, %v10931_v37  ;;  %v1676_v20 = vrot.slane %v11029_v2, 7  ;;  %v1672_v46 = vsel %vm1564_vm0, %v15207_v51, %v1671_v34 }
 0x2c0   :  { %15208 = vst [vmem:[#allocation18_spill] sm:$0xff] %v11112_v38  ;;  %v1662_v54 = vsel %vm1564_vm0, %v15207_v51, %v1661_v44  ;;  %8125 = vmatpush3.bf16.msra.mxu0 %v15209_v32  ;;  %v1664_v30 = vsel %vm1564_vm0, %v1661_v44, %v1663_v57  ;;  %8332 = vmatprep.mubr.bf16.mxu1 %v11112_v38  ;;  %v1673_v32 = vrot.slane %v11026_v62, 7  ;;  %v1678_v38 = vrot.slane %v11032_v8, 7 }
 0x2c1   :  { %15210 = vst [vmem:[#allocation35_spill] sm:$0xff] %v11120_v45  ;;  %8126 = vmatprep.subr.bf16.mxu0 %v9451_v55  ;;  %v11127_v40 = vpack.c.bf16 %v1664_v30, %v1662_v54  ;;  %8333 = vmatmul.mubr.bf16.vlgmr.msra.gmra.mrb[0].mxu1 %v11120_v45  ;;  %15212 = vst [vmem:[#allocation78_spill] sm:$0xff] %v11134_v59  ;;  %v1667_v44 = vsel %vm1564_vm0, %v15207_v51, %v1666_v35  ;;  %v15213_v54 = vld [vmem:[#allocation38_spill] sm:$0xff]  ;;  %v15214_v30 = vld [vmem:[#allocation28_spill] sm:$0xff]  ;;  %v1683_v0 = vrot.slane %v11038_v6, 7 }
 0x2c2   :  { %v1669_v47 = vsel %vm1564_vm0, %v1666_v35, %v1668_v42  ;;  %8365 = vmatpush3.bf16.msra.mxu1 %v15213_v54  ;;  %v11144_v57 = vpack.c.bf16 %v15214_v30, %v10937_v13  ;;  %v1674_v45 = vsel %vm1564_vm0, %v1671_v34, %v1673_v32  ;;  %v15216_v35 = vld [vmem:[#allocation29_spill] sm:$0xff]  ;;  %v15218_v54 = vld [vmem:[#allocation31_spill] sm:$0xff]  ;;  %8065 = vmatmul.mubr.bf16.gmra.mrb[68].mxu0 %v11134_v59 }
 0x2c3   :  { %15211 = vst [vmem:[#allocation77_spill] sm:$0xff] %v11127_v40  ;;  %8336 = vmatprep.mubr.bf16.mxu1 %v11127_v40  ;;  %8366 = vmatprep.subr.bf16.mxu1 %v9440_v9  ;;  %v11152_v42 = vpack.c.bf16 %v15216_v35, %v10943_v28  ;;  %v11156_v62 = vpack.c.bf16 %v15218_v54, %v10949_v63  ;;  %v9441_v40 = vld [vmem:[#allocation8 + $0x110] sm:$0xff]   ;;  %v1686_v35 = vrot.slane %v11041_v19, 7  ;;  %v9453_v54 = vld [vmem:[#allocation8 + $0x18] sm:$0xff]  }
 0x2c4   :  { %15215 = vst [vmem:[#allocation38_spill] sm:$0xff] %v11144_v57  ;;  %8127 = vmatpush3.bf16.msra.mxu0 %v9451_v55  ;;  %v11161_v34 = vpack.c.bf16 %v1669_v47, %v1667_v44  ;;  %v1677_v32 = vsel %vm1564_vm0, %v15207_v51, %v1676_v20  ;;  %v1679_v58 = vsel %vm1564_vm0, %v1676_v20, %v1678_v38  ;;  %v1688_v44 = vrot.slane %v11044_v18, 7 }
 0x2c5   :  { %15217 = vst [vmem:[#allocation28_spill] sm:$0xff] %v11152_v42  ;;  %15219 = vst [vmem:[#allocation79_spill] sm:$0xff] %v11156_v62  ;;  %8128 = vmatprep.subr.bf16.mxu0 %v9452_v56  ;;  %8068 = vmatprep.mubr.bf16.mxu0 %v11144_v57  ;;  %v11168_v63 = vpack.c.bf16 %v1674_v45, %v1672_v46  ;;  %v1682_v55 = vsel %vm1564_vm0, %v15207_v51, %v1681_v3  ;;  %v1691_v20 = vrot.slane %v11047_v48, 7  ;;  %v9442_v57 = vld [vmem:[#allocation8 + $0x118] sm:$0xff]  }
 0x2c6   :  { %15220 = vst [vmem:[#allocation80_spill] sm:$0xff] %v11161_v34  ;;  %v1684_v59 = vsel %vm1564_vm0, %v1681_v3, %v1683_v0  ;;  %8367 = vmatpush3.bf16.msra.mxu1 %v9440_v9  ;;  %v11176_v47 = vpack.c.bf16 %v10958_v17, %v10955_v21  ;;  %v11180_v38 = vpack.c.bf16 %v10962_v29, %v10960_v7  ;;  %v1693_v45 = vrot.slane %v11050_v27, 7 }
 0x2c7   :  { %15221 = vst [vmem:[#allocation81_spill] sm:$0xff] %v11168_v63  ;;  %8368 = vmatprep.subr.bf16.mxu1 %v9441_v40  ;;  %v11184_v46 = vpack.c.bf16 %v1679_v58, %v1677_v32  ;;  %v1687_v0 = vsel %vm1564_vm0, %v15207_v51, %v1686_v35  ;;  %v1689_v9 = vsel %vm1564_vm0, %v1686_v35, %v1688_v44  ;;  %v1696_v3 = vrot.slane %v11053_v22, 7  ;;  %v9454_v58 = vld [vmem:[#allocation8 + $0x20] sm:$0xff]  }
 0x2c8   :  { %15222 = vst [vmem:[#allocation82_spill] sm:$0xff] %v11176_v47  ;;  %15223 = vst [vmem:[#allocation83_spill] sm:$0xff] %v11180_v38  ;;  %8129 = vmatpush3.bf16.msra.mxu0 %v9452_v56  ;;  %v11190_v17 = vpack.c.bf16 %v1684_v59, %v1682_v55  ;;  %v1692_v29 = vsel %vm1564_vm0, %v15207_v51, %v1691_v20  ;;  %v1694_v7 = vsel %vm1564_vm0, %v1691_v20, %v1693_v45 }
 0x2c9   :  { %15224 = vst [vmem:[#allocation84_spill] sm:$0xff] %v11184_v46  ;;  %v1698_v21 = vrot.slane %v11056_v26, 7  ;;  %8130 = vmatprep.subr.bf16.mxu0 %v9453_v54  ;;  %8337 = vmatmul.mubr.bf16.gmra.mrb[4].mxu1 %v11161_v34  ;;  %v11199_v32 = vpack.c.bf16 %v10966_v4, %v10964_v61  ;;  %v11203_v56 = vpack.c.bf16 %v10970_v53, %v10968_v15  ;;  %v1701_v59 = vrot.slane %v11059_v16, 7  ;;  %v9443_v53 = vld [vmem:[#allocation8 + $0x120] sm:$0xff]  }
 0x2ca   :  { %15225 = vst [vmem:[#allocation85_spill] sm:$0xff] %v11190_v17  ;;  %v1703_v35 = vrot.slane %v11062_v10, 7  ;;  %8340 = vmatprep.mubr.bf16.mxu1 %v11168_v63  ;;  %8369 = vmatpush3.bf16.msra.mxu1 %v9441_v40  ;;  %v11208_v55 = vpack.c.bf16 %v1689_v9, %v1687_v0  ;;  %v1697_v44 = vsel %vm1564_vm0, %v15207_v51, %v1696_v3  ;;  %v1706_v45 = vrot.slane %v11065_v14, 7  ;;  %v9456_v9 = vld [vmem:[#allocation8 + $0x28] sm:$0xff]  }
 0x2cb   :  { %15226 = vst [vmem:[#allocation86_spill] sm:$0xff] %v11199_v32  ;;  %15227 = vst [vmem:[#allocation87_spill] sm:$0xff] %v11203_v56  ;;  %v1699_v20 = vsel %vm1564_vm0, %v1696_v3, %v1698_v21  ;;  %8370 = vmatprep.subr.bf16.mxu1 %v9442_v57  ;;  %v11214_v34 = vpack.c.bf16 %v1694_v7, %v1692_v29  ;;  %v1702_v15 = vsel %vm1564_vm0, %v15207_v51, %v1701_v59 }
 0x2cc   :  { %15228 = vst [vmem:[#allocation88_spill] sm:$0xff] %v11208_v55  ;;  %v1704_v4 = vsel %vm1564_vm0, %v1701_v59, %v1703_v35  ;;  %v1708_v40 = vrot.slane %v11068_v24, 7  ;;  %8131 = vmatpush3.bf16.msra.mxu0 %v9453_v54  ;;  %v11223_v0 = vpack.c.bf16 %v10974_v31, %v10972_v36  ;;  %v11227_v21 = vpack.c.bf16 %v10978_v39, %v10976_v5  ;;  %v15239_v5 = vld [vmem:[#allocation75_spill] sm:$0xff] }
 0x2cd   :  { %15229 = vst [vmem:[#allocation89_spill] sm:$0xff] %v11214_v34  ;;  %8069 = vmatmul.mubr.bf16.gmra.mrb[72].mxu0 %v11152_v42  ;;  %v1711_v29 = vrot.slane %v11071_v49, 7  ;;  %v1713_v7 = vrot.slane %v11074_v12, 7  ;;  %8132 = vmatprep.subr.bf16.mxu0 %v9454_v58  ;;  %v11232_v3 = vpack.c.bf16 %v1699_v20, %v1697_v44  ;;  %v11234_v54 = vpack.c.bf16 %v1704_v4, %v1702_v15  ;;  %v9444_v44 = vld [vmem:[#allocation8 + $0x128] sm:$0xff]  }
 0x2ce   :  { %15230 = vst [vmem:[#allocation90_spill] sm:$0xff] %v11223_v0  ;;  %15231 = vst [vmem:[#allocation91_spill] sm:$0xff] %v11227_v21  ;;  %8072 = vmatprep.mubr.bf16.mxu0 %v11156_v62  ;;  %v1707_v59 = vsel %vm1564_vm0, %v15207_v51, %v1706_v45  ;;  %v1716_v35 = vrot.slane %v11077_v60, 7  ;;  %8371 = vmatpush3.bf16.msra.mxu1 %v9442_v57  ;;  %v1709_v63 = vsel %vm1564_vm0, %v1706_v45, %v1708_v40  ;;  %v15236_v57 = vld [vmem:[#allocation25_spill] sm:$0xff] }
 0x2cf   :  { %15232 = vst [vmem:[#allocation92_spill] sm:$0xff] %v11232_v3  ;;  %15233 = vst [vmem:[#allocation93_spill] sm:$0xff] %v11234_v54  ;;  %v1712_v42 = vsel %vm1564_vm0, %v15207_v51, %v1711_v29  ;;  %v1714_v21 = vsel %vm1564_vm0, %v1711_v29, %v1713_v7  ;;  %v1718_v39 = vrot.slane %v11080_v1, 7  ;;  %8372 = vmatprep.subr.bf16.mxu1 %v9443_v53  ;;  %v1721_v20 = vrot.slane %v15236_v57, 7  ;;  %v15237_v45 = vld [vmem:[#allocation37_spill] sm:$0xff] }
 0x2d0   :  { %v11246_v15 = vpack.c.bf16 %v10982_v41, %v10980_v52  ;;  %v11250_v4 = vpack.c.bf16 %v10986_v25, %v10984_v43  ;;  %v1723_v40 = vrot.slane %v15237_v45, 7  ;;  %8133 = vmatpush3.bf16.msra.mxu0 %v9454_v58  ;;  %v1717_v29 = vsel %vm1564_vm0, %v15207_v51, %v1716_v35  ;;  %v15238_v62 = vld [vmem:[#allocation73_spill] sm:$0xff]  ;;  %v15242_v43 = vld [vmem:[#allocation26_spill] sm:$0xff] }
 0x2d1   :  { %v1719_v7 = vsel %vm1564_vm0, %v1716_v35, %v1718_v39  ;;  %v3277_v0 = vrot.slane %v15238_v62, 7  ;;  %v3279_v31 = vrot.slane %v15239_v5, 7  ;;  %8134 = vmatprep.subr.bf16.mxu0 %v9456_v9  ;;  %8341 = vmatmul.mubr.bf16.gmra.mrb[8].mxu1 %v11184_v46  ;;  %v1722_v25 = vsel %vm1564_vm0, %v15207_v51, %v1721_v20  ;;  %v15243_v39 = vld [vmem:[#allocation48_spill] sm:$0xff]  ;;  %v15244_v35 = vld [vmem:[#allocation49_spill] sm:$0xff] }
 0x2d2   :  { %15234 = vst [vmem:[#allocation94_spill] sm:$0xff] %v11246_v15  ;;  %15235 = vst [vmem:[#allocation95_spill] sm:$0xff] %v11250_v4  ;;  %v11260_v15 = vpack.c.bf16 %v1709_v63, %v1707_v59  ;;  %v11262_v4 = vpack.c.bf16 %v1714_v21, %v1712_v42  ;;  %v1724_v58 = vsel %vm1564_vm0, %v1721_v20, %v1723_v40  ;;  %8344 = vmatprep.mubr.bf16.mxu1 %v11190_v17  ;;  %v9445_v21 = vld [vmem:[#allocation8 + $0x130] sm:$0xff]   ;;  %v15247_v20 = vld [vmem:[#allocation52_spill] sm:$0xff] }
 0x2d3   :  { %8373 = vmatpush3.bf16.msra.mxu1 %v9443_v53  ;;  %v11271_v5 = vpack.c.bf16 %v15244_v35, %v15243_v39  ;;  %v3278_v63 = vsel %vm1564_vm0, %v15207_v51, %v3277_v0  ;;  %v3280_v42 = vsel %vm1564_vm0, %v3277_v0, %v3279_v31  ;;  %v11276_v59 = vpack.c.bf16 %v1719_v7, %v1717_v29  ;;  %v15248_v40 = vld [vmem:[#allocation53_spill] sm:$0xff]  ;;  %v9457_v53 = vld [vmem:[#allocation8 + $0x30] sm:$0xff]  }
 0x2d4   :  { %15240 = vst [vmem:[#allocation73_spill] sm:$0xff] %v11260_v15  ;;  %15241 = vst [vmem:[#allocation96_spill] sm:$0xff] %v11262_v4  ;;  %8374 = vmatprep.subr.bf16.mxu1 %v9444_v44  ;;  %v11278_v46 = vpack.c.bf16 %v1724_v58, %v1722_v25  ;;  %v11282_v41 = vpack.c.bf16 %v15248_v40, %v15247_v20  ;;  %v1576_v17 = vrot.slane %v10925_v33, 7  ;;  %8135 = vmatpush3.bf16.msra.mxu0 %v9456_v9 }
 0x2d5   :  { %15245 = vst [vmem:[#allocation26_spill] sm:$0xff] %v11271_v5  ;;  %15246 = vst [vmem:[#allocation48_spill] sm:$0xff] %v11276_v59  ;;  %8073 = vmatmul.mubr.bf16.gmra.mrb[76].mxu0 %v11176_v47  ;;  %v11286_v5 = vpack.c.bf16 %v3280_v42, %v3278_v63  ;;  %v11290_v31 = vpack.c.bf16 %v11032_v8, %v11029_v2  ;;  %v11294_v0 = vpack.c.bf16 %v11038_v6, %v11035_v11  ;;  %v15267_v47 = vld [vmem:[#allocation24_spill] sm:$0xff] }
 0x2d6   :  { %v11298_v25 = vpack.c.bf16 %v11044_v18, %v11041_v19  ;;  %8076 = vmatprep.mubr.bf16.mxu0 %v11180_v38  ;;  %v11303_v29 = vpack.c.bf16 %v11050_v27, %v11047_v48  ;;  %v11307_v7 = vpack.c.bf16 %v11056_v26, %v11053_v22  ;;  %v11311_v58 = vpack.c.bf16 %v11062_v10, %v11059_v16  ;;  %v15281_v10 = vld [vmem:[#allocation34_spill] sm:$0xff] }
 0x2d7   :  { %15249 = vst [vmem:[#allocation49_spill] sm:$0xff] %v11286_v5  ;;  %15250 = vst [vmem:[#allocation97_spill] sm:$0xff] %v11290_v31  ;;  %v11315_v63 = vpack.c.bf16 %v11068_v24, %v11065_v14  ;;  %8375 = vmatpush3.bf16.msra.mxu1 %v9444_v44  ;;  %v11319_v42 = vpack.c.bf16 %v11074_v12, %v11071_v49  ;;  %v11323_v40 = vpack.c.bf16 %v11080_v1, %v11077_v60 }
 0x2d8   :  { %15251 = vst [vmem:[#allocation98_spill] sm:$0xff] %v11294_v0  ;;  %15252 = vst [vmem:[#allocation99_spill] sm:$0xff] %v11298_v25  ;;  %v11327_v20 = vpack.c.bf16 %v15237_v45, %v15236_v57  ;;  %8376 = vmatprep.subr.bf16.mxu1 %v9445_v21  ;;  %8136 = vmatprep.subr.bf16.mxu0 %v9457_v53  ;;  %v15265_v25 = vld [vmem:[#allocation27_spill] sm:$0xff]  ;;  %v15268_v45 = vrot.slane %v15267_v47, 7  ;;  %v1577_v1 = vsel %vm1564_vm0, %v15207_v51, %v1576_v17 }
 0x2d9   :  { %15253 = vst [vmem:[#allocation100_spill] sm:$0xff] %v11303_v29  ;;  %15254 = vst [vmem:[#allocation101_spill] sm:$0xff] %v11307_v7  ;;  %v9446_v7 = vld [vmem:[#allocation8 + $0x138] sm:$0xff]   ;;  %v15262_v29 = vld [vmem:[#allocation50_spill] sm:$0xff]  ;;  %8345 = vmatmul.mubr.bf16.gmra.mrb[12].mxu1 %v11208_v55  ;;  %v1586_v24 = vrot.slane %v10937_v13, 7  ;;  %8137 = vmatpush3.bf16.msra.mxu0 %v9457_v53  ;;  %v1606_v16 = vrot.slane %v15281_v10, 7 }
 0x2da   :  { %15255 = vst [vmem:[#allocation102_spill] sm:$0xff] %v11311_v58  ;;  %15256 = vst [vmem:[#allocation103_spill] sm:$0xff] %v11315_v63  ;;  %v1578_v58 = vrot.slane %v15242_v43, 7  ;;  %v15260_v63 = vld [vmem:[#allocation54_spill] sm:$0xff]  ;;  %v9458_v0 = vld [vmem:[#allocation8 + $0x38] sm:$0xff]   ;;  %8348 = vmatprep.mubr.bf16.mxu1 %v11214_v34  ;;  %v1641_v48 = vrot.slane %v15243_v39, 7 }
 0x2db   :  { %15257 = vst [vmem:[#allocation104_spill] sm:$0xff] %v11319_v42  ;;  %15258 = vst [vmem:[#allocation105_spill] sm:$0xff] %v11323_v40  ;;  %v11332_v44 = vpack.c.bf16 %v15260_v63, %v11005_v50  ;;  %v15263_v42 = vld [vmem:[#allocation51_spill] sm:$0xff]  ;;  %v15266_v40 = vrot.slane %v15265_v25, 7  ;;  %8377 = vmatpush3.bf16.msra.mxu1 %v9445_v21  ;;  %8138 = vmatprep.subr.bf16.mxu0 %v9458_v0  ;;  %v15276_v53 = vld [vmem:[#allocation32_spill] sm:$0xff] }
 0x2dc   :  { %15259 = vst [vmem:[#allocation106_spill] sm:$0xff] %v11327_v20  ;;  %v11336_v38 = vpack.c.bf16 %v15263_v42, %v15262_v29  ;;  %v1581_v20 = vrot.slane %v10931_v37, 7  ;;  %v1579_v60 = vsel %vm1564_vm0, %v1576_v17, %v1578_v58  ;;  %v1588_v17 = vrot.slane %v15214_v30, 7  ;;  %v15272_v58 = vld [vmem:[#allocation29_spill] sm:$0xff]  ;;  %8378 = vmatprep.subr.bf16.mxu1 %v9446_v7  ;;  %v15275_v21 = vld [vmem:[#allocation31_spill] sm:$0xff] }
 0x2dd   :  { %15261 = vst [vmem:[#allocation54_spill] sm:$0xff] %v11332_v44  ;;  %v1572_v9 = vsel %vm1564_vm0, %v15207_v51, %v15266_v40  ;;  %v15269_v31 = vmov %v15266_v40  ;;  %v11355_v40 = vpack.c.bf16 %v1579_v60, %v1577_v1  ;;  %v1593_v55 = vrot.slane %v15272_v58, 7  ;;  %8077 = vmatmul.mubr.bf16.gmra.mrb[80].mxu0 %v11199_v32 }
 0x2de   :  { %15264 = vst [vmem:[#allocation50_spill] sm:$0xff] %v11336_v38  ;;  %v1574_v57 = vsel %vm1564_vm0, %v15269_v31, %v15268_v45  ;;  %v1583_v38 = vrot.slane %v10934_v23, 7  ;;  %v1582_v49 = vsel %vm1564_vm0, %v15207_v51, %v1581_v20  ;;  %v1591_v31 = vrot.slane %v10943_v28, 7  ;;  %8080 = vmatprep.mubr.bf16.mxu0 %v11203_v56  ;;  %8139 = vmatpush3.bf16.msra.mxu0 %v9458_v0 }
 0x2df   :  { %v11353_v12 = vpack.c.bf16 %v1574_v57, %v1572_v9  ;;  %15271 = vst [vmem:[#allocation27_spill] sm:$0xff] %v11355_v40  ;;  %v11365_v57 = vld [vmem:[#allocation8 + $0x140] sm:$0xff]   ;;  %v1587_v1 = vsel %vm1564_vm0, %v15207_v51, %v1586_v24  ;;  %v15274_v9 = vld [vmem:[#allocation30_spill] sm:$0xff]  ;;  %v1598_v40 = vrot.slane %v15275_v21, 7  ;;  %8379 = vmatpush3.bf16.msra.mxu1 %v9446_v7 }
 0x2e0   :  { %v1584_v45 = vsel %vm1564_vm0, %v1581_v20, %v1583_v38  ;;  %v1596_v34 = vrot.slane %v15274_v9, 7  ;;  %v1589_v38 = vsel %vm1564_vm0, %v1586_v24, %v1588_v17  ;;  %v1592_v20 = vsel %vm1564_vm0, %v15207_v51, %v1591_v31  ;;  %8444 = vmatprep.subr.bf16.mxu1 %v11365_v57  ;;  %v15284_v7 = vld [vmem:[#allocation40_spill] sm:$0xff] }
 0x2e1   :  { %15270 = vst [vmem:[#allocation51_spill] sm:$0xff] %v11353_v12  ;;  %v11367_v60 = vpack.c.bf16 %v1584_v45, %v1582_v49  ;;  %v1594_v12 = vsel %vm1564_vm0, %v1591_v31, %v1593_v55  ;;  %v1601_v49 = vrot.slane %v15276_v53, 7  ;;  %v11380_v45 = vpack.c.bf16 %v1589_v38, %v1587_v1  ;;  %v15280_v55 = vld [vmem:[#allocation33_spill] sm:$0xff]  ;;  %8349 = vmatmul.mubr.bf16.gmra.mrb[16].mxu1 %v11232_v3 }
 0x2e2   :  { %v1597_v14 = vsel %vm1564_vm0, %v15207_v51, %v1596_v34  ;;  %v1599_v32 = vsel %vm1564_vm0, %v1596_v34, %v1598_v40  ;;  %v1603_v31 = vrot.slane %v15280_v55, 7  ;;  %v1611_v38 = vrot.slane %v10964_v61, 7  ;;  %8352 = vmatprep.mubr.bf16.mxu1 %v11234_v54 }
 0x2e3   :  { %15273 = vst [vmem:[#allocation24_spill] sm:$0xff] %v11367_v60  ;;  %15277 = vst [vmem:[#allocation29_spill] sm:$0xff] %v11380_v45  ;;  %v11382_v60 = vpack.c.bf16 %v1594_v12, %v1592_v20  ;;  %v11387_v24 = vpack.c.bf16 %v1599_v32, %v1597_v14  ;;  %v1602_v17 = vsel %vm1564_vm0, %v15207_v51, %v1601_v49  ;;  %v15282_v12 = vld [vmem:[#allocation17_spill] sm:$0xff]  ;;  %v15283_v20 = vld [vmem:[#allocation39_spill] sm:$0xff]  ;;  %v1616_v14 = vrot.slane %v15284_v7, 7 }
 0x2e4   :  { %v1608_v1 = vrot.slane %v15282_v12, 7  ;;  %v1613_v34 = vrot.slane %v15283_v20, 7  ;;  %v1604_v32 = vsel %vm1564_vm0, %v1601_v49, %v1603_v31  ;;  %v1607_v40 = vsel %vm1564_vm0, %v15207_v51, %v1606_v16 }
 0x2e5   :  { %15278 = vst [vmem:[#allocation30_spill] sm:$0xff] %v11382_v60  ;;  %15279 = vst [vmem:[#allocation31_spill] sm:$0xff] %v11387_v24  ;;  %v15285_v24 = vld [vmem:[#allocation41_spill] sm:$0xff]  ;;  %v1621_v45 = vrot.slane %v10972_v36, 7  ;;  %v11404_v0 = vpack.c.bf16 %v1604_v32, %v1602_v17  ;;  %v1612_v26 = vsel %vm1564_vm0, %v15207_v51, %v1611_v38  ;;  %v1617_v27 = vsel %vm1564_vm0, %v15207_v51, %v1616_v14 }
 0x2e6   :  { %v1618_v60 = vrot.slane %v15285_v24, 7  ;;  %v1609_v56 = vsel %vm1564_vm0, %v1606_v16, %v1608_v1  ;;  %v1614_v22 = vsel %vm1564_vm0, %v1611_v38, %v1613_v34  ;;  %v15290_v1 = vld [vmem:[#allocation42_spill] sm:$0xff] }
 0x2e7   :  { %15286 = vst [vmem:[#allocation32_spill] sm:$0xff] %v11404_v0  ;;  %v11411_v49 = vpack.c.bf16 %v1609_v56, %v1607_v40  ;;  %v11413_v31 = vpack.c.bf16 %v1614_v22, %v1612_v26  ;;  %v1622_v16 = vsel %vm1564_vm0, %v15207_v51, %v1621_v45  ;;  %v1623_v32 = vrot.slane %v15290_v1, 7  ;;  %v15291_v0 = vld [vmem:[#allocation43_spill] sm:$0xff]  ;;  %v15292_v34 = vld [vmem:[#allocation90_spill] sm:$0xff]  ;;  %v15293_v56 = vld [vmem:[#allocation44_spill] sm:$0xff] }
 0x2e8   :  { %v1619_v3 = vsel %vm1564_vm0, %v1616_v14, %v1618_v60  ;;  %v1626_v38 = vrot.slane %v15291_v0, 7  ;;  %8081 = vmatmul.mubr.bf16.gmra.mrb[84].mxu0 %v15292_v34  ;;  %v1628_v40 = vrot.slane %v15293_v56, 7  ;;  %v1631_v22 = vrot.slane %v10980_v52, 7  ;;  %v15294_v26 = vld [vmem:[#allocation45_spill] sm:$0xff]  ;;  %v15296_v60 = vld [vmem:[#allocation91_spill] sm:$0xff] }
 0x2e9   :  { %15287 = vst [vmem:[#allocation33_spill] sm:$0xff] %v11411_v49  ;;  %15288 = vst [vmem:[#allocation34_spill] sm:$0xff] %v11413_v31  ;;  %v11418_v17 = vpack.c.bf16 %v1619_v3, %v1617_v27  ;;  %v1633_v54 = vrot.slane %v15294_v26, 7  ;;  %v15295_v31 = vld [vmem:[#allocation46_spill] sm:$0xff]  ;;  %8084 = vmatprep.mubr.bf16.mxu0 %v15296_v60  ;;  %v1624_v27 = vsel %vm1564_vm0, %v1621_v45, %v1623_v32  ;;  %v15297_v14 = vld [vmem:[#allocation47_spill] sm:$0xff]  ;;  %8353 = vmatmul.mubr.bf16.gmra.mrb[20].mxu1 %v11260_v15 }
 0x2ea   :  { %v1636_v49 = vrot.slane %v15295_v31, 7  ;;  %v1627_v3 = vsel %vm1564_vm0, %v15207_v51, %v1626_v38  ;;  %v11435_v34 = vpack.c.bf16 %v1624_v27, %v1622_v16  ;;  %v1629_v18 = vsel %vm1564_vm0, %v1626_v38, %v1628_v40  ;;  %v15298_v40 = vld [vmem:[#allocation75_spill] sm:$0xff]  ;;  %8356 = vmatprep.mubr.bf16.mxu1 %v11262_v4 }
 0x2eb   :  { %15289 = vst [vmem:[#allocation17_spill] sm:$0xff] %v11418_v17  ;;  %v1638_v17 = vrot.slane %v15297_v14, 7  ;;  %v1632_v19 = vsel %vm1564_vm0, %v15207_v51, %v1631_v22  ;;  %v1634_v6 = vsel %vm1564_vm0, %v1631_v22, %v1633_v54  ;;  %v11441_v11 = vpack.c.bf16 %v1629_v18, %v1627_v3 }
 0x2ec   :  { %v11443_v60 = vpack.c.bf16 %v1634_v6, %v1632_v19  ;;  %v1637_v45 = vsel %vm1564_vm0, %v15207_v51, %v1636_v49  ;;  %v1642_v16 = vsel %vm1564_vm0, %v15207_v51, %v1641_v48  ;;  %v1643_v38 = vrot.slane %v15244_v35, 7 }
 0x2ed   :  { %v1639_v32 = vsel %vm1564_vm0, %v1636_v49, %v1638_v17  ;;  %v11455_v27 = vpack.c.bf16 %v15298_v40, %v15238_v62  ;;  %v2597_v6 = vrot.slane %v15265_v25, 1  ;;  %v2598_v19 = vrot.slane %v15267_v47, 1  ;;  %v15302_v17 = vld [vmem:[#allocation36_spill] sm:$0xff] }
 0x2ee   :  { %v11448_v8 = vpack.c.bf16 %v1639_v32, %v1637_v45  ;;  %v15300_v18 = vrot.slane %v15242_v43, 1  ;;  %v15301_v54 = vrot.slane %v10925_v33, 1  ;;  %v1644_v45 = vsel %vm1564_vm0, %v1641_v48, %v1643_v38 }
 0x2ef   :  { %15299 = vst [vmem:[#allocation39_spill] sm:$0xff] %v11455_v27  ;;  %v2607_v25 = vrot.slane %v10931_v37, 1  ;;  %v2608_v47 = vrot.slane %v10934_v23, 1  ;;  %v11475_v15 = vpack.c.bf16 %v1644_v45, %v1642_v16  ;;  %v2599_v33 = vsel %vm2591_vm1, %v2597_v6, %v2598_v19  ;;  %v15305_v16 = vld [vmem:[#allocation95_spill] sm:$0xff] }
 0x2f0   :  { %v2604_v49 = vsel %vm2591_vm1, %v15301_v54, %v15300_v18  ;;  %v15303_v22 = vmov %v15300_v18  ;;  %v2601_v18 = vsel %vm2591_vm1, %v2598_v19, %v15302_v17  ;;  %v2612_v43 = vrot.slane %v10937_v13, 1  ;;  %v15304_v54 = vld [vmem:[#allocation94_spill] sm:$0xff] }
 0x2f1   :  { %v2606_v3 = vsel %vm2591_vm1, %v15303_v22, %v15302_v17  ;;  %8085 = vmatmul.mubr.bf16.gmra.mrb[88].mxu0 %v15304_v54  ;;  %v11482_v22 = vpack.c.bf16 %v2601_v18, %v2599_v33  ;;  %v2609_v48 = vsel %vm2591_vm1, %v2607_v25, %v2608_v47  ;;  %v2611_v37 = vsel %vm2591_vm1, %v2608_v47, %v15302_v17 }
 0x2f2   :  { %v11471_v32 = vpack.c.bf16 %v2606_v3, %v2604_v49  ;;  %v2613_v23 = vrot.slane %v15214_v30, 1  ;;  %8088 = vmatprep.mubr.bf16.mxu0 %v15305_v16  ;;  %v11489_v38 = vpack.c.bf16 %v2611_v37, %v2609_v48  ;;  %v2617_v6 = vrot.slane %v10943_v28, 1  ;;  %8357 = vmatmul.mubr.bf16.gmra.mrb[24].mxu1 %v11276_v59 }
 0x2f3   :  { %v2618_v19 = vrot.slane %v15272_v58, 1  ;;  %v2622_v13 = vrot.slane %v15274_v9, 1  ;;  %v2623_v45 = vrot.slane %v15275_v21, 1  ;;  %v2627_v25 = vrot.slane %v15276_v53, 1  ;;  %8360 = vmatprep.mubr.bf16.mxu1 %v11278_v46 }
 0x2f4   :  { %v2614_v49 = vsel %vm2591_vm1, %v2612_v43, %v2613_v23  ;;  %v2616_v3 = vsel %vm2591_vm1, %v2613_v23, %v15302_v17  ;;  %v2628_v58 = vrot.slane %v15280_v55, 1  ;;  %v2632_v21 = vrot.slane %v15281_v10, 1 }
 0x2f5   :  { %v11499_v30 = vpack.c.bf16 %v2616_v3, %v2614_v49  ;;  %v2619_v47 = vsel %vm2591_vm1, %v2617_v6, %v2618_v19  ;;  %v2621_v28 = vsel %vm2591_vm1, %v2618_v19, %v15302_v17  ;;  %v2624_v9 = vsel %vm2591_vm1, %v2622_v13, %v2623_v45 }
 0x2f6   :  { %v11505_v33 = vpack.c.bf16 %v2621_v28, %v2619_v47  ;;  %v2626_v18 = vsel %vm2591_vm1, %v2623_v45, %v15302_v17  ;;  %v2629_v43 = vsel %vm2591_vm1, %v2627_v25, %v2628_v58  ;;  %v2631_v48 = vsel %vm2591_vm1, %v2628_v58, %v15302_v17 }
 0x2f7   :  { %v11512_v53 = vpack.c.bf16 %v2626_v18, %v2624_v9  ;;  %v2633_v55 = vrot.slane %v15282_v12, 1  ;;  %v11519_v37 = vpack.c.bf16 %v2631_v48, %v2629_v43  ;;  %v2637_v23 = vrot.slane %v10964_v61, 1  ;;  %v15306_v12 = vld [vmem:[#allocation26_spill] sm:$0xff] }
 0x2f8   :  { %v2638_v6 = vrot.slane %v15283_v20, 1  ;;  %v2642_v10 = vrot.slane %v15284_v7, 1  ;;  %v2643_v49 = vrot.slane %v15285_v24, 1  ;;  %v2647_v3 = vrot.slane %v10972_v36, 1 }
 0x2f9   :  { %v2634_v19 = vsel %vm2591_vm1, %v2632_v21, %v2633_v55  ;;  %v2636_v13 = vsel %vm2591_vm1, %v2633_v55, %v15302_v17  ;;  %8089 = vmatmul.mubr.bf16.gmra.mrb[92].mxu0 %v15306_v12  ;;  %v2648_v20 = vrot.slane %v15290_v1, 1  ;;  %v15307_v7 = vmov 0.0|0.0  }
 0x2fa   :  { %v11530_v45 = vpack.c.bf16 %v2636_v13, %v2634_v19  ;;  %v2639_v25 = vsel %vm2591_vm1, %v2637_v23, %v2638_v6  ;;  %v2641_v61 = vsel %vm2591_vm1, %v2638_v6, %v15302_v17  ;;  %8092 = vmatprep.mubr.bf16.mxu0 %v15307_v7  ;;  %v2644_v28 = vsel %vm2591_vm1, %v2642_v10, %v2643_v49 }
 0x2fb   :  { %v11537_v47 = vpack.c.bf16 %v2641_v61, %v2639_v25  ;;  %v2646_v36 = vsel %vm2591_vm1, %v2643_v49, %v15302_v17  ;;  %v2652_v24 = vrot.slane %v15291_v0, 1  ;;  %v2649_v9 = vsel %vm2591_vm1, %v2647_v3, %v2648_v20  ;;  %8361 = vmatmul.mubr.bf16.gmra.mrb[28].mxu1 %v11286_v5  ;;  %v15330_v5 = vld [vmem:[#allocation64_spill] sm:$0xff] }
 0x2fc   :  { %v11543_v58 = vpack.c.bf16 %v2646_v36, %v2644_v28  ;;  %v2651_v18 = vsel %vm2591_vm1, %v2648_v20, %v15302_v17  ;;  %v2653_v1 = vrot.slane %v15293_v56, 1  ;;  %v2657_v43 = vrot.slane %v10980_v52, 1 }
 0x2fd   :  { %v11549_v21 = vpack.c.bf16 %v2651_v18, %v2649_v9  ;;  %v2658_v48 = vrot.slane %v15294_v26, 1  ;;  %v2662_v55 = vrot.slane %v15295_v31, 1  ;;  %v2663_v6 = vrot.slane %v15297_v14, 1  ;;  %v15308_v26 = vld [vmem:[#allocation74_spill] sm:$0xff] }
 0x2fe   :  { %v2654_v23 = vsel %vm2591_vm1, %v2652_v24, %v2653_v1  ;;  %v2656_v0 = vsel %vm2591_vm1, %v2653_v1, %v15302_v17  ;;  %v2667_v10 = vrot.slane %v15243_v39, 1  ;;  %v2668_v31 = vrot.slane %v15244_v35, 1  ;;  %8380 = vmatprep.mubr.bf16.mxu1 %v15308_v26  ;;  %v9448_v1 = vld [vmem:[#allocation8 + $0x148] sm:$0xff]   ;;  %v15315_v26 = vld [vmem:[#allocation78_spill] sm:$0xff] }
 0x2ff   :  { %v11560_v56 = vpack.c.bf16 %v2656_v0, %v2654_v23  ;;  %v2659_v19 = vsel %vm2591_vm1, %v2657_v43, %v2658_v48  ;;  %v2661_v52 = vsel %vm2591_vm1, %v2658_v48, %v15302_v17  ;;  %v2664_v49 = vsel %vm2591_vm1, %v2662_v55, %v2663_v6  ;;  %v15309_v55 = vld [vmem:[#allocation57_spill] sm:$0xff]  ;;  %v15310_v0 = vld [vmem:[#allocation58_spill] sm:$0xff] }
 0x300   :  { %v11567_v13 = vpack.c.bf16 %v2661_v52, %v2659_v19  ;;  %v2666_v39 = vsel %vm2591_vm1, %v2663_v6, %v15302_v17  ;;  %v4125_v14 = vrot.slane %v15262_v29, 1  ;;  %v2669_v25 = vsel %vm2591_vm1, %v2667_v10, %v2668_v31  ;;  %v15311_v10 = vld [vmem:[#allocation76_spill] sm:$0xff]  ;;  %v15312_v19 = vld [vmem:[#allocation55_spill] sm:$0xff] }
 0x301   :  { %v11573_v3 = vpack.c.bf16 %v2666_v39, %v2664_v49  ;;  %v2671_v61 = vsel %vm2591_vm1, %v2668_v31, %v15302_v17  ;;  %v4126_v35 = vrot.slane %v15263_v42, 1  ;;  %8093 = vmatmul.mubr.bf16.gmra.mrb[96].mxu0 %v11282_v41  ;;  %v2682_v28 = vrot.slane %v11005_v50, 1  ;;  %v15313_v52 = vld [vmem:[#allocation56_spill] sm:$0xff] }
 0x302   :  { %v11580_v20 = vpack.c.bf16 %v2671_v61, %v2669_v25  ;;  %8096 = vmatprep.mubr.bf16.mxu0 %v11332_v44  ;;  %v2683_v9 = vrot.slane %v15260_v63, 1  ;;  %v2692_v23 = vrot.slane %v15309_v55, 1  ;;  %v2693_v6 = vrot.slane %v15310_v0, 1  ;;  %v15317_v61 = vld [vmem:[#allocation62_spill] sm:$0xff] }
 0x303   :  { %v4127_v36 = vsel %vm2591_vm1, %v4125_v14, %v4126_v35  ;;  %v4129_v24 = vsel %vm2591_vm1, %v4126_v35, %v15302_v17  ;;  %8381 = vmatmul.mubr.bf16.vlgmr.msra.gmra.mrb[32].mxu1 %v15311_v10  ;;  %v11600_v31 = vpack.c.bf16 %v15313_v52, %v15312_v19  ;;  %v2702_v63 = vrot.slane %v11029_v2, 1  ;;  %v15316_v14 = vld [vmem:[#allocation61_spill] sm:$0xff]  ;;  %v15329_v10 = vld [vmem:[#allocation63_spill] sm:$0xff] }
 0x304   :  { %v11588_v18 = vpack.c.bf16 %v4129_v24, %v4127_v36  ;;  %v2684_v43 = vsel %vm2591_vm1, %v2682_v28, %v2683_v9  ;;  %v2686_v48 = vsel %vm2591_vm1, %v2683_v9, %v15302_v17  ;;  %8445 = vmatpush3.bf16.msra.mxu1 %v11365_v57  ;;  %8384 = vmatprep.mubr.bf16.mxu1 %v15315_v26  ;;  %v2703_v25 = vrot.slane %v15316_v14, 1  ;;  %v9450_v36 = vld [vmem:[#allocation8 + $0x150] sm:$0xff]   ;;  %v15320_v57 = vld [vmem:[#allocation19_spill] sm:$0xff]  ;;  %v15324_v14 = vld [vmem:[#allocation21_spill] sm:$0xff] }
 0x305   :  { %v11594_v50 = vpack.c.bf16 %v2686_v48, %v2684_v43  ;;  %15314 = vst [vmem:[#allocation40_spill] sm:$0xff] %v11600_v31  ;;  %v2694_v49 = vsel %vm2591_vm1, %v2692_v23, %v2693_v6  ;;  %v2696_v39 = vsel %vm2591_vm1, %v2693_v6, %v15302_v17  ;;  %v2707_v35 = vrot.slane %v15317_v61, 1  ;;  %8446 = vmatprep.subr.bf16.mxu1 %v9448_v1  ;;  %v15321_v9 = vld [vmem:[#allocation59_spill] sm:$0xff]  ;;  %v15322_v43 = vld [vmem:[#allocation60_spill] sm:$0xff] }
 0x306   :  { %v11612_v28 = vpack.c.bf16 %v15310_v0, %v15309_v55  ;;  %v11614_v2 = vpack.c.bf16 %v2696_v39, %v2694_v49  ;;  %v2708_v24 = vrot.slane %v15320_v57, 1  ;;  %v11620_v48 = vpack.c.bf16 %v15322_v43, %v15321_v9  ;;  %v15326_v61 = vld [vmem:[#allocation23_spill] sm:$0xff] }
 0x307   :  { %v2704_v23 = vsel %vm2591_vm1, %v2702_v63, %v2703_v25  ;;  %v2706_v6 = vsel %vm2591_vm1, %v2703_v25, %v15302_v17  ;;  %v2712_v55 = vrot.slane %v15324_v14, 1  ;;  %v2713_v57 = vrot.slane %v15326_v61, 1  ;;  %v15328_v63 = vld [vmem:[#allocation20_spill] sm:$0xff] }
 0x308   :  { %15318 = vst [vmem:[#allocation41_spill] sm:$0xff] %v11612_v28  ;;  %15319 = vst [vmem:[#allocation42_spill] sm:$0xff] %v11614_v2  ;;  %v11627_v0 = vpack.c.bf16 %v2706_v6, %v2704_v23  ;;  %v2709_v49 = vsel %vm2591_vm1, %v2707_v35, %v2708_v24  ;;  %v2711_v39 = vsel %vm2591_vm1, %v2708_v24, %v15302_v17  ;;  %8447 = vmatpush3.bf16.msra.mxu1 %v9448_v1  ;;  %v9455_v2 = vld [vmem:[#allocation8 + $0x158] sm:$0xff]   ;;  %v15331_v6 = vld [vmem:[#allocation65_spill] sm:$0xff] }
 0x309   :  { %8097 = vmatmul.mubr.bf16.gmra.mrb[100].mxu0 %v11600_v31  ;;  %15323 = vst [vmem:[#allocation43_spill] sm:$0xff] %v11620_v48  ;;  %v11633_v7 = vpack.c.bf16 %v2711_v39, %v2709_v49  ;;  %v2717_v26 = vrot.slane %v15328_v63, 1  ;;  %v2718_v25 = vrot.slane %v15329_v10, 1  ;;  %v2722_v14 = vrot.slane %v15330_v5, 1  ;;  %8448 = vmatprep.subr.bf16.mxu1 %v9450_v36  ;;  %v15334_v39 = vld [vmem:[#allocation67_spill] sm:$0xff]  ;;  %v15335_v63 = vld [vmem:[#allocation38_spill] sm:$0xff] }
 0x30a   :  { %8100 = vmatprep.mubr.bf16.mxu0 %v11612_v28  ;;  %15325 = vst [vmem:[#allocation44_spill] sm:$0xff] %v11627_v0  ;;  %v2714_v23 = vsel %vm2591_vm1, %v2712_v55, %v2713_v57  ;;  %v2716_v35 = vsel %vm2591_vm1, %v2713_v57, %v15302_v17  ;;  %v2723_v24 = vrot.slane %v15331_v6, 1  ;;  %v15332_v0 = vld [vmem:[#allocation66_spill] sm:$0xff]  ;;  %v2728_v5 = vrot.slane %v15334_v39, 1  ;;  %v15337_v6 = vld [vmem:[#allocation68_spill] sm:$0xff]  ;;  %v15340_v39 = vld [vmem:[#allocation69_spill] sm:$0xff] }
 0x30b   :  { %15327 = vst [vmem:[#allocation45_spill] sm:$0xff] %v11633_v7  ;;  %v2727_v61 = vrot.slane %v15332_v0, 1  ;;  %v11643_v1 = vpack.c.bf16 %v2716_v35, %v2714_v23  ;;  %v2719_v49 = vsel %vm2591_vm1, %v2717_v26, %v2718_v25  ;;  %v2721_v10 = vsel %vm2591_vm1, %v2718_v25, %v15302_v17  ;;  %8385 = vmatmul.mubr.bf16.gmra.mrb[36].mxu1 %v15335_v63  ;;  %v15338_v23 = vld [vmem:[#allocation28_spill] sm:$0xff]  ;;  %v15341_v63 = vld [vmem:[#allocation70_spill] sm:$0xff] }
 0x30c   :  { %v11650_v7 = vpack.c.bf16 %v2721_v10, %v2719_v49  ;;  %v2724_v55 = vsel %vm2591_vm1, %v2722_v14, %v2723_v24  ;;  %v2726_v57 = vsel %vm2591_vm1, %v2723_v24, %v15302_v17  ;;  %v2732_v0 = vrot.slane %v15337_v6, 1  ;;  %8388 = vmatprep.mubr.bf16.mxu1 %v15338_v23  ;;  %8449 = vmatpush3.bf16.msra.mxu1 %v9450_v36  ;;  %v9459_v10 = vld [vmem:[#allocation8 + $0x160] sm:$0xff]  }
 0x30d   :  { %15333 = vst [vmem:[#allocation46_spill] sm:$0xff] %v11643_v1  ;;  %v11657_v26 = vpack.c.bf16 %v2726_v57, %v2724_v55  ;;  %v2729_v25 = vsel %vm2591_vm1, %v2727_v61, %v2728_v5  ;;  %v2731_v35 = vsel %vm2591_vm1, %v2728_v5, %v15302_v17  ;;  %v2733_v49 = vrot.slane %v15340_v39, 1  ;;  %8450 = vmatprep.subr.bf16.mxu1 %v9455_v2  ;;  %v15343_v1 = vld [vmem:[#allocation71_spill] sm:$0xff]  ;;  %v15344_v5 = vld [vmem:[#allocation72_spill] sm:$0xff]  ;;  %v15345_v57 = vld [vmem:[#allocation25_spill] sm:$0xff] }
 0x30e   :  { %15336 = vst [vmem:[#allocation47_spill] sm:$0xff] %v11650_v7  ;;  %v11663_v14 = vpack.c.bf16 %v2731_v35, %v2729_v25  ;;  %v2737_v24 = vrot.slane %v15341_v63, 1  ;;  %v15342_v7 = vld [vmem:[#allocation22_spill] sm:$0xff]  ;;  %v2742_v23 = vrot.slane %v15343_v1, 1  ;;  %v2743_v55 = vrot.slane %v15344_v5, 1  ;;  %v15347_v1 = vld [vmem:[#allocation37_spill] sm:$0xff] }
 0x30f   :  { %15339 = vst [vmem:[#allocation75_spill] sm:$0xff] %v11657_v26  ;;  %v2738_v6 = vrot.slane %v15342_v7, 1  ;;  %v2734_v36 = vsel %vm2591_vm1, %v2732_v0, %v2733_v49  ;;  %v2736_v61 = vsel %vm2591_vm1, %v2733_v49, %v15302_v17  ;;  %v2747_v39 = vrot.slane %v15345_v57, 1  ;;  %v15346_v26 = vld [vmem:[#allocation97_spill] sm:$0xff] }
 0x310   :  { %v11675_v25 = vpack.c.bf16 %v2736_v61, %v2734_v36  ;;  %v2748_v35 = vrot.slane %v15347_v1, 1  ;;  %8451 = vmatpush3.bf16.msra.mxu1 %v9455_v2  ;;  %v2744_v49 = vsel %vm2591_vm1, %v2742_v23, %v2743_v55  ;;  %v2746_v5 = vsel %vm2591_vm1, %v2743_v55, %v15302_v17  ;;  %v9460_v36 = vld [vmem:[#allocation8 + $0x168] sm:$0xff]   ;;  %v15348_v55 = vld [vmem:[#allocation79_spill] sm:$0xff] }
 0x311   :  { %8101 = vmatmul.mubr.bf16.gmra.mrb[104].mxu0 %v11620_v48  ;;  %v2739_v63 = vsel %vm2591_vm1, %v2737_v24, %v2738_v6  ;;  %v2741_v7 = vsel %vm2591_vm1, %v2738_v6, %v15302_v17  ;;  %v4130_v57 = vrot.slane %v15238_v62, 1  ;;  %8452 = vmatprep.subr.bf16.mxu1 %v9459_v10  ;;  %v11687_v61 = vpack.c.bf16 %v2746_v5, %v2744_v49  ;;  %v15349_v49 = vld [vmem:[#allocation82_spill] sm:$0xff] }
 0x312   :  { %8104 = vmatprep.mubr.bf16.mxu0 %v15346_v26  ;;  %v11681_v0 = vpack.c.bf16 %v2741_v7, %v2739_v63  ;;  %v2749_v24 = vsel %vm2591_vm1, %v2747_v39, %v2748_v35  ;;  %v2751_v6 = vsel %vm2591_vm1, %v2748_v35, %v15302_v17  ;;  %v4131_v2 = vrot.slane %v15298_v40, 1  ;;  %v15350_v5 = vld [vmem:[#allocation98_spill] sm:$0xff] }
 0x313   :  { %v11693_v63 = vpack.c.bf16 %v2751_v6, %v2749_v24  ;;  %v3272_v23 = vrot.slane %v15262_v29, 7  ;;  %v3274_v7 = vrot.slane %v15263_v42, 7  ;;  %8389 = vmatmul.mubr.bf16.gmra.mrb[40].mxu1 %v15348_v55  ;;  %v9461_v29 = vld [vmem:[#allocation8 + $0x170] sm:$0xff]   ;;  %v9462_v24 = vld [vmem:[#allocation8 + $0x178] sm:$0xff]   ;;  %v15388_v55 = vld [vmem:[#allocation53_spill] sm:$0xff] }
 0x314   :  { %v4132_v62 = vsel %vm2591_vm1, %v4130_v57, %v4131_v2  ;;  %v4134_v1 = vsel %vm2591_vm1, %v4131_v2, %v15302_v17  ;;  %8392 = vmatprep.mubr.bf16.mxu1 %v15349_v49  ;;  %8453 = vmatpush3.bf16.msra.mxu1 %v9459_v10  ;;  %v15351_v57 = vld [vmem:[#allocation99_spill] sm:$0xff]  ;;  %v15353_v10 = vld [vmem:[#allocation86_spill] sm:$0xff]  ;;  %v11713_v2 = vld [vmem:[#allocation8 + $0x180] sm:$0xff]  }
 0x315   :  { %v11702_v39 = vpack.c.bf16 %v4134_v1, %v4132_v62  ;;  %v3273_v40 = vsel %vm1564_vm0, %v15207_v51, %v3272_v23  ;;  %v3275_v35 = vsel %vm1564_vm0, %v3272_v23, %v3274_v7  ;;  %8454 = vmatprep.subr.bf16.mxu1 %v9460_v36  ;;  %v15352_v6 = vld [vmem:[#allocation83_spill] sm:$0xff]  ;;  %v15354_v23 = vld [vmem:[#allocation100_spill] sm:$0xff]  ;;  %v15355_v62 = vld [vmem:[#allocation101_spill] sm:$0xff] }
 0x316   :  { %v11707_v42 = vpack.c.bf16 %v3275_v35, %v3273_v40  ;;  %v9465_v7 = vld [vmem:[#allocation8 + $0x80] sm:$0xff]   ;;  %v15357_v1 = vld [vmem:[#allocation90_spill] sm:$0xff]  ;;  %v15359_v35 = vld [vmem:[#allocation103_spill] sm:$0xff] }
 0x317   :  { %8204 = vmatprep.subr.bf16.mxu0 %v9465_v7  ;;  %v15358_v40 = vld [vmem:[#allocation102_spill] sm:$0xff]  ;;  %v15366_v49 = vld [vmem:[#allocation27_spill] sm:$0xff] }
 0x318   :  { %8455 = vmatpush3.bf16.msra.mxu1 %v9460_v36  ;;  %v15356_v36 = vld [vmem:[#allocation87_spill] sm:$0xff] }
 0x319   :  { %8105 = vmatmul.mubr.bf16.gmra.mrb[108].mxu0 %v15350_v5  ;;  %8456 = vmatprep.subr.bf16.mxu1 %v9461_v29 }
 0x31a   :  { %8108 = vmatprep.mubr.bf16.mxu0 %v15351_v57 }
 0x31b   :  { %8393 = vmatmul.mubr.bf16.gmra.mrb[44].mxu1 %v15352_v6  ;;  %v15362_v6 = vld [vmem:[#allocation105_spill] sm:$0xff] }
 0x31c   :  { %8396 = vmatprep.mubr.bf16.mxu1 %v15353_v10  ;;  %8457 = vmatpush3.bf16.msra.mxu1 %v9461_v29  ;;  %v15360_v29 = vld [vmem:[#allocation91_spill] sm:$0xff]  ;;  %v15361_v10 = vld [vmem:[#allocation104_spill] sm:$0xff] }
 0x31d   :  { %8458 = vmatprep.subr.bf16.mxu1 %v9462_v24 }
 0x320   :  { %8459 = vmatpush3.bf16.msra.mxu1 %v9462_v24  ;;  %v11729_v24 = vpack.c.bf16 %v15207_v51, %v15207_v51  ;;  %v9469_v51 = vld [vmem:[#allocation8 + $0x98] sm:$0xff]  }
 0x321   :  { %8109 = vmatmul.mubr.bf16.gmra.mrb[112].mxu0 %v15354_v23  ;;  %8524 = vmatprep.subr.bf16.mxu1 %v11713_v2 }
 0x322   :  { %8112 = vmatprep.mubr.bf16.mxu0 %v15355_v62 }
 0x323   :  { %8397 = vmatmul.mubr.bf16.gmra.mrb[48].mxu1 %v15356_v36  ;;  %v15364_v36 = vld [vmem:[#allocation50_spill] sm:$0xff] }
 0x324   :  { %8400 = vmatprep.mubr.bf16.mxu1 %v15357_v1  ;;  %v15363_v1 = vld [vmem:[#allocation106_spill] sm:$0xff] }
 0x329   :  { %8113 = vmatmul.mubr.bf16.gmra.mrb[116].mxu0 %v15358_v40 }
 0x32a   :  { %8116 = vmatprep.mubr.bf16.mxu0 %v15359_v35 }
 0x32b   :  { %8401 = vmatmul.mubr.bf16.gmra.mrb[52].mxu1 %v15360_v29  ;;  %v15365_v29 = vld [vmem:[#allocation51_spill] sm:$0xff] }
 0x32c   :  { %8404 = vmatprep.mubr.bf16.mxu1 %v15304_v54  ;;  %v9467_v54 = vld [vmem:[#allocation8 + $0x88] sm:$0xff]  }
 0x331   :  { %8117 = vmatmul.mubr.bf16.gmra.mrb[120].mxu0 %v15361_v10 }
 0x332   :  { %8120 = vmatprep.mubr.bf16.mxu0 %v15362_v6 }
 0x333   :  { %8405 = vmatmul.mubr.bf16.gmra.mrb[56].mxu1 %v15305_v16  ;;  %v9468_v16 = vld [vmem:[#allocation8 + $0x90] sm:$0xff]  }
 0x334   :  { %8408 = vmatprep.mubr.bf16.mxu1 %v15306_v12  ;;  %v15367_v12 = vld [vmem:[#allocation24_spill] sm:$0xff] }
 0x339   :  { %8121 = vmatmul.mubr.bf16.gmra.mrb[124].mxu0 %v15363_v1 }
 0x33a   :  { %8140 = vmatprep.mubr.bf16.mxu0 %v11729_v24 }
 0x33b   :  { %8409 = vmatmul.mubr.bf16.gmra.mrb[60].mxu1 %v15364_v36  ;;  %v15368_v36 = vld [vmem:[#allocation29_spill] sm:$0xff] }
 0x33c   :  { %8412 = vmatprep.mubr.bf16.mxu1 %v11282_v41  ;;  %v9470_v41 = vld [vmem:[#allocation8 + $0xa0] sm:$0xff]  }
 0x341   :  { %8141 = vmatmul.mubr.bf16.vlgmr.msra.gmra.mrb[64].mxu0 %v15365_v29 }
 0x342   :  { %8144 = vmatprep.mubr.bf16.mxu0 %v15366_v49  ;;  %8205 = vmatpush3.bf16.msra.mxu0 %v9465_v7  ;;  %v9472_v7 = vld [vmem:[#allocation8 + $0xa8] sm:$0xff]  }
 0x343   :  { %8206 = vmatprep.subr.bf16.mxu0 %v9467_v54  ;;  %8413 = vmatmul.mubr.bf16.gmra.mrb[0].mxu1 %v11332_v44  ;;  %v15369_v44 = vld [vmem:[#allocation30_spill] sm:$0xff] }
 0x344   :  { %8416 = vmatprep.mubr.bf16.mxu1 %v11600_v31  ;;  %v9473_v31 = vld [vmem:[#allocation8 + $0xb0] sm:$0xff]  }
 0x346   :  { %8207 = vmatpush3.bf16.msra.mxu0 %v9467_v54  ;;  %v15370_v54 = vld [vmem:[#allocation31_spill] sm:$0xff] }
 0x347   :  { %8208 = vmatprep.subr.bf16.mxu0 %v9468_v16 }
 0x349   :  { %8145 = vmatmul.mubr.bf16.gmra.mrb[68].mxu0 %v15367_v12 }
 0x34a   :  { %8148 = vmatprep.mubr.bf16.mxu0 %v15368_v36  ;;  %8209 = vmatpush3.bf16.msra.mxu0 %v9468_v16  ;;  %v9474_v16 = vld [vmem:[#allocation8 + $0xb8] sm:$0xff]  }
 0x34b   :  { %8210 = vmatprep.subr.bf16.mxu0 %v9469_v51  ;;  %8417 = vmatmul.mubr.bf16.gmra.mrb[4].mxu1 %v11612_v28  ;;  %v15371_v28 = vld [vmem:[#allocation32_spill] sm:$0xff] }
 0x34c   :  { %8420 = vmatprep.mubr.bf16.mxu1 %v11620_v48  ;;  %v15386_v48 = vld [vmem:[#allocation73_spill] sm:$0xff] }
 0x34e   :  { %8211 = vmatpush3.bf16.msra.mxu0 %v9469_v51  ;;  %v15372_v51 = vld [vmem:[#allocation33_spill] sm:$0xff] }
 0x34f   :  { %8212 = vmatprep.subr.bf16.mxu0 %v9470_v41 }
 0x351   :  { %8149 = vmatmul.mubr.bf16.gmra.mrb[72].mxu0 %v15369_v44 }
 0x352   :  { %8152 = vmatprep.mubr.bf16.mxu0 %v15370_v54  ;;  %8213 = vmatpush3.bf16.msra.mxu0 %v9470_v41  ;;  %v11752_v41 = vld [vmem:[#allocation8 + $0xc0] sm:$0xff]  }
 0x353   :  { %8214 = vmatprep.subr.bf16.mxu0 %v9472_v7  ;;  %8421 = vmatmul.mubr.bf16.gmra.mrb[8].mxu1 %v15346_v26  ;;  %v15383_v26 = vld [vmem:[#allocation89_spill] sm:$0xff] }
 0x354   :  { %8424 = vmatprep.mubr.bf16.mxu1 %v15350_v5  ;;  %v15374_v5 = vld [vmem:[#allocation17_spill] sm:$0xff] }
 0x356   :  { %8215 = vmatpush3.bf16.msra.mxu0 %v9472_v7  ;;  %v15373_v7 = vld [vmem:[#allocation34_spill] sm:$0xff] }
 0x357   :  { %8216 = vmatprep.subr.bf16.mxu0 %v9473_v31 }
 0x359   :  { %8153 = vmatmul.mubr.bf16.gmra.mrb[76].mxu0 %v15371_v28 }
 0x35a   :  { %8156 = vmatprep.mubr.bf16.mxu0 %v15372_v51  ;;  %8217 = vmatpush3.bf16.msra.mxu0 %v9473_v31  ;;  %v15375_v31 = vld [vmem:[#allocation18_spill] sm:$0xff] }
 0x35b   :  { %8218 = vmatprep.subr.bf16.mxu0 %v9474_v16  ;;  %8425 = vmatmul.mubr.bf16.gmra.mrb[12].mxu1 %v15351_v57  ;;  %v15382_v57 = vld [vmem:[#allocation88_spill] sm:$0xff] }
 0x35c   :  { %8428 = vmatprep.mubr.bf16.mxu1 %v15354_v23  ;;  %v15381_v23 = vld [vmem:[#allocation85_spill] sm:$0xff] }
 0x35e   :  { %8219 = vmatpush3.bf16.msra.mxu0 %v9474_v16  ;;  %v15376_v16 = vld [vmem:[#allocation35_spill] sm:$0xff] }
 0x35f   :  { %8284 = vmatprep.subr.bf16.mxu0 %v11752_v41 }
 0x361   :  { %8157 = vmatmul.mubr.bf16.gmra.mrb[80].mxu0 %v15373_v7 }
 0x362   :  { %8160 = vmatprep.mubr.bf16.mxu0 %v15374_v5 }
 0x363   :  { %8429 = vmatmul.mubr.bf16.gmra.mrb[16].mxu1 %v15355_v62  ;;  %v9476_v62 = vld [vmem:[#allocation8 + $0x1a8] sm:$0xff]  }
 0x364   :  { %8432 = vmatprep.mubr.bf16.mxu1 %v15358_v40  ;;  %v15379_v40 = vld [vmem:[#allocation81_spill] sm:$0xff] }
 0x369   :  { %8161 = vmatmul.mubr.bf16.gmra.mrb[84].mxu0 %v11435_v34 }
 0x36a   :  { %8164 = vmatprep.mubr.bf16.mxu0 %v11441_v11 }
 0x36b   :  { %8433 = vmatmul.mubr.bf16.gmra.mrb[20].mxu1 %v15359_v35  ;;  %v15378_v35 = vld [vmem:[#allocation80_spill] sm:$0xff] }
 0x36c   :  { %8436 = vmatprep.mubr.bf16.mxu1 %v15361_v10  ;;  %v9464_v10 = vld [vmem:[#allocation8 + $0x188] sm:$0xff]  }
 0x371   :  { %8165 = vmatmul.mubr.bf16.gmra.mrb[88].mxu0 %v11443_v60 }
 0x372   :  { %8168 = vmatprep.mubr.bf16.mxu0 %v11448_v8 }
 0x373   :  { %8437 = vmatmul.mubr.bf16.gmra.mrb[24].mxu1 %v15362_v6  ;;  %v15377_v6 = vld [vmem:[#allocation77_spill] sm:$0xff] }
 0x374   :  { %8440 = vmatprep.mubr.bf16.mxu1 %v15363_v1  ;;  %v9466_v1 = vld [vmem:[#allocation8 + $0x190] sm:$0xff]  }
 0x379   :  { %8169 = vmatmul.mubr.bf16.gmra.mrb[92].mxu0 %v11475_v15 }
 0x37a   :  { %8172 = vmatprep.mubr.bf16.mxu0 %v11729_v24 }
 0x37b   :  { %8441 = vmatmul.mubr.bf16.gmra.mrb[28].mxu1 %v11455_v27  ;;  %v9471_v27 = vld [vmem:[#allocation8 + $0x198] sm:$0xff]  }
 0x37c   :  { %8460 = vmatprep.mubr.bf16.mxu1 %v11482_v22 }
 0x381   :  { %8173 = vmatmul.mubr.bf16.gmra.mrb[96].mxu0 %v15375_v31  ;;  %v9475_v31 = vld [vmem:[#allocation8 + $0x1a0] sm:$0xff]  }
 0x382   :  { %8176 = vmatprep.mubr.bf16.mxu0 %v15376_v16 }
 0x383   :  { %8461 = vmatmul.mubr.bf16.vlgmr.msra.gmra.mrb[32].mxu1 %v11471_v32 }
 0x384   :  { %8525 = vmatpush3.bf16.msra.mxu1 %v11713_v2  ;;  %8464 = vmatprep.mubr.bf16.mxu1 %v11489_v38  ;;  %v15380_v2 = vld [vmem:[#allocation84_spill] sm:$0xff] }
 0x385   :  { %8526 = vmatprep.subr.bf16.mxu1 %v9464_v10 }
 0x388   :  { %8527 = vmatpush3.bf16.msra.mxu1 %v9464_v10  ;;  %v9477_v10 = vld [vmem:[#allocation8 + $0x1b0] sm:$0xff]  }
 0x389   :  { %8177 = vmatmul.mubr.bf16.gmra.mrb[100].mxu0 %v15377_v6  ;;  %8528 = vmatprep.subr.bf16.mxu1 %v9466_v1 }
 0x38a   :  { %8180 = vmatprep.mubr.bf16.mxu0 %v15378_v35 }
 0x38b   :  { %8465 = vmatmul.mubr.bf16.gmra.mrb[36].mxu1 %v11499_v30 }
 0x38c   :  { %8468 = vmatprep.mubr.bf16.mxu1 %v11505_v33  ;;  %8529 = vmatpush3.bf16.msra.mxu1 %v9466_v1  ;;  %v9478_v1 = vld [vmem:[#allocation8 + $0x1b8] sm:$0xff]  }
 0x38d   :  { %8530 = vmatprep.subr.bf16.mxu1 %v9471_v27 }
 0x390   :  { %8531 = vmatpush3.bf16.msra.mxu1 %v9471_v27  ;;  %v11788_v27 = vld [vmem:[#allocation8 + $0x1c0] sm:$0xff]  }
 0x391   :  { %8181 = vmatmul.mubr.bf16.gmra.mrb[104].mxu0 %v15379_v40  ;;  %8532 = vmatprep.subr.bf16.mxu1 %v9475_v31 }
 0x392   :  { %8184 = vmatprep.mubr.bf16.mxu0 %v15380_v2 }
 0x393   :  { %8469 = vmatmul.mubr.bf16.gmra.mrb[40].mxu1 %v11512_v53 }
 0x394   :  { %8472 = vmatprep.mubr.bf16.mxu1 %v11519_v37  ;;  %8533 = vmatpush3.bf16.msra.mxu1 %v9475_v31  ;;  %v15384_v31 = vld [vmem:[#allocation92_spill] sm:$0xff] }
 0x395   :  { %8534 = vmatprep.subr.bf16.mxu1 %v9476_v62 }
 0x398   :  { %8535 = vmatpush3.bf16.msra.mxu1 %v9476_v62  ;;  %v15385_v62 = vld [vmem:[#allocation93_spill] sm:$0xff] }
 0x399   :  { %8185 = vmatmul.mubr.bf16.gmra.mrb[108].mxu0 %v15381_v23  ;;  %8536 = vmatprep.subr.bf16.mxu1 %v9477_v10 }
 0x39a   :  { %8188 = vmatprep.mubr.bf16.mxu0 %v15382_v57 }
 0x39b   :  { %8473 = vmatmul.mubr.bf16.gmra.mrb[44].mxu1 %v11530_v45 }
 0x39c   :  { %8476 = vmatprep.mubr.bf16.mxu1 %v11537_v47  ;;  %8537 = vmatpush3.bf16.msra.mxu1 %v9477_v10  ;;  %v15387_v10 = vld [vmem:[#allocation52_spill] sm:$0xff] }
 0x39d   :  { %8538 = vmatprep.subr.bf16.mxu1 %v9478_v1 }
 0x3a0   :  { %8539 = vmatpush3.bf16.msra.mxu1 %v9478_v1  ;;  %v2677_v1 = vrot.slane %v15387_v10, 1  ;;  %v2688_v10 = vrot.slane %v15313_v52, 1  ;;  %v2698_v52 = vrot.slane %v15322_v43, 1  ;;  %v15389_v43 = vld [vmem:[#allocation42_spill] sm:$0xff] }
 0x3a1   :  { %8189 = vmatmul.mubr.bf16.gmra.mrb[112].mxu0 %v15383_v26  ;;  %8604 = vmatprep.subr.bf16.mxu1 %v11788_v27  ;;  %v11806_v26 = vpack.c.bf16 %v15302_v17, %v15302_v17 }
 0x3a2   :  { %8192 = vmatprep.mubr.bf16.mxu0 %v15384_v31  ;;  %v2678_v31 = vrot.slane %v15388_v55, 1  ;;  %v2687_v55 = vrot.slane %v15312_v19, 1  ;;  %v2697_v19 = vrot.slane %v15321_v9, 1 }
 0x3a3   :  { %8477 = vmatmul.mubr.bf16.gmra.mrb[48].mxu1 %v11543_v58 }
 0x3a4   :  { %8480 = vmatprep.mubr.bf16.mxu1 %v11549_v21 }
 0x3a9   :  { %8193 = vmatmul.mubr.bf16.gmra.mrb[116].mxu0 %v15385_v62 }
 0x3aa   :  { %8196 = vmatprep.mubr.bf16.mxu0 %v15386_v48  ;;  %v2679_v48 = vsel %vm2591_vm1, %v2677_v1, %v2678_v31  ;;  %v2689_v1 = vsel %vm2591_vm1, %v2687_v55, %v2688_v10  ;;  %v2701_v55 = vsel %vm2591_vm1, %v2698_v52, %v15302_v17 }
 0x3ab   :  { %8481 = vmatmul.mubr.bf16.gmra.mrb[52].mxu1 %v11560_v56 }
 0x3ac   :  { %8484 = vmatprep.mubr.bf16.mxu1 %v11567_v13 }
 0x3b1   :  { %8197 = vmatmul.mubr.bf16.gmra.mrb[120].mxu0 %v11262_v4  ;;  %v2681_v4 = vsel %vm2591_vm1, %v2678_v31, %v15302_v17  ;;  %v2691_v31 = vsel %vm2591_vm1, %v2688_v10, %v15302_v17  ;;  %v9544_v10 = vld [vmem:[#allocation8 + $0xd8] sm:$0xff]   ;;  %v15390_v17 = vld [vmem:[#allocation44_spill] sm:$0xff] }
 0x3b2   :  { %8200 = vmatprep.mubr.bf16.mxu0 %v11276_v59  ;;  %v11814_v59 = vpack.c.bf16 %v2681_v4, %v2679_v48  ;;  %v9542_v4 = vld [vmem:[#allocation8 + $0xc8] sm:$0xff]   ;;  %v11826_v48 = vpack.c.bf16 %v2691_v31, %v2689_v1  ;;  %v9545_v1 = vld [vmem:[#allocation8 + $0xe0] sm:$0xff]  }
 0x3b3   :  { %8485 = vmatmul.mubr.bf16.gmra.mrb[56].mxu1 %v11573_v3  ;;  %v9546_v31 = vld [vmem:[#allocation8 + $0xe8] sm:$0xff]  }
 0x3b4   :  { %8488 = vmatprep.mubr.bf16.mxu1 %v11580_v20 }
 0x3b9   :  { %8201 = vmatmul.mubr.bf16.gmra.mrb[124].mxu0 %v11278_v46 }
 0x3ba   :  { %8220 = vmatprep.mubr.bf16.mxu0 %v11806_v26 }
 0x3bb   :  { %8489 = vmatmul.mubr.bf16.gmra.mrb[60].mxu1 %v11588_v18 }
 0x3bc   :  { %8492 = vmatprep.mubr.bf16.mxu1 %v11814_v59 }
 0x3c1   :  { %8221 = vmatmul.mubr.bf16.vlgmr.msra.gmra.mrb[64].mxu0 %v11482_v22  ;;  %v9543_v22 = vld [vmem:[#allocation8 + $0xd0] sm:$0xff]  }
 0x3c2   :  { %8224 = vmatprep.mubr.bf16.mxu0 %v11471_v32  ;;  %8285 = vmatpush3.bf16.msra.mxu0 %v11752_v41  ;;  %v2699_v41 = vsel %vm2591_vm1, %v2697_v19, %v2698_v52  ;;  %v9547_v19 = vld [vmem:[#allocation8 + $0xf0] sm:$0xff]   ;;  %v9548_v52 = vld [vmem:[#allocation8 + $0xf8] sm:$0xff]  }
 0x3c3   :  { %8286 = vmatprep.subr.bf16.mxu0 %v9542_v4  ;;  %8493 = vmatmul.mubr.bf16.gmra.mrb[0].mxu1 %v11594_v50  ;;  %v11837_v9 = vpack.c.bf16 %v2701_v55, %v2699_v41  ;;  %v15393_v41 = vld [vmem:[#allocation47_spill] sm:$0xff] }
 0x3c4   :  { %8496 = vmatprep.mubr.bf16.mxu1 %v11826_v48  ;;  %v15394_v55 = vld [vmem:[#allocation75_spill] sm:$0xff] }
 0x3c6   :  { %8287 = vmatpush3.bf16.msra.mxu0 %v9542_v4  ;;  %v15391_v4 = vld [vmem:[#allocation45_spill] sm:$0xff] }
 0x3c7   :  { %8288 = vmatprep.subr.bf16.mxu0 %v9543_v22 }
 0x3c9   :  { %8225 = vmatmul.mubr.bf16.gmra.mrb[68].mxu0 %v11489_v38 }
 0x3ca   :  { %8228 = vmatprep.mubr.bf16.mxu0 %v11499_v30  ;;  %8289 = vmatpush3.bf16.msra.mxu0 %v9543_v22  ;;  %v15392_v22 = vld [vmem:[#allocation46_spill] sm:$0xff] }
 0x3cb   :  { %8290 = vmatprep.subr.bf16.mxu0 %v9544_v10  ;;  %8497 = vmatmul.mubr.bf16.gmra.mrb[4].mxu1 %v15389_v43 }
 0x3cc   :  { %8500 = vmatprep.mubr.bf16.mxu1 %v11837_v9 }
 0x3ce   :  { %8291 = vmatpush3.bf16.msra.mxu0 %v9544_v10  ;;  %v9480_v10 = vld [vmem:[#allocation8 + $0x1c8] sm:$0xff]  }
 0x3cf   :  { %8292 = vmatprep.subr.bf16.mxu0 %v9545_v1 }
 0x3d1   :  { %8229 = vmatmul.mubr.bf16.gmra.mrb[72].mxu0 %v11505_v33 }
 0x3d2   :  { %8232 = vmatprep.mubr.bf16.mxu0 %v11512_v53  ;;  %8293 = vmatpush3.bf16.msra.mxu0 %v9545_v1  ;;  %v9481_v1 = vld [vmem:[#allocation8 + $0x1d0] sm:$0xff]  }
 0x3d3   :  { %8294 = vmatprep.subr.bf16.mxu0 %v9546_v31  ;;  %8501 = vmatmul.mubr.bf16.gmra.mrb[8].mxu1 %v15390_v17 }
 0x3d4   :  { %8504 = vmatprep.mubr.bf16.mxu1 %v15391_v4 }
 0x3d6   :  { %8295 = vmatpush3.bf16.msra.mxu0 %v9546_v31  ;;  %v9482_v31 = vld [vmem:[#allocation8 + $0x1d8] sm:$0xff]  }
 0x3d7   :  { %8296 = vmatprep.subr.bf16.mxu0 %v9547_v19 }
 0x3d9   :  { %8233 = vmatmul.mubr.bf16.gmra.mrb[76].mxu0 %v11519_v37 }
 0x3da   :  { %8236 = vmatprep.mubr.bf16.mxu0 %v11530_v45  ;;  %8297 = vmatpush3.bf16.msra.mxu0 %v9547_v19  ;;  %v9485_v19 = vld [vmem:[#allocation8 + $0x1f0] sm:$0xff]  }
 0x3db   :  { %8298 = vmatprep.subr.bf16.mxu0 %v9548_v52  ;;  %8505 = vmatmul.mubr.bf16.gmra.mrb[12].mxu1 %v15392_v22 }
 0x3dc   :  { %8508 = vmatprep.mubr.bf16.mxu1 %v15393_v41 }
 0x3de   :  { %8299 = vmatpush3.bf16.msra.mxu0 %v9548_v52  ;;  %v9486_v52 = vld [vmem:[#allocation8 + $0x1f8] sm:$0xff]  }
 0x3e1   :  { %8237 = vmatmul.mubr.bf16.gmra.mrb[80].mxu0 %v11537_v47 }
 0x3e2   :  { %8240 = vmatprep.mubr.bf16.mxu0 %v11543_v58 }
 0x3e3   :  { %8509 = vmatmul.mubr.bf16.gmra.mrb[16].mxu1 %v15394_v55 }
 0x3e4   :  { %8512 = vmatprep.mubr.bf16.mxu1 %v11663_v14 }
 0x3e9   :  { %8241 = vmatmul.mubr.bf16.gmra.mrb[84].mxu0 %v11549_v21 }
 0x3ea   :  { %8244 = vmatprep.mubr.bf16.mxu0 %v11560_v56 }
 0x3eb   :  { %8513 = vmatmul.mubr.bf16.gmra.mrb[20].mxu1 %v11675_v25 }
 0x3ec   :  { %8516 = vmatprep.mubr.bf16.mxu1 %v11681_v0 }
 0x3f1   :  { %8245 = vmatmul.mubr.bf16.gmra.mrb[88].mxu0 %v11567_v13 }
 0x3f2   :  { %8248 = vmatprep.mubr.bf16.mxu0 %v11573_v3 }
 0x3f3   :  { %8517 = vmatmul.mubr.bf16.gmra.mrb[24].mxu1 %v11687_v61 }
 0x3f4   :  { %8520 = vmatprep.mubr.bf16.mxu1 %v11693_v63 }
 0x3f9   :  { %8249 = vmatmul.mubr.bf16.gmra.mrb[92].mxu0 %v11580_v20 }
 0x3fa   :  { %8252 = vmatprep.mubr.bf16.mxu0 %v11806_v26 }
 0x3fb   :  { %8521 = vmatmul.mubr.bf16.gmra.mrb[28].mxu1 %v11702_v39 }
 0x3fc   :  { %8540 = vmatprep.mubr.bf16.mxu1 %v15366_v49 }
 0x401   :  { %8253 = vmatmul.mubr.bf16.gmra.mrb[96].mxu0 %v11814_v59  ;;  %v9483_v59 = vld [vmem:[#allocation8 + $0x1e0] sm:$0xff]  }
 0x402   :  { %8256 = vmatprep.mubr.bf16.mxu0 %v11594_v50 }
 0x403   :  { %8541 = vmatmul.mubr.bf16.vlgmr.msra.gmra.mrb[32].mxu1 %v15367_v12 }
 0x404   :  { %8605 = vmatpush3.bf16.msra.mxu1 %v11788_v27  ;;  %8544 = vmatprep.mubr.bf16.mxu1 %v15368_v36  ;;  %v9484_v27 = vld [vmem:[#allocation8 + $0x1e8] sm:$0xff]  }
 0x405   :  { %8606 = vmatprep.subr.bf16.mxu1 %v9480_v10 }
 0x408   :  { %8607 = vmatpush3.bf16.msra.mxu1 %v9480_v10  ;;  %v9487_v10 = vld [vmem:[#allocation8 + $0x200] sm:$0xff]  }
 0x409   :  { %8257 = vmatmul.mubr.bf16.gmra.mrb[100].mxu0 %v11826_v48  ;;  %8608 = vmatprep.subr.bf16.mxu1 %v9481_v1 }
 0x40a   :  { %8260 = vmatprep.mubr.bf16.mxu0 %v15389_v43 }
 0x40b   :  { %8545 = vmatmul.mubr.bf16.gmra.mrb[36].mxu1 %v15369_v44 }
 0x40c   :  { %8548 = vmatprep.mubr.bf16.mxu1 %v15370_v54  ;;  %8609 = vmatpush3.bf16.msra.mxu1 %v9481_v1  ;;  %v15414_v1 = vld [vmem:[#allocation26_spill] sm:$0xff] }
 0x40d   :  { %8610 = vmatprep.subr.bf16.mxu1 %v9482_v31 }
 0x410   :  { %8611 = vmatpush3.bf16.msra.mxu1 %v9482_v31  ;;  %v15415_v31 = vld [vmem:[#allocation50_spill] sm:$0xff] }
 0x411   :  { %8261 = vmatmul.mubr.bf16.gmra.mrb[104].mxu0 %v11837_v9  ;;  %8612 = vmatprep.subr.bf16.mxu1 %v9483_v59 }
 0x412   :  { %8264 = vmatprep.mubr.bf16.mxu0 %v15390_v17 }
 0x413   :  { %8549 = vmatmul.mubr.bf16.gmra.mrb[40].mxu1 %v15371_v28 }
 0x414   :  { %8552 = vmatprep.mubr.bf16.mxu1 %v15372_v51  ;;  %8613 = vmatpush3.bf16.msra.mxu1 %v9483_v59  ;;  %v15416_v59 = vmov 0.0|0.0  }
 0x415   :  { %8614 = vmatprep.subr.bf16.mxu1 %v9484_v27 }
 0x418   :  { %8615 = vmatpush3.bf16.msra.mxu1 %v9484_v27  ;;  %v15417_v27 = vld [vmem:[#allocation54_spill] sm:$0xff] }
 0x419   :  { %8265 = vmatmul.mubr.bf16.gmra.mrb[108].mxu0 %v15391_v4  ;;  %8616 = vmatprep.subr.bf16.mxu1 %v9485_v19 }
 0x41a   :  { %8268 = vmatprep.mubr.bf16.mxu0 %v15392_v22 }
 0x41b   :  { %8553 = vmatmul.mubr.bf16.gmra.mrb[44].mxu1 %v15373_v7 }
 0x41c   :  { %8556 = vmatprep.mubr.bf16.mxu1 %v15374_v5  ;;  %8617 = vmatpush3.bf16.msra.mxu1 %v9485_v19  ;;  %v15418_v19 = vld [vmem:[#allocation40_spill] sm:$0xff] }
 0x41d   :  { %8618 = vmatprep.subr.bf16.mxu1 %v9486_v52 }
 0x420   :  { %8619 = vmatpush3.bf16.msra.mxu1 %v9486_v52  ;;  %v15419_v52 = vld [vmem:[#allocation41_spill] sm:$0xff] }
 0x421   :  { %8269 = vmatmul.mubr.bf16.gmra.mrb[112].mxu0 %v15393_v41  ;;  %8684 = vmatprep.subr.bf16.mxu1 %v9487_v10 }
 0x422   :  { %8272 = vmatprep.mubr.bf16.mxu0 %v15394_v55 }
 0x423   :  { %8557 = vmatmul.mubr.bf16.gmra.mrb[48].mxu1 %v11435_v34 }
 0x424   :  { %8560 = vmatprep.mubr.bf16.mxu1 %v11441_v11 }
 0x429   :  { %8273 = vmatmul.mubr.bf16.gmra.mrb[116].mxu0 %v11663_v14 }
 0x42a   :  { %8276 = vmatprep.mubr.bf16.mxu0 %v11675_v25 }
 0x42b   :  { %8561 = vmatmul.mubr.bf16.gmra.mrb[52].mxu1 %v11443_v60 }
 0x42c   :  { %8564 = vmatprep.mubr.bf16.mxu1 %v11448_v8 }
 0x431   :  { %8277 = vmatmul.mubr.bf16.gmra.mrb[120].mxu0 %v11681_v0 }
 0x432   :  { %8280 = vmatprep.mubr.bf16.mxu0 %v11687_v61 }
 0x433   :  { %8565 = vmatmul.mubr.bf16.gmra.mrb[56].mxu1 %v11475_v15 }
 0x434   :  { %8568 = vmatprep.mubr.bf16.mxu1 %v11707_v42 }
 0x439   :  { %8281 = vmatmul.mubr.bf16.gmra.mrb[124].mxu0 %v11693_v63 }
 0x43a   :  { %8300 = vmatprep.mubr.bf16.mxu0 %v15365_v29  ;;  %v9493_v29 = vld [vmem:[#allocation8 + $0x230] sm:$0xff]  }
 0x43b   :  { %8569 = vmatmul.mubr.bf16.gmra.mrb[60].mxu1 %v11729_v24 }
 0x43c   :  { %8572 = vmatprep.mubr.bf16.mxu1 %v15376_v16  ;;  %v15411_v16 = vld [vmem:[#allocation91_spill] sm:$0xff] }
 0x441   :  { %8301 = vmatmul.mubr.bf16.vlgmr.msra.gmra.mrb[64].mxu0 %v15366_v49  ;;  %v15396_v49 = vld [vmem:[#allocation92_spill] sm:$0xff] }
 0x442   :  { %8304 = vmatprep.mubr.bf16.mxu0 %v15367_v12  ;;  %v15395_v12 = vld [vmem:[#allocation89_spill] sm:$0xff] }
 0x443   :  { %8573 = vmatmul.mubr.bf16.gmra.mrb[0].mxu1 %v15377_v6  ;;  %v15403_v6 = vld [vmem:[#allocation38_spill] sm:$0xff] }
 0x444   :  { %8576 = vmatprep.mubr.bf16.mxu1 %v15378_v35  ;;  %v15407_v35 = vld [vmem:[#allocation83_spill] sm:$0xff] }
 0x449   :  { %8305 = vmatmul.mubr.bf16.gmra.mrb[68].mxu0 %v15368_v36  ;;  %v9492_v36 = vld [vmem:[#allocation8 + $0x228] sm:$0xff]  }
 0x44a   :  { %8308 = vmatprep.mubr.bf16.mxu0 %v15369_v44  ;;  %v15397_v44 = vld [vmem:[#allocation73_spill] sm:$0xff] }
 0x44b   :  { %8577 = vmatmul.mubr.bf16.gmra.mrb[4].mxu1 %v15379_v40  ;;  %v15406_v40 = vld [vmem:[#allocation82_spill] sm:$0xff] }
 0x44c   :  { %8580 = vmatprep.mubr.bf16.mxu1 %v15380_v2  ;;  %v15412_v2 = vld [vmem:[#allocation94_spill] sm:$0xff] }
 0x451   :  { %8309 = vmatmul.mubr.bf16.gmra.mrb[72].mxu0 %v15370_v54  ;;  %v15408_v54 = vld [vmem:[#allocation86_spill] sm:$0xff] }
 0x452   :  { %8312 = vmatprep.mubr.bf16.mxu0 %v15371_v28  ;;  %v15398_v28 = vld [vmem:[#allocation96_spill] sm:$0xff] }
 0x453   :  { %8581 = vmatmul.mubr.bf16.gmra.mrb[8].mxu1 %v15381_v23  ;;  %v15405_v23 = vld [vmem:[#allocation79_spill] sm:$0xff] }
 0x454   :  { %8584 = vmatprep.mubr.bf16.mxu1 %v15382_v57  ;;  %v15399_v57 = vld [vmem:[#allocation48_spill] sm:$0xff] }
 0x459   :  { %8313 = vmatmul.mubr.bf16.gmra.mrb[76].mxu0 %v15372_v51  ;;  %v15409_v51 = vld [vmem:[#allocation87_spill] sm:$0xff] }
 0x45a   :  { %8316 = vmatprep.mubr.bf16.mxu0 %v15373_v7  ;;  %v15410_v7 = vld [vmem:[#allocation90_spill] sm:$0xff] }
 0x45b   :  { %8585 = vmatmul.mubr.bf16.gmra.mrb[12].mxu1 %v15395_v12  ;;  %v15421_v12 = vld [vmem:[#allocation97_spill] sm:$0xff] }
 0x45c   :  { %8588 = vmatprep.mubr.bf16.mxu1 %v15396_v49 }
 0x461   :  { %8317 = vmatmul.mubr.bf16.gmra.mrb[80].mxu0 %v15374_v5  ;;  %v15400_v5 = vld [vmem:[#allocation49_spill] sm:$0xff] }
 0x462   :  { %8320 = vmatprep.mubr.bf16.mxu0 %v11435_v34  ;;  %v15401_v34 = vld [vmem:[#allocation76_spill] sm:$0xff] }
 0x463   :  { %8589 = vmatmul.mubr.bf16.gmra.mrb[16].mxu1 %v15385_v62  ;;  %v15413_v62 = vld [vmem:[#allocation95_spill] sm:$0xff] }
 0x464   :  { %8592 = vmatprep.mubr.bf16.mxu1 %v15397_v44 }
 0x469   :  { %8321 = vmatmul.mubr.bf16.gmra.mrb[84].mxu0 %v11441_v11  ;;  %v9488_v11 = vld [vmem:[#allocation8 + $0x208] sm:$0xff]  }
 0x46a   :  { %8324 = vmatprep.mubr.bf16.mxu0 %v11443_v60  ;;  %v15402_v60 = vld [vmem:[#allocation78_spill] sm:$0xff] }
 0x46b   :  { %8593 = vmatmul.mubr.bf16.gmra.mrb[20].mxu1 %v15398_v28  ;;  %v15422_v28 = vld [vmem:[#allocation98_spill] sm:$0xff] }
 0x46c   :  { %8596 = vmatprep.mubr.bf16.mxu1 %v15399_v57 }
 0x471   :  { %8325 = vmatmul.mubr.bf16.gmra.mrb[88].mxu0 %v11448_v8  ;;  %v9489_v8 = vld [vmem:[#allocation8 + $0x210] sm:$0xff]  }
 0x472   :  { %8328 = vmatprep.mubr.bf16.mxu0 %v11475_v15  ;;  %v9490_v15 = vld [vmem:[#allocation8 + $0x218] sm:$0xff]  }
 0x473   :  { %8597 = vmatmul.mubr.bf16.gmra.mrb[24].mxu1 %v11278_v46  ;;  %v15404_v46 = vld [vmem:[#allocation28_spill] sm:$0xff] }
 0x474   :  { %8600 = vmatprep.mubr.bf16.mxu1 %v15400_v5  ;;  %v15423_v5 = vld [vmem:[#allocation99_spill] sm:$0xff] }
 0x479   :  { %8329 = vmatmul.mubr.bf16.gmra.mrb[92].mxu0 %v11707_v42  ;;  %v9491_v42 = vld [vmem:[#allocation8 + $0x220] sm:$0xff]  }
 0x47b   :  { %8601 = vmatmul.mubr.bf16.gmra.mrb[28].mxu1 %v11729_v24  ;;  %v9494_v24 = vld [vmem:[#allocation8 + $0x238] sm:$0xff]  }
 0x47c   :  { %8620 = vmatprep.mubr.bf16.mxu1 %v15401_v34 }
 0x483   :  { %8621 = vmatmul.mubr.bf16.vlgmr.msra.gmra.mrb[32].mxu1 %v15402_v60 }
 0x484   :  { %8685 = vmatpush3.bf16.msra.mxu1 %v9487_v10  ;;  %8624 = vmatprep.mubr.bf16.mxu1 %v15403_v6  ;;  %v15420_v10 = vld [vmem:[#allocation43_spill] sm:$0xff]  ;;  %v15424_v6 = vld [vmem:[#allocation100_spill] sm:$0xff] }
 0x485   :  { %8686 = vmatprep.subr.bf16.mxu1 %v9488_v11 }
 0x488   :  { %8687 = vmatpush3.bf16.msra.mxu1 %v9488_v11 }
 0x489   :  { %8688 = vmatprep.subr.bf16.mxu1 %v9489_v8 }
 0x48b   :  { %8625 = vmatmul.mubr.bf16.gmra.mrb[36].mxu1 %v15404_v46 }
 0x48c   :  { %8628 = vmatprep.mubr.bf16.mxu1 %v15405_v23  ;;  %8689 = vmatpush3.bf16.msra.mxu1 %v9489_v8 }
 0x48d   :  { %8690 = vmatprep.subr.bf16.mxu1 %v9490_v15 }
 0x490   :  { %8691 = vmatpush3.bf16.msra.mxu1 %v9490_v15  ;;  %v15425_v15 = vld [vmem:[#allocation101_spill] sm:$0xff] }
 0x491   :  { %8692 = vmatprep.subr.bf16.mxu1 %v9491_v42 }
 0x493   :  { %8629 = vmatmul.mubr.bf16.gmra.mrb[40].mxu1 %v15406_v40 }
 0x494   :  { %8632 = vmatprep.mubr.bf16.mxu1 %v15407_v35  ;;  %8693 = vmatpush3.bf16.msra.mxu1 %v9491_v42  ;;  %v15427_v35 = vld [vmem:[#allocation103_spill] sm:$0xff] }
 0x495   :  { %8694 = vmatprep.subr.bf16.mxu1 %v9492_v36 }
 0x498   :  { %8695 = vmatpush3.bf16.msra.mxu1 %v9492_v36  ;;  %v15426_v36 = vld [vmem:[#allocation102_spill] sm:$0xff] }
 0x499   :  { %8696 = vmatprep.subr.bf16.mxu1 %v9493_v29 }
 0x49b   :  { %8633 = vmatmul.mubr.bf16.gmra.mrb[44].mxu1 %v15408_v54 }
 0x49c   :  { %8636 = vmatprep.mubr.bf16.mxu1 %v15409_v51  ;;  %8697 = vmatpush3.bf16.msra.mxu1 %v9493_v29  ;;  %v15428_v51 = vld [vmem:[#allocation104_spill] sm:$0xff] }
 0x49d   :  { %8698 = vmatprep.subr.bf16.mxu1 %v9494_v24 }
 0x4a0   :  { %8699 = vmatpush3.bf16.msra.mxu1 %v9494_v24 }
 0x4a3   :  { %8637 = vmatmul.mubr.bf16.gmra.mrb[48].mxu1 %v15410_v7 }
 0x4a4   :  { %8640 = vmatprep.mubr.bf16.mxu1 %v15411_v16  ;;  %v15429_v16 = vld [vmem:[#allocation105_spill] sm:$0xff] }
 0x4ab   :  { %8641 = vmatmul.mubr.bf16.gmra.mrb[52].mxu1 %v15412_v2 }
 0x4ac   :  { %8644 = vmatprep.mubr.bf16.mxu1 %v15413_v62 }
 0x4b3   :  { %8645 = vmatmul.mubr.bf16.gmra.mrb[56].mxu1 %v15414_v1 }
 0x4b4   :  { %8648 = vmatprep.mubr.bf16.mxu1 %v15415_v31  ;;  %v15431_v31 = vld [vmem:[#allocation106_spill] sm:$0xff] }
 0x4bb   :  { %8649 = vmatmul.mubr.bf16.gmra.mrb[60].mxu1 %v15416_v59 }
 0x4bc   :  { %8652 = vmatprep.mubr.bf16.mxu1 %v15417_v27 }
 0x4c3   :  { %8653 = vmatmul.mubr.bf16.gmra.mrb[0].mxu1 %v15418_v19  ;;  %v15433_v19 = vld [vmem:[#allocation39_spill] sm:$0xff] }
 0x4c4   :  { %8656 = vmatprep.mubr.bf16.mxu1 %v15419_v52 }
 0x4cb   :  { %8657 = vmatmul.mubr.bf16.gmra.mrb[4].mxu1 %v15420_v10 }
 0x4cc   :  { %8660 = vmatprep.mubr.bf16.mxu1 %v15421_v12 }
 0x4d3   :  { %8661 = vmatmul.mubr.bf16.gmra.mrb[8].mxu1 %v15422_v28 }
 0x4d4   :  { %v11949_v49 = vpop.f32.mrb[96].mxu0  ;;  %8664 = vmatprep.mubr.bf16.mxu1 %v15423_v5 }
 0x4d5   :  { %v11951_v44 = vpop.f32.mrb[97].mxu0 }
 0x4d6   :  { %v11954_v57 = vpop.f32.mrb[98].mxu0 }
 0x4d7   :  { %v11957_v34 = vpop.f32.mrb[99].mxu0 }
 0x4db   :  { %8665 = vmatmul.mubr.bf16.gmra.mrb[12].mxu1 %v15424_v6 }
 0x4dc   :  { %v11959_v11 = vpop.f32.mrb[100].mxu0  ;;  %8668 = vmatprep.mubr.bf16.mxu1 %v15425_v15 }
 0x4dd   :  { %v11961_v60 = vpop.f32.mrb[101].mxu0 }
 0x4de   :  { %v11964_v8 = vpop.f32.mrb[102].mxu0 }
 0x4df   :  { %v11967_v46 = vpop.f32.mrb[103].mxu0 }
 0x4e3   :  { %8669 = vmatmul.mubr.bf16.gmra.mrb[16].mxu1 %v15426_v36 }
 0x4e4   :  { %v11969_v23 = vpop.f32.mrb[104].mxu0  ;;  %8672 = vmatprep.mubr.bf16.mxu1 %v15427_v35 }
 0x4e5   :  { %v11971_v42 = vpop.f32.mrb[105].mxu0 }
 0x4e6   :  { %v11974_v40 = vpop.f32.mrb[106].mxu0 }
 0x4e7   :  { %v11977_v29 = vpop.f32.mrb[107].mxu0 }
 0x4eb   :  { %8673 = vmatmul.mubr.bf16.gmra.mrb[20].mxu1 %v15428_v51 }
 0x4ec   :  { %v11979_v24 = vpop.f32.mrb[108].mxu0  ;;  %8676 = vmatprep.mubr.bf16.mxu1 %v15429_v16 }
 0x4ed   :  { %v11981_v54 = vpop.f32.mrb[109].mxu0 }
 0x4ee   :  { %v11984_v7 = vpop.f32.mrb[110].mxu0 }
 0x4ef   :  { %v11987_v2 = vpop.f32.mrb[111].mxu0 }
 0x4f3   :  { %8677 = vmatmul.mubr.bf16.gmra.mrb[24].mxu1 %v15431_v31 }
 0x4f4   :  { %v11989_v62 = vpop.f32.mrb[112].mxu0  ;;  %8680 = vmatprep.mubr.bf16.mxu1 %v15433_v19 }
 0x4f5   :  { %v11991_v1 = vpop.f32.mrb[113].mxu0 }
 0x4f6   :  { %15430 = vst [vmem:[#allocation36_spill] sm:$0xff] %v11991_v1  ;;  %v11994_v27 = vpop.f32.mrb[114].mxu0 }
 0x4f7   :  { %15432 = vst [vmem:[#allocation74_spill] sm:$0xff] %v11994_v27  ;;  %v11997_v52 = vpop.f32.mrb[115].mxu0 }
 0x4f8   :  { %15434 = vst [vmem:[#allocation57_spill] sm:$0xff] %v11997_v52 }
 0x4fb   :  { %8681 = vmatmul.mubr.bf16.gmra.mrb[28].mxu1 %v15416_v59 }
 0x4fc   :  { %v11999_v10 = vpop.f32.mrb[116].mxu0  ;;  %8700 = vmatprep.mubr.bf16.mxu1 %v11471_v32 }
 0x4fd   :  { %15435 = vst [vmem:[#allocation58_spill] sm:$0xff] %v11999_v10  ;;  %v12001_v12 = vpop.f32.mrb[117].mxu0 }
 0x4fe   :  { %15436 = vst [vmem:[#allocation55_spill] sm:$0xff] %v12001_v12  ;;  %v12004_v28 = vpop.f32.mrb[118].mxu0 }
 0x4ff   :  { %15437 = vst [vmem:[#allocation56_spill] sm:$0xff] %v12004_v28  ;;  %v12007_v5 = vpop.f32.mrb[119].mxu0 }
 0x500   :  { %15438 = vst [vmem:[#allocation61_spill] sm:$0xff] %v12007_v5 }
 0x503   :  { %8701 = vmatmul.mubr.bf16.vlgmr.msra.gmra.mrb[32].mxu1 %v11489_v38 }
 0x504   :  { %v12009_v6 = vpop.f32.mrb[120].mxu0  ;;  %8704 = vmatprep.mubr.bf16.mxu1 %v11499_v30 }
 0x505   :  { %15439 = vst [vmem:[#allocation62_spill] sm:$0xff] %v12009_v6  ;;  %v12011_v15 = vpop.f32.mrb[121].mxu0 }
 0x506   :  { %15440 = vst [vmem:[#allocation19_spill] sm:$0xff] %v12011_v15  ;;  %v12014_v36 = vpop.f32.mrb[122].mxu0 }
 0x507   :  { %15441 = vst [vmem:[#allocation59_spill] sm:$0xff] %v12014_v36  ;;  %v12017_v35 = vpop.f32.mrb[123].mxu0 }
 0x508   :  { %15442 = vst [vmem:[#allocation60_spill] sm:$0xff] %v12017_v35 }
 0x50b   :  { %8705 = vmatmul.mubr.bf16.gmra.mrb[36].mxu1 %v11505_v33 }
 0x50c   :  { %v12019_v51 = vpop.f32.mrb[124].mxu0  ;;  %8708 = vmatprep.mubr.bf16.mxu1 %v11512_v53 }
 0x50d   :  { %15443 = vst [vmem:[#allocation21_spill] sm:$0xff] %v12019_v51  ;;  %v12021_v59 = vpop.f32.mrb[125].mxu0 }
 0x50e   :  { %15444 = vst [vmem:[#allocation23_spill] sm:$0xff] %v12021_v59  ;;  %v12024_v32 = vpop.f32.mrb[126].mxu0 }
 0x50f   :  { %15445 = vst [vmem:[#allocation20_spill] sm:$0xff] %v12024_v32  ;;  %v12027_v16 = vpop.f32.mrb[127].mxu0 }
 0x510   :  { %15446 = vst [vmem:[#allocation63_spill] sm:$0xff] %v12027_v16 }
 0x513   :  { %8709 = vmatmul.mubr.bf16.gmra.mrb[40].mxu1 %v11519_v37 }
 0x514   :  { %v8302_v31 = vpop.f32.mrb[64].mxu0  ;;  %8712 = vmatprep.mubr.bf16.mxu1 %v11530_v45 }
 0x515   :  { %v3385_v38 = vpop.f32.mrb[65].mxu0 }
 0x516   :  { %v8303_v19 = vpop.f32.mrb[66].mxu0 }
 0x517   :  { %v3388_v30 = vpop.f32.mrb[67].mxu0 }
 0x51b   :  { %8713 = vmatmul.mubr.bf16.gmra.mrb[44].mxu1 %v11537_v47 }
 0x51c   :  { %v12031_v35 = vpop.f32.mrb[68].mxu0  ;;  %8716 = vmatprep.mubr.bf16.mxu1 %v11543_v58 }
 0x51d   :  { %v12033_v51 = vpop.f32.mrb[69].mxu0 }
 0x51e   :  { %v12036_v33 = vpop.f32.mrb[70].mxu0 }
 0x51f   :  { %v12039_v53 = vpop.f32.mrb[71].mxu0 }
 0x523   :  { %8717 = vmatmul.mubr.bf16.gmra.mrb[48].mxu1 %v11549_v21 }
 0x524   :  { %v12041_v16 = vpop.f32.mrb[72].mxu0  ;;  %8720 = vmatprep.mubr.bf16.mxu1 %v11560_v56 }
 0x525   :  { %v12043_v32 = vpop.f32.mrb[73].mxu0 }
 0x526   :  { %v12046_v37 = vpop.f32.mrb[74].mxu0 }
 0x527   :  { %v12049_v45 = vpop.f32.mrb[75].mxu0 }
 0x52b   :  { %8721 = vmatmul.mubr.bf16.gmra.mrb[52].mxu1 %v11567_v13 }
 0x52c   :  { %v12051_v59 = vpop.f32.mrb[76].mxu0  ;;  %8724 = vmatprep.mubr.bf16.mxu1 %v11573_v3 }
 0x52d   :  { %v12053_v47 = vpop.f32.mrb[77].mxu0 }
 0x52e   :  { %v12056_v58 = vpop.f32.mrb[78].mxu0 }
 0x52f   :  { %v12059_v36 = vpop.f32.mrb[79].mxu0 }
 0x533   :  { %8725 = vmatmul.mubr.bf16.gmra.mrb[56].mxu1 %v11580_v20 }
 0x534   :  { %v12061_v15 = vpop.f32.mrb[80].mxu0  ;;  %8728 = vmatprep.mubr.bf16.mxu1 %v11588_v18 }
 0x535   :  { %v12063_v21 = vpop.f32.mrb[81].mxu0 }
 0x536   :  { %v12066_v56 = vpop.f32.mrb[82].mxu0 }
 0x537   :  { %v12069_v6 = vpop.f32.mrb[83].mxu0 }
 0x53b   :  { %8729 = vmatmul.mubr.bf16.gmra.mrb[60].mxu1 %v11806_v26 }
 0x53c   :  { %v12071_v5 = vpop.f32.mrb[84].mxu0  ;;  %8732 = vmatprep.mubr.bf16.mxu1 %v11594_v50 }
 0x53d   :  { %v12073_v13 = vpop.f32.mrb[85].mxu0 }
 0x53e   :  { %v12076_v3 = vpop.f32.mrb[86].mxu0 }
 0x53f   :  { %v12079_v28 = vpop.f32.mrb[87].mxu0 }
 0x543   :  { %8733 = vmatmul.mubr.bf16.gmra.mrb[0].mxu1 %v11826_v48 }
 0x544   :  { %v12081_v12 = vpop.f32.mrb[88].mxu0  ;;  %8736 = vmatprep.mubr.bf16.mxu1 %v15389_v43 }
 0x545   :  { %v12083_v20 = vpop.f32.mrb[89].mxu0 }
 0x546   :  { %v12086_v18 = vpop.f32.mrb[90].mxu0 }
 0x547   :  { %v12089_v10 = vpop.f32.mrb[91].mxu0 }
 0x54b   :  { %8737 = vmatmul.mubr.bf16.gmra.mrb[4].mxu1 %v11837_v9 }
 0x54c   :  { %v12091_v52 = vpop.f32.mrb[92].mxu0  ;;  %8740 = vmatprep.mubr.bf16.mxu1 %v15390_v17 }
 0x54d   :  { %v12093_v27 = vpop.f32.mrb[93].mxu0 }
 0x54e   :  { %v12096_v50 = vpop.f32.mrb[94].mxu0 }
 0x54f   :  { %v12099_v1 = vpop.f32.mrb[95].mxu0 }
 0x553   :  { %8741 = vmatmul.mubr.bf16.gmra.mrb[8].mxu1 %v15391_v4 }
 0x554   :  { %8744 = vmatprep.mubr.bf16.mxu1 %v15392_v22 }
 0x55b   :  { %8745 = vmatmul.mubr.bf16.gmra.mrb[12].mxu1 %v15393_v41 }
 0x55c   :  { %8748 = vmatprep.mubr.bf16.mxu1 %v15394_v55 }
 0x563   :  { %8749 = vmatmul.mubr.bf16.gmra.mrb[16].mxu1 %v11663_v14 }
 0x564   :  { %8752 = vmatprep.mubr.bf16.mxu1 %v11675_v25 }
 0x56b   :  { %8753 = vmatmul.mubr.bf16.gmra.mrb[20].mxu1 %v11681_v0 }
 0x56c   :  { %8756 = vmatprep.mubr.bf16.mxu1 %v11687_v61 }
 0x573   :  { %8757 = vmatmul.mubr.bf16.gmra.mrb[24].mxu1 %v11693_v63 }
 0x574   :  { %8760 = vmatprep.mubr.bf16.mxu1 %v11702_v39 }
 0x57b   :  { %8761 = vmatmul.mubr.bf16.gmra.mrb[28].mxu1 %v11806_v26 }
 0x5d6   :  { %v8702_v48 = vpop.f32.mrb[32].mxu1 }
 0x5d7   :  { %v12112_v9 = vadd.f32 %v8702_v48, %v8302_v31  ;;  %v5532_v43 = vpop.f32.mrb[33].mxu1 }
 0x5d8   :  { %v12114_v17 = vadd.f32 %v5532_v43, %v3385_v38  ;;  %v8703_v4 = vpop.f32.mrb[34].mxu1 }
 0x5d9   :  { %v12116_v14 = vadd.f32 %v8703_v4, %v8303_v19  ;;  %v5535_v25 = vpop.f32.mrb[35].mxu1 }
 0x5da   :  { %v12118_v22 = vadd.f32 %v5535_v25, %v3388_v30 }
 0x5dc   :  { %v5853_v0 = vadd.f32 %v12118_v22, %v12114_v17 }
 0x5de   :  { %v5854_v61 = vadd.f32 %v12112_v9, %v5853_v0  ;;  %v8706_v63 = vpop.f32.mrb[36].mxu1 }
 0x5df   :  { %v12124_v26 = vadd.f32 %v8706_v63, %v12031_v35  ;;  %v5548_v39 = vpop.f32.mrb[37].mxu1 }
 0x5e0   :  { %v12127_v41 = vadd.f32 %v5548_v39, %v12033_v51  ;;  %v5855_v55 = vadd.f32 %v12116_v14, %v5854_v61  ;;  %v8707_v31 = vpop.f32.mrb[38].mxu1 }
 0x5e1   :  { %v12131_v38 = vadd.f32 %v8707_v31, %v12036_v33  ;;  %v5551_v19 = vpop.f32.mrb[39].mxu1 }
 0x5e2   :  { %v5856_v30 = vadd.f32 %v12127_v41, %v5855_v55  ;;  %v12135_v48 = vadd.f32 %v5551_v19, %v12039_v53 }
 0x5e4   :  { %v5857_v43 = vadd.f32 %v12135_v48, %v5856_v30 }
 0x5e6   :  { %v5858_v35 = vadd.f32 %v12124_v26, %v5857_v43  ;;  %v8710_v4 = vpop.f32.mrb[40].mxu1 }
 0x5e7   :  { %v12140_v51 = vadd.f32 %v8710_v4, %v12041_v16  ;;  %v5564_v25 = vpop.f32.mrb[41].mxu1 }
 0x5e8   :  { %v12143_v0 = vadd.f32 %v5564_v25, %v12043_v32  ;;  %v5859_v33 = vadd.f32 %v12131_v38, %v5858_v35  ;;  %v8711_v61 = vpop.f32.mrb[42].mxu1 }
 0x5e9   :  { %v12147_v63 = vadd.f32 %v8711_v61, %v12046_v37  ;;  %v5567_v53 = vpop.f32.mrb[43].mxu1 }
 0x5ea   :  { %v5860_v39 = vadd.f32 %v12143_v0, %v5859_v33  ;;  %v12151_v55 = vadd.f32 %v5567_v53, %v12049_v45 }
 0x5ec   :  { %v5861_v31 = vadd.f32 %v12151_v55, %v5860_v39 }
 0x5ee   :  { %v5862_v16 = vadd.f32 %v12140_v51, %v5861_v31  ;;  %v8714_v19 = vpop.f32.mrb[44].mxu1 }
 0x5ef   :  { %v12156_v32 = vadd.f32 %v8714_v19, %v12051_v59  ;;  %v5580_v30 = vpop.f32.mrb[45].mxu1 }
 0x5f0   :  { %v12159_v43 = vadd.f32 %v5580_v30, %v12053_v47  ;;  %v5863_v37 = vadd.f32 %v12147_v63, %v5862_v16  ;;  %v8715_v35 = vpop.f32.mrb[46].mxu1 }
 0x5f1   :  { %v12163_v4 = vadd.f32 %v8715_v35, %v12056_v58  ;;  %v5583_v45 = vpop.f32.mrb[47].mxu1 }
 0x5f2   :  { %v5864_v25 = vadd.f32 %v12159_v43, %v5863_v37  ;;  %v12167_v33 = vadd.f32 %v5583_v45, %v12059_v36 }
 0x5f4   :  { %v5865_v61 = vadd.f32 %v12167_v33, %v5864_v25 }
 0x5f6   :  { %v5866_v59 = vadd.f32 %v12156_v32, %v5865_v61  ;;  %v8718_v53 = vpop.f32.mrb[48].mxu1 }
 0x5f7   :  { %v12172_v47 = vadd.f32 %v8718_v53, %v12061_v15  ;;  %v5596_v39 = vpop.f32.mrb[49].mxu1 }
 0x5f8   :  { %v12175_v31 = vadd.f32 %v5596_v39, %v12063_v21  ;;  %v5867_v58 = vadd.f32 %v12163_v4, %v5866_v59  ;;  %v8719_v16 = vpop.f32.mrb[50].mxu1 }
 0x5f9   :  { %v12179_v19 = vadd.f32 %v8719_v16, %v12066_v56  ;;  %v5599_v36 = vpop.f32.mrb[51].mxu1 }
 0x5fa   :  { %v5868_v30 = vadd.f32 %v12175_v31, %v5867_v58  ;;  %v12183_v37 = vadd.f32 %v5599_v36, %v12069_v6 }
 0x5fc   :  { %v5869_v35 = vadd.f32 %v12183_v37, %v5868_v30 }
 0x5fe   :  { %v5870_v15 = vadd.f32 %v12172_v47, %v5869_v35  ;;  %v8722_v45 = vpop.f32.mrb[52].mxu1 }
 0x5ff   :  { %v12188_v21 = vadd.f32 %v8722_v45, %v12071_v5  ;;  %v5612_v25 = vpop.f32.mrb[53].mxu1 }
 0x600   :  { %v12191_v61 = vadd.f32 %v5612_v25, %v12073_v13  ;;  %v5871_v56 = vadd.f32 %v12179_v19, %v5870_v15  ;;  %v8723_v59 = vpop.f32.mrb[54].mxu1 }
 0x601   :  { %v12195_v53 = vadd.f32 %v8723_v59, %v12076_v3  ;;  %v5615_v6 = vpop.f32.mrb[55].mxu1 }
 0x602   :  { %v5872_v39 = vadd.f32 %v12191_v61, %v5871_v56  ;;  %v12199_v58 = vadd.f32 %v5615_v6, %v12079_v28 }
 0x604   :  { %v5873_v16 = vadd.f32 %v12199_v58, %v5872_v39 }
 0x606   :  { %v5874_v5 = vadd.f32 %v12188_v21, %v5873_v16  ;;  %v8726_v36 = vpop.f32.mrb[56].mxu1 }
 0x607   :  { %v12204_v13 = vadd.f32 %v8726_v36, %v12081_v12  ;;  %v5628_v30 = vpop.f32.mrb[57].mxu1 }
 0x608   :  { %v12207_v35 = vadd.f32 %v5628_v30, %v12083_v20  ;;  %v5875_v3 = vadd.f32 %v12195_v53, %v5874_v5  ;;  %v8727_v15 = vpop.f32.mrb[58].mxu1 }
 0x609   :  { %15447 = vst [vmem:[#allocation64_spill] sm:$0xff] %v12204_v13  ;;  %v12211_v45 = vadd.f32 %v8727_v15, %v12086_v18  ;;  %v5631_v28 = vpop.f32.mrb[59].mxu1 }
 0x60a   :  { %v5876_v25 = vadd.f32 %v12207_v35, %v5875_v3  ;;  %v12215_v56 = vadd.f32 %v5631_v28, %v12089_v10 }
 0x60b   :  { %15448 = vst [vmem:[#allocation65_spill] sm:$0xff] %v12211_v45 }
 0x60c   :  { %v5877_v59 = vadd.f32 %v12215_v56, %v5876_v25 }
 0x60e   :  { %v5878_v12 = vadd.f32 %v12204_v13, %v5877_v59  ;;  %v8730_v6 = vpop.f32.mrb[60].mxu1 }
 0x60f   :  { %v12220_v20 = vadd.f32 %v8730_v6, %v12091_v52  ;;  %v5644_v39 = vpop.f32.mrb[61].mxu1 }
 0x610   :  { %v12223_v16 = vadd.f32 %v5644_v39, %v12093_v27  ;;  %v5879_v18 = vadd.f32 %v12211_v45, %v5878_v12  ;;  %v8731_v5 = vpop.f32.mrb[62].mxu1 }
 0x611   :  { %15449 = vst [vmem:[#allocation66_spill] sm:$0xff] %v12220_v20  ;;  %v12227_v36 = vadd.f32 %v8731_v5, %v12096_v50  ;;  %v5647_v10 = vpop.f32.mrb[63].mxu1 }
 0x612   :  { %15450 = vst [vmem:[#allocation67_spill] sm:$0xff] %v12223_v16  ;;  %v5880_v30 = vadd.f32 %v12223_v16, %v5879_v18  ;;  %v12231_v3 = vadd.f32 %v5647_v10, %v12099_v1  ;;  %v15480_v16 = vld [vmem:[#allocation63_spill] sm:$0xff] }
 0x613   :  { %15451 = vst [vmem:[#allocation68_spill] sm:$0xff] %v12227_v36 }
 0x614   :  { %15452 = vst [vmem:[#allocation69_spill] sm:$0xff] %v12231_v3  ;;  %v5881_v15 = vadd.f32 %v12231_v3, %v5880_v30  ;;  %v15479_v3 = vld [vmem:[#allocation20_spill] sm:$0xff] }
 0x616   :  { %v5882_v52 = vadd.f32 %v12220_v20, %v5881_v15  ;;  %v8734_v28 = vpop.f32.mrb[0].mxu1 }
 0x617   :  { %v12236_v27 = vadd.f32 %v8734_v28, %v11949_v49  ;;  %v5660_v25 = vpop.f32.mrb[1].mxu1 }
 0x618   :  { %v12239_v59 = vadd.f32 %v5660_v25, %v11951_v44  ;;  %v5883_v50 = vadd.f32 %v12227_v36, %v5882_v52  ;;  %v8735_v12 = vpop.f32.mrb[2].mxu1 }
 0x619   :  { %15453 = vst [vmem:[#allocation70_spill] sm:$0xff] %v12236_v27  ;;  %v12243_v6 = vadd.f32 %v8735_v12, %v11954_v57  ;;  %v5663_v1 = vpop.f32.mrb[3].mxu1 }
 0x61a   :  { %15454 = vst [vmem:[#allocation22_spill] sm:$0xff] %v12239_v59  ;;  %v5884_v39 = vadd.f32 %v12239_v59, %v5883_v50  ;;  %v12247_v18 = vadd.f32 %v5663_v1, %v11957_v34  ;;  %v15476_v59 = vld [vmem:[#allocation60_spill] sm:$0xff] }
 0x61b   :  { %15455 = vst [vmem:[#allocation71_spill] sm:$0xff] %v12243_v6 }
 0x61c   :  { %15456 = vst [vmem:[#allocation72_spill] sm:$0xff] %v12247_v18  ;;  %v5885_v5 = vadd.f32 %v12247_v18, %v5884_v39  ;;  %v15475_v18 = vld [vmem:[#allocation59_spill] sm:$0xff] }
 0x61e   :  { %v5886_v49 = vadd.f32 %v12236_v27, %v5885_v5  ;;  %v8738_v10 = vpop.f32.mrb[4].mxu1 }
 0x61f   :  { %v12252_v44 = vadd.f32 %v8738_v10, %v11959_v11  ;;  %v5676_v30 = vpop.f32.mrb[5].mxu1 }
 0x620   :  { %v12255_v15 = vadd.f32 %v5676_v30, %v11961_v60  ;;  %v5887_v57 = vadd.f32 %v12243_v6, %v5886_v49  ;;  %v8739_v52 = vpop.f32.mrb[6].mxu1 }
 0x621   :  { %15457 = vst [vmem:[#allocation25_spill] sm:$0xff] %v12252_v44  ;;  %v12259_v28 = vadd.f32 %v8739_v52, %v11964_v8  ;;  %v5679_v34 = vpop.f32.mrb[7].mxu1 }
 0x622   :  { %15458 = vst [vmem:[#allocation37_spill] sm:$0xff] %v12255_v15  ;;  %v5888_v25 = vadd.f32 %v12255_v15, %v5887_v57  ;;  %v12263_v50 = vadd.f32 %v5679_v34, %v11967_v46  ;;  %v15472_v15 = vld [vmem:[#allocation61_spill] sm:$0xff] }
 0x623   :  { %15459 = vst [vmem:[#allocation51_spill] sm:$0xff] %v12259_v28 }
 0x624   :  { %15460 = vst [vmem:[#allocation27_spill] sm:$0xff] %v12263_v50  ;;  %v5889_v12 = vadd.f32 %v12263_v50, %v5888_v25 }
 0x626   :  { %v5890_v11 = vadd.f32 %v12252_v44, %v5889_v12  ;;  %v8742_v1 = vpop.f32.mrb[8].mxu1 }
 0x627   :  { %v12268_v60 = vadd.f32 %v8742_v1, %v11969_v23  ;;  %v5692_v39 = vpop.f32.mrb[9].mxu1 }
 0x628   :  { %v12271_v5 = vadd.f32 %v5692_v39, %v11971_v42  ;;  %v5891_v8 = vadd.f32 %v12259_v28, %v5890_v11  ;;  %v8743_v49 = vpop.f32.mrb[10].mxu1  ;;  %v15470_v28 = vld [vmem:[#allocation55_spill] sm:$0xff] }
 0x629   :  { %15461 = vst [vmem:[#allocation24_spill] sm:$0xff] %v12268_v60  ;;  %v12275_v10 = vadd.f32 %v8743_v49, %v11974_v40  ;;  %v5695_v46 = vpop.f32.mrb[11].mxu1 }
 0x62a   :  { %15462 = vst [vmem:[#allocation29_spill] sm:$0xff] %v12271_v5  ;;  %v5892_v30 = vadd.f32 %v12271_v5, %v5891_v8  ;;  %v12279_v57 = vadd.f32 %v5695_v46, %v11977_v29 }
 0x62b   :  { %15463 = vst [vmem:[#allocation30_spill] sm:$0xff] %v12275_v10 }
 0x62c   :  { %15464 = vst [vmem:[#allocation31_spill] sm:$0xff] %v12279_v57  ;;  %v5893_v52 = vadd.f32 %v12279_v57, %v5892_v30  ;;  %v15468_v57 = vld [vmem:[#allocation57_spill] sm:$0xff] }
 0x62e   :  { %v5894_v23 = vadd.f32 %v12268_v60, %v5893_v52  ;;  %v8746_v34 = vpop.f32.mrb[12].mxu1 }
 0x62f   :  { %v12284_v42 = vadd.f32 %v8746_v34, %v11979_v24  ;;  %v5708_v25 = vpop.f32.mrb[13].mxu1 }
 0x630   :  { %v12287_v12 = vadd.f32 %v5708_v25, %v11981_v54  ;;  %v5895_v40 = vadd.f32 %v12275_v10, %v5894_v23  ;;  %v8747_v11 = vpop.f32.mrb[14].mxu1  ;;  %v15466_v54 = vld [vmem:[#allocation36_spill] sm:$0xff]  ;;  %v15467_v10 = vld [vmem:[#allocation74_spill] sm:$0xff] }
 0x631   :  { %v12291_v1 = vadd.f32 %v8747_v11, %v11984_v7  ;;  %v5711_v29 = vpop.f32.mrb[15].mxu1 }
 0x632   :  { %15465 = vst [vmem:[#allocation32_spill] sm:$0xff] %v12287_v12  ;;  %v5896_v39 = vadd.f32 %v12287_v12, %v5895_v40  ;;  %v8907_v8 = vadd.f32 %v5711_v29, %v11987_v2 }
 0x634   :  { %v5897_v49 = vadd.f32 %v8907_v8, %v5896_v39  ;;  %v15469_v39 = vld [vmem:[#allocation58_spill] sm:$0xff] }
 0x636   :  { %v5898_v46 = vadd.f32 %v12284_v42, %v5897_v49  ;;  %v8750_v24 = vpop.f32.mrb[16].mxu1 }
 0x637   :  { %v8908_v30 = vadd.f32 %v8750_v24, %v11989_v62  ;;  %v5724_v52 = vpop.f32.mrb[17].mxu1 }
 0x638   :  { %v8909_v34 = vadd.f32 %v5724_v52, %v15466_v54  ;;  %v5899_v23 = vadd.f32 %v12291_v1, %v5898_v46  ;;  %v8751_v25 = vpop.f32.mrb[18].mxu1  ;;  %v15471_v52 = vld [vmem:[#allocation56_spill] sm:$0xff] }
 0x639   :  { %v8910_v7 = vadd.f32 %v8751_v25, %v15467_v10  ;;  %v5727_v11 = vpop.f32.mrb[19].mxu1 }
 0x63a   :  { %v5900_v60 = vadd.f32 %v8909_v34, %v5899_v23  ;;  %v8911_v40 = vadd.f32 %v5727_v11, %v15468_v57  ;;  %v15473_v57 = vld [vmem:[#allocation62_spill] sm:$0xff]  ;;  %v15474_v11 = vld [vmem:[#allocation19_spill] sm:$0xff] }
 0x63c   :  { %v5901_v12 = vadd.f32 %v8911_v40, %v5900_v60 }
 0x63e   :  { %v5902_v2 = vadd.f32 %v8908_v30, %v5901_v12  ;;  %v8754_v29 = vpop.f32.mrb[20].mxu1 }
 0x63f   :  { %v8912_v49 = vadd.f32 %v8754_v29, %v15469_v39  ;;  %v5740_v5 = vpop.f32.mrb[21].mxu1 }
 0x640   :  { %v8913_v62 = vadd.f32 %v5740_v5, %v15470_v28  ;;  %v5903_v24 = vadd.f32 %v8910_v7, %v5902_v2  ;;  %v8755_v44 = vpop.f32.mrb[22].mxu1 }
 0x641   :  { %v8914_v54 = vadd.f32 %v8755_v44, %v15471_v52  ;;  %v5743_v46 = vpop.f32.mrb[23].mxu1 }
 0x642   :  { %v5904_v50 = vadd.f32 %v8913_v62, %v5903_v24  ;;  %v8915_v10 = vadd.f32 %v5743_v46, %v15472_v15  ;;  %v15477_v15 = vld [vmem:[#allocation21_spill] sm:$0xff] }
 0x644   :  { %v5905_v25 = vadd.f32 %v8915_v10, %v5904_v50 }
 0x646   :  { %v5906_v23 = vadd.f32 %v8912_v49, %v5905_v25  ;;  %v8758_v6 = vpop.f32.mrb[24].mxu1  ;;  %v15478_v25 = vld [vmem:[#allocation23_spill] sm:$0xff] }
 0x647   :  { %v8916_v60 = vadd.f32 %v8758_v6, %v15473_v57  ;;  %v5756_v12 = vpop.f32.mrb[25].mxu1 }
 0x648   :  { %v8917_v27 = vadd.f32 %v5756_v12, %v15474_v11  ;;  %v5907_v29 = vadd.f32 %v8914_v54, %v5906_v23  ;;  %v8759_v39 = vpop.f32.mrb[26].mxu1 }
 0x649   :  { %v8918_v28 = vadd.f32 %v8759_v39, %v15475_v18  ;;  %v5759_v5 = vpop.f32.mrb[27].mxu1 }
 0x64a   :  { %v5908_v2 = vadd.f32 %v8917_v27, %v5907_v29  ;;  %v8919_v44 = vadd.f32 %v5759_v5, %v15476_v59 }
 0x64c   :  { %v5909_v52 = vadd.f32 %v8919_v44, %v5908_v2 }
 0x64e   :  { %v5910_v24 = vadd.f32 %v8916_v60, %v5909_v52  ;;  %v8762_v36 = vpop.f32.mrb[28].mxu1 }
 0x64f   :  { %v8920_v50 = vadd.f32 %v8762_v36, %v15477_v15  ;;  %v5772_v46 = vpop.f32.mrb[29].mxu1 }
 0x650   :  { %v8921_v20 = vadd.f32 %v5772_v46, %v15478_v25  ;;  %v5911_v6 = vadd.f32 %v8918_v28, %v5910_v24  ;;  %v8763_v57 = vpop.f32.mrb[30].mxu1 }
 0x651   :  { %v8922_v12 = vadd.f32 %v8763_v57, %v15479_v3  ;;  %v5775_v23 = vpop.f32.mrb[31].mxu1 }
 0x652   :  { %v5912_v11 = vadd.f32 %v8921_v20, %v5911_v6  ;;  %v8923_v18 = vadd.f32 %v5775_v23, %v15480_v16 }
 0x654   :  { %v5913_v39 = vadd.f32 %v8923_v18, %v5912_v11 }
 0x656   :  { %v5914_v29 = vadd.f32 %v8920_v50, %v5913_v39 }
 0x658   :  { %v5915_v45 = vadd.f32 %v8922_v12, %v5914_v29 }
 0x65a   :  { %v5916_v59 = vrot.slane %v5915_v45, 4 }
 0x65c   :  { %v5917_v5 = vadd.f32 %v5916_v59, %v5915_v45 }
 0x65e   :  { %v5918_v2 = vrot.slane %v5917_v5, 2 }
 0x660   :  { %v5919_v52 = vadd.f32 %v5918_v2, %v5917_v5 }
 0x662   :  { %v5920_v13 = vrot.slane %v5919_v52, 1 }
 0x664   :  { %v5921_v36 = vadd.f32 %v5920_v13, %v5919_v52 }
 0x666   :  { %v12313_v15 = vmul.f32 0.001953125, %v5921_v36 }
 0x668   :  { %v12316_v24 = vsub.f32 %v8907_v8, %v12313_v15  ;;  %v12320_v3 = vsub.f32 %v12284_v42, %v12313_v15  ;;  %v12324_v16 = vsub.f32 %v12291_v1, %v12313_v15  ;;  %v12327_v46 = vsub.f32 %v8909_v34, %v12313_v15 }
 0x669   :  { %v12330_v45 = vsub.f32 %v8911_v40, %v12313_v15  ;;  %v12333_v13 = vsub.f32 %v8908_v30, %v12313_v15  ;;  %v12336_v8 = vsub.f32 %v8910_v7, %v12313_v15  ;;  %v12339_v25 = vsub.f32 %v8913_v62, %v12313_v15 }
 0x66a   :  { %v12342_v42 = vsub.f32 %v8915_v10, %v12313_v15  ;;  %v12345_v1 = vsub.f32 %v8912_v49, %v12313_v15  ;;  %v12348_v34 = vsub.f32 %v8914_v54, %v12313_v15  ;;  %v12351_v40 = vsub.f32 %v8917_v27, %v12313_v15 }
 0x66b   :  { %v12354_v30 = vsub.f32 %v8919_v44, %v12313_v15  ;;  %v12357_v7 = vsub.f32 %v8916_v60, %v12313_v15  ;;  %v12360_v62 = vsub.f32 %v8918_v28, %v12313_v15  ;;  %v12363_v10 = vsub.f32 %v8921_v20, %v12313_v15 }
 0x66c   :  { %15481 = vst [vmem:[#allocation33_spill] sm:$0xff] %v12351_v40  ;;  %v12366_v49 = vsub.f32 %v8923_v18, %v12313_v15  ;;  %v12369_v54 = vsub.f32 %v8920_v50, %v12313_v15  ;;  %v12372_v27 = vsub.f32 %v8922_v12, %v12313_v15  ;;  %v12376_v44 = vsub.f32 %v12114_v17, %v12313_v15 }
 0x66d   :  { %15482 = vst [vmem:[#allocation34_spill] sm:$0xff] %v12354_v30  ;;  %15483 = vst [vmem:[#allocation17_spill] sm:$0xff] %v12357_v7  ;;  %v12380_v60 = vsub.f32 %v12118_v22, %v12313_v15  ;;  %v12384_v20 = vsub.f32 %v12112_v9, %v12313_v15  ;;  %v12392_v6 = vsub.f32 %v12116_v14, %v12313_v15 }
 0x66e   :  { %15484 = vst [vmem:[#allocation18_spill] sm:$0xff] %v12360_v62  ;;  %15485 = vst [vmem:[#allocation35_spill] sm:$0xff] %v12363_v10  ;;  %v5987_v28 = vmul.f32 %v12376_v44, %v12376_v44  ;;  %v12396_v17 = vsub.f32 %v12127_v41, %v12313_v15  ;;  %v12402_v9 = vsub.f32 %v12135_v48, %v12313_v15 }
 0x66f   :  { %v5988_v50 = vmul.f32 %v12380_v60, %v12380_v60  ;;  %v5989_v22 = vmul.f32 %v12384_v20, %v12384_v20  ;;  %v5990_v12 = vmul.f32 %v12392_v6, %v12392_v6  ;;  %v12408_v14 = vsub.f32 %v12124_v26, %v12313_v15 }
 0x670   :  { %v5991_v41 = vmul.f32 %v12396_v17, %v12396_v17  ;;  %v12414_v18 = vsub.f32 %v12131_v38, %v12313_v15  ;;  %v5992_v48 = vmul.f32 %v12402_v9, %v12402_v9  ;;  %v12420_v29 = vsub.f32 %v12143_v0, %v12313_v15 }
 0x671   :  { %v6051_v57 = vadd.f32 %v5988_v50, %v5987_v28  ;;  %v5993_v26 = vmul.f32 %v12408_v14, %v12408_v14  ;;  %v12426_v5 = vsub.f32 %v12151_v55, %v12313_v15  ;;  %v12432_v52 = vsub.f32 %v12140_v51, %v12313_v15 }
 0x672   :  { %v5994_v38 = vmul.f32 %v12414_v18, %v12414_v18  ;;  %v5995_v0 = vmul.f32 %v12420_v29, %v12420_v29  ;;  %v12438_v28 = vsub.f32 %v12147_v63, %v12313_v15 }
 0x673   :  { %v6052_v23 = vadd.f32 %v6051_v57, %v5989_v22  ;;  %v5996_v55 = vmul.f32 %v12426_v5, %v12426_v5  ;;  %v12444_v22 = vsub.f32 %v12159_v43, %v12313_v15  ;;  %v5997_v51 = vmul.f32 %v12432_v52, %v12432_v52 }
 0x674   :  { %v5998_v63 = vmul.f32 %v12438_v28, %v12438_v28 }
 0x675   :  { %v6053_v11 = vadd.f32 %v6052_v23, %v5990_v12  ;;  %v12450_v12 = vsub.f32 %v12167_v33, %v12313_v15  ;;  %v5999_v43 = vmul.f32 %v12444_v22, %v12444_v22 }
 0x677   :  { %v6054_v39 = vadd.f32 %v6053_v11, %v5991_v41  ;;  %v12456_v41 = vsub.f32 %v12156_v32, %v12313_v15  ;;  %v6000_v33 = vmul.f32 %v12450_v12, %v12450_v12 }
 0x679   :  { %v6055_v59 = vadd.f32 %v6054_v39, %v5992_v48  ;;  %v12462_v48 = vsub.f32 %v12163_v4, %v12313_v15  ;;  %v6001_v32 = vmul.f32 %v12456_v41, %v12456_v41 }
 0x67b   :  { %v6056_v2 = vadd.f32 %v6055_v59, %v5993_v26  ;;  %v12468_v26 = vsub.f32 %v12175_v31, %v12313_v15  ;;  %v6002_v4 = vmul.f32 %v12462_v48, %v12462_v48 }
 0x67d   :  { %v6057_v36 = vadd.f32 %v6056_v2, %v5994_v38  ;;  %v12474_v38 = vsub.f32 %v12183_v37, %v12313_v15  ;;  %v6003_v31 = vmul.f32 %v12468_v26, %v12468_v26 }
 0x67f   :  { %v6058_v50 = vadd.f32 %v6057_v36, %v5995_v0  ;;  %v12480_v0 = vsub.f32 %v12172_v47, %v12313_v15  ;;  %v6004_v37 = vmul.f32 %v12474_v38, %v12474_v38 }
 0x681   :  { %v6059_v57 = vadd.f32 %v6058_v50, %v5996_v55  ;;  %v12486_v55 = vsub.f32 %v12179_v19, %v12313_v15  ;;  %v6005_v47 = vmul.f32 %v12480_v0, %v12480_v0 }
 0x683   :  { %v6060_v23 = vadd.f32 %v6059_v57, %v5997_v51  ;;  %v12492_v51 = vsub.f32 %v12191_v61, %v12313_v15  ;;  %v6006_v19 = vmul.f32 %v12486_v55, %v12486_v55 }
 0x685   :  { %v6061_v11 = vadd.f32 %v6060_v23, %v5998_v63  ;;  %v12498_v63 = vsub.f32 %v12199_v58, %v12313_v15  ;;  %v6007_v61 = vmul.f32 %v12492_v51, %v12492_v51 }
 0x687   :  { %v6062_v39 = vadd.f32 %v6061_v11, %v5999_v43  ;;  %v12504_v43 = vsub.f32 %v12188_v21, %v12313_v15  ;;  %v6008_v58 = vmul.f32 %v12498_v63, %v12498_v63 }
 0x689   :  { %v6063_v59 = vadd.f32 %v6062_v39, %v6000_v33  ;;  %v12510_v33 = vsub.f32 %v12195_v53, %v12313_v15  ;;  %v6009_v21 = vmul.f32 %v12504_v43, %v12504_v43 }
 0x68b   :  { %v6064_v2 = vadd.f32 %v6063_v59, %v6001_v32  ;;  %v12516_v32 = vsub.f32 %v12207_v35, %v12313_v15  ;;  %v6010_v53 = vmul.f32 %v12510_v33, %v12510_v33 }
 0x68d   :  { %v6065_v36 = vadd.f32 %v6064_v2, %v6002_v4  ;;  %v12522_v4 = vsub.f32 %v12215_v56, %v12313_v15  ;;  %v6011_v35 = vmul.f32 %v12516_v32, %v12516_v32 }
 0x68f   :  { %v6066_v50 = vadd.f32 %v6065_v36, %v6003_v31  ;;  %v15486_v31 = vld [vmem:[#allocation64_spill] sm:$0xff]  ;;  %v6012_v56 = vmul.f32 %v12522_v4, %v12522_v4 }
 0x690   :  { %v12528_v36 = vsub.f32 %v15486_v31, %v12313_v15  ;;  %v15494_v31 = vld [vmem:[#allocation66_spill] sm:$0xff] }
 0x691   :  { %v6067_v57 = vadd.f32 %v6066_v50, %v6004_v37  ;;  %v15488_v50 = vld [vmem:[#allocation65_spill] sm:$0xff] }
 0x692   :  { %15487 = vst [vmem:[#allocation77_spill] sm:$0xff] %v12528_v36 }
 0x693   :  { %v6068_v23 = vadd.f32 %v6067_v57, %v6005_v47  ;;  %v12534_v47 = vsub.f32 %v15488_v50, %v12313_v15 }
 0x695   :  { %v6069_v11 = vadd.f32 %v6068_v23, %v6006_v19  ;;  %15489 = vst [vmem:[#allocation80_spill] sm:$0xff] %v12534_v47  ;;  %v15490_v19 = vld [vmem:[#allocation67_spill] sm:$0xff] }
 0x696   :  { %v12540_v23 = vsub.f32 %v15490_v19, %v12313_v15 }
 0x697   :  { %v6070_v39 = vadd.f32 %v6069_v11, %v6007_v61  ;;  %v6013_v61 = vmul.f32 %v12528_v36, %v12528_v36 }
 0x698   :  { %15491 = vst [vmem:[#allocation81_spill] sm:$0xff] %v12540_v23 }
 0x699   :  { %v6071_v59 = vadd.f32 %v6070_v39, %v6008_v58  ;;  %v9495_v58 = vld [vmem:[#allocation9] sm:$0xff]   ;;  %v9496_v39 = vld [vmem:[#allocation9 + $0x8] sm:$0xff]  }
 0x69a   :  { %8764 = vmatprep.subr.bf16.mxu0 %v9495_v58 }
 0x69b   :  { %v6072_v2 = vadd.f32 %v6071_v59, %v6009_v21  ;;  %v15492_v21 = vld [vmem:[#allocation69_spill] sm:$0xff]  ;;  %8765 = vmatpush3.bf16.msra.mxu0 %v9495_v58  ;;  %v9498_v58 = vld [vmem:[#allocation9 + $0x18] sm:$0xff]  }
 0x69c   :  { %v12546_v59 = vsub.f32 %v15492_v21, %v12313_v15  ;;  %8766 = vmatprep.subr.bf16.mxu0 %v9496_v39 }
 0x69d   :  { %v6073_v37 = vadd.f32 %v6072_v2, %v6010_v53  ;;  %v6014_v53 = vmul.f32 %v12534_v47, %v12534_v47 }
 0x69e   :  { %15493 = vst [vmem:[#allocation84_spill] sm:$0xff] %v12546_v59  ;;  %v6016_v21 = vmul.f32 %v12546_v59, %v12546_v59 }
 0x69f   :  { %v6074_v57 = vadd.f32 %v6073_v37, %v6011_v35  ;;  %v12552_v35 = vsub.f32 %v15494_v31, %v12313_v15  ;;  %v6015_v37 = vmul.f32 %v12540_v23, %v12540_v23  ;;  %8767 = vmatpush3.bf16.msra.mxu0 %v9496_v39  ;;  %v9499_v39 = vld [vmem:[#allocation9 + $0x20] sm:$0xff]  }
 0x6a1   :  { %v6075_v11 = vadd.f32 %v6074_v57, %v6012_v56  ;;  %15495 = vst [vmem:[#allocation85_spill] sm:$0xff] %v12552_v35  ;;  %v9497_v56 = vld [vmem:[#allocation9 + $0x10] sm:$0xff]   ;;  %v15496_v57 = vld [vmem:[#allocation68_spill] sm:$0xff]  ;;  %v6017_v31 = vmul.f32 %v12552_v35, %v12552_v35 }
 0x6a2   :  { %v12558_v19 = vsub.f32 %v15496_v57, %v12313_v15  ;;  %8768 = vmatprep.subr.bf16.mxu0 %v9497_v56 }
 0x6a3   :  { %v6076_v2 = vadd.f32 %v6075_v11, %v6013_v61  ;;  %v15498_v11 = vld [vmem:[#allocation22_spill] sm:$0xff]  ;;  %8769 = vmatpush3.bf16.msra.mxu0 %v9497_v56  ;;  %v15507_v56 = vld [vmem:[#allocation27_spill] sm:$0xff] }
 0x6a4   :  { %15497 = vst [vmem:[#allocation88_spill] sm:$0xff] %v12558_v19  ;;  %v12564_v47 = vsub.f32 %v15498_v11, %v12313_v15  ;;  %v6018_v57 = vmul.f32 %v12558_v19, %v12558_v19  ;;  %8770 = vmatprep.subr.bf16.mxu0 %v9498_v58 }
 0x6a5   :  { %v6077_v50 = vadd.f32 %v6076_v2, %v6014_v53  ;;  %v15500_v53 = vld [vmem:[#allocation72_spill] sm:$0xff] }
 0x6a6   :  { %15499 = vst [vmem:[#allocation93_spill] sm:$0xff] %v12564_v47  ;;  %v12570_v2 = vsub.f32 %v15500_v53, %v12313_v15  ;;  %v6019_v11 = vmul.f32 %v12564_v47, %v12564_v47 }
 0x6a7   :  { %v6078_v61 = vadd.f32 %v6077_v50, %v6015_v37  ;;  %v15502_v37 = vld [vmem:[#allocation70_spill] sm:$0xff]  ;;  %8771 = vmatpush3.bf16.msra.mxu0 %v9498_v58  ;;  %v15511_v58 = vld [vmem:[#allocation51_spill] sm:$0xff] }
 0x6a8   :  { %15501 = vst [vmem:[#allocation52_spill] sm:$0xff] %v12570_v2  ;;  %v12576_v50 = vsub.f32 %v15502_v37, %v12313_v15  ;;  %v6020_v53 = vmul.f32 %v12570_v2, %v12570_v2  ;;  %8772 = vmatprep.subr.bf16.mxu0 %v9499_v39 }
 0x6a9   :  { %v6079_v23 = vadd.f32 %v6078_v61, %v6016_v21  ;;  %v15503_v21 = vld [vmem:[#allocation71_spill] sm:$0xff] }
 0x6aa   :  { %v12582_v61 = vsub.f32 %v15503_v21, %v12313_v15  ;;  %v6021_v37 = vmul.f32 %v12576_v50, %v12576_v50 }
 0x6ab   :  { %v6080_v59 = vadd.f32 %v6079_v23, %v6017_v31  ;;  %v15505_v23 = vld [vmem:[#allocation37_spill] sm:$0xff]  ;;  %8773 = vmatpush3.bf16.msra.mxu0 %v9499_v39  ;;  %v15514_v39 = vld [vmem:[#allocation31_spill] sm:$0xff] }
 0x6ac   :  { %15504 = vst [vmem:[#allocation53_spill] sm:$0xff] %v12582_v61  ;;  %v12588_v31 = vsub.f32 %v15505_v23, %v12313_v15  ;;  %v6022_v21 = vmul.f32 %v12582_v61, %v12582_v61 }
 0x6ad   :  { %v6081_v35 = vadd.f32 %v6080_v59, %v6018_v57  ;;  %v9500_v59 = vld [vmem:[#allocation9 + $0x28] sm:$0xff]   ;;  %v12594_v57 = vsub.f32 %v15507_v56, %v12313_v15 }
 0x6ae   :  { %15506 = vst [vmem:[#allocation42_spill] sm:$0xff] %v12588_v31  ;;  %v6023_v23 = vmul.f32 %v12588_v31, %v12588_v31  ;;  %8774 = vmatprep.subr.bf16.mxu0 %v9500_v59 }
 0x6af   :  { %v6082_v19 = vadd.f32 %v6081_v35, %v6019_v11  ;;  %15508 = vst [vmem:[#allocation44_spill] sm:$0xff] %v12594_v57  ;;  %v15509_v35 = vld [vmem:[#allocation25_spill] sm:$0xff]  ;;  %v6024_v56 = vmul.f32 %v12594_v57, %v12594_v57  ;;  %8775 = vmatpush3.bf16.msra.mxu0 %v9500_v59 }
 0x6b0   :  { %v12600_v11 = vsub.f32 %v15509_v35, %v12313_v15 }
 0x6b1   :  { %v6083_v47 = vadd.f32 %v6082_v19, %v6020_v53  ;;  %v9501_v19 = vld [vmem:[#allocation9 + $0x30] sm:$0xff]   ;;  %v12606_v53 = vsub.f32 %v15511_v58, %v12313_v15 }
 0x6b2   :  { %15510 = vst [vmem:[#allocation45_spill] sm:$0xff] %v12600_v11  ;;  %v6025_v35 = vmul.f32 %v12600_v11, %v12600_v11  ;;  %8776 = vmatprep.subr.bf16.mxu0 %v9501_v19 }
 0x6b3   :  { %v6084_v2 = vadd.f32 %v6083_v47, %v6021_v37  ;;  %15512 = vst [vmem:[#allocation46_spill] sm:$0xff] %v12606_v53  ;;  %v15513_v47 = vld [vmem:[#allocation29_spill] sm:$0xff]  ;;  %v6026_v58 = vmul.f32 %v12606_v53, %v12606_v53  ;;  %8777 = vmatpush3.bf16.msra.mxu0 %v9501_v19 }
 0x6b4   :  { %v12612_v37 = vsub.f32 %v15513_v47, %v12313_v15 }
 0x6b5   :  { %v6085_v36 = vadd.f32 %v6084_v2, %v6022_v21  ;;  %v9502_v2 = vld [vmem:[#allocation9 + $0x38] sm:$0xff]   ;;  %v12618_v21 = vsub.f32 %v15514_v39, %v12313_v15 }
 0x6b6   :  { %v6027_v47 = vmul.f32 %v12612_v37, %v12612_v37  ;;  %8778 = vmatprep.subr.bf16.mxu0 %v9502_v2 }
 0x6b7   :  { %v6086_v61 = vadd.f32 %v6085_v36, %v6023_v23  ;;  %v15515_v36 = vld [vmem:[#allocation24_spill] sm:$0xff]  ;;  %8779 = vmatpush3.bf16.msra.mxu0 %v9502_v2 }
 0x6b8   :  { %v12624_v23 = vsub.f32 %v15515_v36, %v12313_v15 }
 0x6b9   :  { %v6087_v31 = vadd.f32 %v6086_v61, %v6024_v56  ;;  %v15516_v61 = vld [vmem:[#allocation30_spill] sm:$0xff]  ;;  %v6028_v56 = vmul.f32 %v12618_v21, %v12618_v21 }
 0x6ba   :  { %v12630_v59 = vsub.f32 %v15516_v61, %v12313_v15  ;;  %v6029_v36 = vmul.f32 %v12624_v23, %v12624_v23 }
 0x6bb   :  { %v6088_v57 = vadd.f32 %v6087_v31, %v6025_v35  ;;  %v15517_v31 = vld [vmem:[#allocation32_spill] sm:$0xff] }
 0x6bc   :  { %v12636_v35 = vsub.f32 %v15517_v31, %v12313_v15  ;;  %v6033_v15 = vmul.f32 %v12320_v3, %v12320_v3 }
 0x6bd   :  { %v6089_v11 = vadd.f32 %v6088_v57, %v6026_v58  ;;  %v6030_v57 = vmul.f32 %v12630_v59, %v12630_v59 }
 0x6be   :  { %v6031_v58 = vmul.f32 %v12636_v35, %v12636_v35 }
 0x6bf   :  { %v6090_v39 = vadd.f32 %v6089_v11, %v6027_v47  ;;  %v6032_v11 = vmul.f32 %v12316_v24, %v12316_v24 }
 0x6c1   :  { %v6091_v53 = vadd.f32 %v6090_v39, %v6028_v56  ;;  %v6034_v56 = vmul.f32 %v12324_v16, %v12324_v16  ;;  %v6035_v39 = vmul.f32 %v12327_v46, %v12327_v46 }
 0x6c3   :  { %v6092_v19 = vadd.f32 %v6091_v53, %v6029_v36  ;;  %v6036_v36 = vmul.f32 %v12330_v45, %v12330_v45 }
 0x6c5   :  { %v6093_v61 = vadd.f32 %v6092_v19, %v6030_v57  ;;  %v6037_v19 = vmul.f32 %v12333_v13, %v12333_v13 }
 0x6c7   :  { %v6094_v47 = vadd.f32 %v6093_v61, %v6031_v58  ;;  %v6038_v61 = vmul.f32 %v12336_v8, %v12336_v8 }
 0x6c9   :  { %v6095_v31 = vadd.f32 %v6094_v47, %v6032_v11  ;;  %v6039_v47 = vmul.f32 %v12339_v25, %v12339_v25 }
 0x6cb   :  { %v6096_v2 = vadd.f32 %v6095_v31, %v6033_v15  ;;  %v6040_v31 = vmul.f32 %v12342_v42, %v12342_v42 }
 0x6cd   :  { %v6097_v53 = vadd.f32 %v6096_v2, %v6034_v56  ;;  %v6041_v2 = vmul.f32 %v12345_v1, %v12345_v1 }
 0x6cf   :  { %v6098_v57 = vadd.f32 %v6097_v53, %v6035_v39  ;;  %v6042_v53 = vmul.f32 %v12348_v34, %v12348_v34 }
 0x6d1   :  { %v6099_v58 = vadd.f32 %v6098_v57, %v6036_v36  ;;  %v6043_v57 = vmul.f32 %v12351_v40, %v12351_v40 }
 0x6d3   :  { %v6100_v11 = vadd.f32 %v6099_v58, %v6037_v19  ;;  %v6044_v58 = vmul.f32 %v12354_v30, %v12354_v30 }
 0x6d5   :  { %v6101_v15 = vadd.f32 %v6100_v11, %v6038_v61  ;;  %v6045_v11 = vmul.f32 %v12357_v7, %v12357_v7 }
 0x6d7   :  { %v6102_v56 = vadd.f32 %v6101_v15, %v6039_v47  ;;  %v6046_v15 = vmul.f32 %v12360_v62, %v12360_v62 }
 0x6d9   :  { %v6103_v39 = vadd.f32 %v6102_v56, %v6040_v31  ;;  %v6047_v56 = vmul.f32 %v12363_v10, %v12363_v10 }
 0x6db   :  { %v6104_v36 = vadd.f32 %v6103_v39, %v6041_v2  ;;  %v6048_v39 = vmul.f32 %v12366_v49, %v12366_v49 }
 0x6dd   :  { %v6105_v19 = vadd.f32 %v6104_v36, %v6042_v53  ;;  %v6049_v36 = vmul.f32 %v12369_v54, %v12369_v54 }
 0x6df   :  { %v6106_v61 = vadd.f32 %v6105_v19, %v6043_v57  ;;  %v6050_v19 = vmul.f32 %v12372_v27, %v12372_v27 }
 0x6e1   :  { %v6107_v47 = vadd.f32 %v6106_v61, %v6044_v58 }
 0x6e3   :  { %v6108_v31 = vadd.f32 %v6107_v47, %v6045_v11 }
 0x6e5   :  { %v6109_v2 = vadd.f32 %v6108_v31, %v6046_v15 }
 0x6e7   :  { %v6110_v53 = vadd.f32 %v6109_v2, %v6047_v56  ;;  %v5851_v56 = vld [vmem:[%s14684_s6] sm:$0x1] }
 0x6e9   :  { %v6111_v57 = vadd.f32 %v6110_v53, %v6048_v39  ;;  %v15518_v39 = vld [vmem:[#allocation16_spill] sm:$0xff] }
 0x6eb   :  { %v6112_v58 = vadd.f32 %v6111_v57, %v6049_v36 }
 0x6ed   :  { %v6113_v61 = vadd.f32 %v6112_v58, %v6050_v19 }
 0x6ef   :  { %v6114_v7 = vrot.slane %v6113_v61, 4 }
 0x6f1   :  { %v6115_v62 = vadd.f32 %v6114_v7, %v6113_v61  ;;  %v15520_v61 = vld [vmem:[#allocation42_spill] sm:$0xff] }
 0x6f3   :  { %v6116_v11 = vrot.slane %v6115_v62, 2 }
 0x6f5   :  { %v6117_v47 = vadd.f32 %v6116_v11, %v6115_v62  ;;  %v15521_v11 = vld [vmem:[#allocation44_spill] sm:$0xff] }
 0x6f7   :  { %v6118_v30 = vrot.slane %v6117_v47, 1 }
 0x6f9   :  { %v6119_v10 = vadd.f32 %v6118_v30, %v6117_v47 }
 0x6fb   :  { %v6120_v15 = vmul.f32 0.001953125, %v6119_v10 }
 0x6fd   :  { %v6121_v31 = vadd.f32 1e-05, %v6120_v15 }
 0x6ff   :  { %9537 = vrsqrt.f32 %v6121_v31 }
 0x709   :  { %v9538_v40 = vpop.eup %9537 }
 0x70a   :  { %v6123_v2 = vmul.f32 %v9538_v40, %v5851_v56 }
 0x70c   :  { %v12686_v53 = vrot.slane %v6123_v2, %v15518_v39 }
 0x70e   :  { %v12690_v36 = vmul.f32 %v12686_v53, %v12366_v49  ;;  %v6130_v7 = vmul.f32 %v12686_v53, %v12376_v44  ;;  %v6131_v30 = vmul.f32 %v12686_v53, %v12380_v60  ;;  %v6132_v62 = vmul.f32 %v12686_v53, %v12384_v20 }
 0x70f   :  { %v6133_v10 = vmul.f32 %v12686_v53, %v12392_v6  ;;  %v6134_v40 = vmul.f32 %v12686_v53, %v12396_v17  ;;  %v6135_v57 = vmul.f32 %v12686_v53, %v12402_v9  ;;  %v6136_v49 = vmul.f32 %v12686_v53, %v12408_v14 }
 0x710   :  { %v6137_v44 = vmul.f32 %v12686_v53, %v12414_v18  ;;  %v6138_v60 = vmul.f32 %v12686_v53, %v12420_v29  ;;  %v6139_v20 = vmul.f32 %v12686_v53, %v12426_v5  ;;  %v6140_v6 = vmul.f32 %v12686_v53, %v12432_v52  ;;  %v12727_v5 = vld [vmem:[%s14685_s7] ss:$0 sm:$0xff] }
 0x711   :  { %v6141_v17 = vmul.f32 %v12686_v53, %v12438_v28  ;;  %v6142_v9 = vmul.f32 %v12686_v53, %v12444_v22  ;;  %v6143_v14 = vmul.f32 %v12686_v53, %v12450_v12  ;;  %v6144_v18 = vmul.f32 %v12686_v53, %v12456_v41 }
 0x712   :  { %v6145_v29 = vmul.f32 %v12686_v53, %v12462_v48  ;;  %v6146_v52 = vmul.f32 %v12686_v53, %v12468_v26  ;;  %v6147_v28 = vmul.f32 %v12686_v53, %v12474_v38  ;;  %v12735_v22 = vmul.f32 %v12686_v53, %v12480_v0 }
 0x713   :  { %v12739_v12 = vmul.f32 %v12686_v53, %v12486_v55  ;;  %v12743_v41 = vmul.f32 %v12686_v53, %v12492_v51  ;;  %v12747_v48 = vmul.f32 %v12686_v53, %v12498_v63  ;;  %v12751_v26 = vmul.f32 %v12686_v53, %v12504_v43  ;;  %v15519_v63 = vld [vmem:[#allocation53_spill] sm:$0xff] }
 0x714   :  { %v12755_v38 = vmul.f32 %v12686_v53, %v12510_v33  ;;  %v12759_v0 = vmul.f32 %v12686_v53, %v12516_v32  ;;  %v12763_v55 = vmul.f32 %v12686_v53, %v12522_v4  ;;  %v12767_v51 = vmul.f32 %v12686_v53, %v12576_v50 }
 0x715   :  { %v12771_v43 = vmul.f32 %v12686_v53, %v15519_v63  ;;  %v6202_v19 = vadd.f32 %v12727_v5, %v6132_v62  ;;  %v6203_v33 = vadd.f32 %v12727_v5, %v6133_v10  ;;  %v6200_v58 = vadd.f32 %v12727_v5, %v6130_v7  ;;  %v15522_v10 = vld [vmem:[#allocation45_spill] sm:$0xff] }
 0x716   :  { %v6201_v32 = vadd.f32 %v12727_v5, %v6131_v30  ;;  %v12779_v4 = vmul.f32 %v12686_v53, %v15520_v61  ;;  %v12783_v50 = vmul.f32 %v12686_v53, %v15521_v11  ;;  %v6204_v47 = vadd.f32 %v12727_v5, %v6134_v40  ;;  %v15523_v30 = vld [vmem:[#allocation46_spill] sm:$0xff] }
 0x717   :  { %v6205_v15 = vadd.f32 %v12727_v5, %v6135_v57  ;;  %v6266_v31 = vmax.f32 %v6202_v19, 0.0  ;;  %v6267_v56 = vmax.f32 %v6203_v33, 0.0  ;;  %v6264_v2 = vmax.f32 %v6200_v58, 0.0 }
 0x718   :  { %v6265_v62 = vmax.f32 %v6201_v32, 0.0  ;;  %v12789_v7 = vmul.f32 %v12686_v53, %v15522_v10  ;;  %v12793_v63 = vmul.f32 %v12686_v53, %v15523_v30  ;;  %v6268_v61 = vmax.f32 %v6204_v47, 0.0 }
 0x719   :  { %v6269_v39 = vmax.f32 %v6205_v15, 0.0  ;;  %v12797_v11 = vmul.f32 %v12686_v53, %v12612_v37  ;;  %v12801_v40 = vmul.f32 %v12686_v53, %v12618_v21  ;;  %v6329_v57 = vpack.c.bf16 %v6267_v56, %v6266_v31 }
 0x71a   :  { %v6328_v19 = vpack.c.bf16 %v6265_v62, %v6264_v2  ;;  %v12805_v33 = vmul.f32 %v12686_v53, %v12624_v23  ;;  %v12809_v58 = vmul.f32 %v12686_v53, %v12630_v59  ;;  %v6206_v32 = vadd.f32 %v12727_v5, %v6136_v49 }
 0x71b   :  { %v6207_v47 = vadd.f32 %v12727_v5, %v6137_v44  ;;  %v12815_v37 = vmul.f32 %v12686_v53, %v12636_v35  ;;  %v6330_v21 = vpack.c.bf16 %v6269_v39, %v6268_v61  ;;  %v6208_v15 = vadd.f32 %v12727_v5, %v6138_v60 }
 0x71c   :  { %8780 = vmatprep.mubr.bf16.mxu0 %v6328_v19  ;;  %v6209_v31 = vadd.f32 %v12727_v5, %v6139_v20  ;;  %v12821_v23 = vmul.f32 %v12686_v53, %v12316_v24  ;;  %v12825_v59 = vmul.f32 %v12686_v53, %v12320_v3  ;;  %v12829_v49 = vmul.f32 %v12686_v53, %v12324_v16 }
 0x71d   :  { %v12833_v35 = vmul.f32 %v12686_v53, %v12327_v46  ;;  %8781 = vmatmul.mubr.bf16.vlgmr.msra.gmra.mrb[128].mxu0 %v6329_v57  ;;  %v12837_v39 = vmul.f32 %v12686_v53, %v12330_v45  ;;  %v12841_v24 = vmul.f32 %v12686_v53, %v12333_v13  ;;  %v12845_v3 = vmul.f32 %v12686_v53, %v12336_v8 }
 0x71e   :  { %v12849_v16 = vmul.f32 %v12686_v53, %v12339_v25  ;;  %8784 = vmatprep.mubr.bf16.mxu0 %v6330_v21  ;;  %v6270_v46 = vmax.f32 %v6206_v32, 0.0  ;;  %v6271_v44 = vmax.f32 %v6207_v47, 0.0  ;;  %v6210_v60 = vadd.f32 %v12727_v5, %v6140_v6  ;;  %v15525_v21 = vld [vmem:[#allocation34_spill] sm:$0xff] }
 0x71f   :  { %v6211_v45 = vadd.f32 %v12727_v5, %v6141_v17  ;;  %v6272_v20 = vmax.f32 %v6208_v15, 0.0  ;;  %v6273_v56 = vmax.f32 %v6209_v31, 0.0  ;;  %v6212_v13 = vadd.f32 %v12727_v5, %v6142_v9  ;;  %v15524_v9 = vld [vmem:[#allocation33_spill] sm:$0xff] }
 0x720   :  { %v6213_v2 = vadd.f32 %v12727_v5, %v6143_v14  ;;  %v6214_v8 = vadd.f32 %v12727_v5, %v6144_v18  ;;  %v6215_v62 = vadd.f32 %v12727_v5, %v6145_v29  ;;  %v6216_v25 = vadd.f32 %v12727_v5, %v6146_v52  ;;  %v15526_v31 = vld [vmem:[#allocation17_spill] sm:$0xff] }
 0x721   :  { %v6217_v10 = vadd.f32 %v12727_v5, %v6147_v28  ;;  %v12861_v30 = vmul.f32 %v12686_v53, %v12342_v42  ;;  %v12865_v6 = vmul.f32 %v12686_v53, %v12345_v1  ;;  %v12869_v17 = vmul.f32 %v12686_v53, %v12348_v34 }
 0x722   :  { %v12873_v14 = vmul.f32 %v12686_v53, %v15524_v9  ;;  %v6331_v18 = vpack.c.bf16 %v6271_v44, %v6270_v46  ;;  %v6274_v29 = vmax.f32 %v6210_v60, 0.0  ;;  %v6218_v52 = vadd.f32 %v12727_v5, %v12735_v22  ;;  %v15527_v44 = vld [vmem:[#allocation18_spill] sm:$0xff] }
 0x723   :  { %v6219_v42 = vadd.f32 %v12727_v5, %v12739_v12  ;;  %v6332_v28 = vpack.c.bf16 %v6273_v56, %v6272_v20  ;;  %v6275_v61 = vmax.f32 %v6211_v45, 0.0  ;;  %v6276_v1 = vmax.f32 %v6212_v13, 0.0  ;;  %v15528_v45 = vld [vmem:[#allocation35_spill] sm:$0xff] }
 0x724   :  { %v6277_v57 = vmax.f32 %v6213_v2, 0.0  ;;  %v6278_v19 = vmax.f32 %v6214_v8, 0.0  ;;  %v6279_v34 = vmax.f32 %v6215_v62, 0.0  ;;  %v6280_v32 = vmax.f32 %v6216_v25, 0.0 }
 0x725   :  { %8785 = vmatmul.mubr.bf16.gmra.mrb[132].mxu0 %v6331_v18  ;;  %v6281_v47 = vmax.f32 %v6217_v10, 0.0  ;;  %v12881_v15 = vmul.f32 %v12686_v53, %v15525_v21  ;;  %v12885_v46 = vmul.f32 %v12686_v53, %v15526_v31  ;;  %v12889_v22 = vadd.f32 %v12727_v5, %v12743_v41 }
 0x726   :  { %8788 = vmatprep.mubr.bf16.mxu0 %v6332_v28  ;;  %v12893_v12 = vadd.f32 %v12727_v5, %v12747_v48  ;;  %v12897_v60 = vmul.f32 %v12686_v53, %v15527_v44  ;;  %v12901_v20 = vmul.f32 %v12686_v53, %v15528_v45  ;;  %v6282_v56 = vmax.f32 %v6218_v52, 0.0 }
 0x727   :  { %v6283_v13 = vmax.f32 %v6219_v42, 0.0  ;;  %v12905_v2 = vmul.f32 %v12686_v53, %v12369_v54  ;;  %v12909_v41 = vmul.f32 %v12686_v53, %v12372_v27  ;;  %v6333_v48 = vpack.c.bf16 %v6275_v61, %v6274_v29 }
 0x728   :  { %v6334_v8 = vpack.c.bf16 %v6277_v57, %v6276_v1  ;;  %v6335_v62 = vpack.c.bf16 %v6279_v34, %v6278_v19  ;;  %v6336_v25 = vpack.c.bf16 %v6281_v47, %v6280_v32  ;;  %v12913_v10 = vadd.f32 %v12727_v5, %v12751_v26 }
 0x729   :  { %v12917_v9 = vadd.f32 %v12727_v5, %v12755_v38  ;;  %v6284_v18 = vmax.f32 %v12889_v22, 0.0  ;;  %v6285_v54 = vmax.f32 %v12893_v12, 0.0  ;;  %v6234_v27 = vadd.f32 %v12727_v5, %v12767_v51 }
 0x72a   :  { %v6235_v29 = vadd.f32 %v12727_v5, %v12771_v43  ;;  %v12925_v52 = vpack.c.bf16 %v6283_v13, %v6282_v56  ;;  %v12929_v26 = vadd.f32 %v12727_v5, %v12759_v0  ;;  %v6236_v38 = vadd.f32 %v12727_v5, %v12779_v4 }
 0x72b   :  { %v6237_v42 = vadd.f32 %v12727_v5, %v12783_v50  ;;  %v6298_v28 = vmax.f32 %v6234_v27, 0.0  ;;  %v6238_v51 = vadd.f32 %v12727_v5, %v12789_v7  ;;  %v6239_v43 = vadd.f32 %v12727_v5, %v12793_v63 }
 0x72c   :  { %v6299_v61 = vmax.f32 %v6235_v29, 0.0  ;;  %v12941_v1 = vadd.f32 %v12727_v5, %v12763_v55  ;;  %v6300_v0 = vmax.f32 %v6236_v38, 0.0  ;;  %v6240_v4 = vadd.f32 %v12727_v5, %v12797_v11 }
 0x72d   :  { %8789 = vmatmul.mubr.bf16.gmra.mrb[136].mxu0 %v6333_v48  ;;  %v6301_v57 = vmax.f32 %v6237_v42, 0.0  ;;  %v6302_v19 = vmax.f32 %v6238_v51, 0.0  ;;  %v6303_v34 = vmax.f32 %v6239_v43, 0.0  ;;  %v6241_v7 = vadd.f32 %v12727_v5, %v12801_v40 }
 0x72e   :  { %8792 = vmatprep.mubr.bf16.mxu0 %v6334_v8  ;;  %v12945_v50 = vpack.c.bf16 %v6299_v61, %v6298_v28  ;;  %v6304_v63 = vmax.f32 %v6240_v4, 0.0  ;;  %v6242_v55 = vadd.f32 %v12727_v5, %v12805_v33  ;;  %v6243_v47 = vadd.f32 %v12727_v5, %v12809_v58 }
 0x72f   :  { %v12949_v32 = vpack.c.bf16 %v6301_v57, %v6300_v0  ;;  %v12955_v21 = vpack.c.bf16 %v6303_v34, %v6302_v19  ;;  %v6305_v11 = vmax.f32 %v6241_v7, 0.0  ;;  %v6244_v31 = vadd.f32 %v12727_v5, %v12815_v37 }
 0x730   :  { %v6245_v44 = vadd.f32 %v12727_v5, %v12821_v23  ;;  %v6306_v45 = vmax.f32 %v6242_v55, 0.0  ;;  %v6307_v40 = vmax.f32 %v6243_v47, 0.0  ;;  %v6246_v56 = vadd.f32 %v12727_v5, %v12825_v59 }
 0x731   :  { %v6247_v33 = vadd.f32 %v12727_v5, %v12829_v49  ;;  %v12965_v13 = vpack.c.bf16 %v6305_v11, %v6304_v63  ;;  %v6308_v58 = vmax.f32 %v6244_v31, 0.0  ;;  %v6248_v8 = vadd.f32 %v12727_v5, %v12833_v35 }
 0x732   :  { %v6309_v48 = vmax.f32 %v6245_v44, 0.0  ;;  %v12969_v27 = vpack.c.bf16 %v6307_v40, %v6306_v45  ;;  %v6310_v37 = vmax.f32 %v6246_v56, 0.0  ;;  %v6249_v23 = vadd.f32 %v12727_v5, %v12837_v39 }
 0x733   :  { %v6311_v29 = vmax.f32 %v6247_v33, 0.0  ;;  %v6312_v59 = vmax.f32 %v6248_v8, 0.0  ;;  %v6250_v49 = vadd.f32 %v12727_v5, %v12841_v24  ;;  %v6251_v42 = vadd.f32 %v12727_v5, %v12845_v3  ;;  %v15529_v33 = vld [vmem:[#allocation77_spill] sm:$0xff] }
 0x734   :  { %v12973_v38 = vpack.c.bf16 %v6309_v48, %v6308_v58  ;;  %v6313_v35 = vmax.f32 %v6249_v23, 0.0  ;;  %v6252_v61 = vadd.f32 %v12727_v5, %v12849_v16  ;;  %v6253_v51 = vadd.f32 %v12727_v5, %v12861_v30  ;;  %v15530_v48 = vld [vmem:[#allocation80_spill] sm:$0xff] }
 0x735   :  { %8793 = vmatmul.mubr.bf16.gmra.mrb[140].mxu0 %v6335_v62  ;;  %v12979_v28 = vpack.c.bf16 %v6311_v29, %v6310_v37  ;;  %v6314_v39 = vmax.f32 %v6250_v49, 0.0  ;;  %v6315_v43 = vmax.f32 %v6251_v42, 0.0  ;;  %v6254_v0 = vadd.f32 %v12727_v5, %v12865_v6 }
 0x736   :  { %8796 = vmatprep.mubr.bf16.mxu0 %v6336_v25  ;;  %v6255_v24 = vadd.f32 %v12727_v5, %v12869_v17  ;;  %v12989_v3 = vpack.c.bf16 %v6313_v35, %v6312_v59  ;;  %v6316_v62 = vmax.f32 %v6252_v61, 0.0  ;;  %v6317_v57 = vmax.f32 %v6253_v51, 0.0  ;;  %v15533_v61 = vld [vmem:[#allocation85_spill] sm:$0xff] }
 0x737   :  { %v6256_v4 = vadd.f32 %v12727_v5, %v12873_v14  ;;  %v12993_v16 = vpack.c.bf16 %v6315_v43, %v6314_v39  ;;  %v6318_v19 = vmax.f32 %v6254_v0, 0.0  ;;  %v6257_v25 = vadd.f32 %v12727_v5, %v12881_v15  ;;  %v15534_v39 = vld [vmem:[#allocation88_spill] sm:$0xff]  ;;  %v15535_v0 = vld [vmem:[#allocation93_spill] sm:$0xff] }
 0x738   :  { %v6319_v30 = vmax.f32 %v6255_v24, 0.0  ;;  %v12997_v34 = vpack.c.bf16 %v6317_v57, %v6316_v62  ;;  %v6258_v17 = vadd.f32 %v12727_v5, %v12885_v46  ;;  %v6259_v7 = vadd.f32 %v12727_v5, %v12897_v60  ;;  %v15536_v62 = vld [vmem:[#allocation52_spill] sm:$0xff] }
 0x739   :  { %v6320_v6 = vmax.f32 %v6256_v4, 0.0  ;;  %v6321_v55 = vmax.f32 %v6257_v25, 0.0  ;;  %v6260_v14 = vadd.f32 %v12727_v5, %v12901_v20  ;;  %v6261_v47 = vadd.f32 %v12727_v5, %v12690_v36 }
 0x73a   :  { %v13003_v63 = vpack.c.bf16 %v6319_v30, %v6318_v19  ;;  %v6322_v11 = vmax.f32 %v6258_v17, 0.0  ;;  %v6323_v15 = vmax.f32 %v6259_v7, 0.0  ;;  %v6262_v31 = vadd.f32 %v12727_v5, %v12905_v2 }
 0x73b   :  { %v6263_v46 = vadd.f32 %v12727_v5, %v12909_v41  ;;  %v6338_v60 = vpack.c.bf16 %v6285_v54, %v6284_v18  ;;  %v6356_v44 = vpack.c.bf16 %v6321_v55, %v6320_v6  ;;  %v6324_v45 = vmax.f32 %v6260_v14, 0.0  ;;  %v15531_v54 = vld [vmem:[#allocation81_spill] sm:$0xff] }
 0x73c   :  { %v6325_v40 = vmax.f32 %v6261_v47, 0.0  ;;  %v6357_v20 = vpack.c.bf16 %v6323_v15, %v6322_v11  ;;  %v6326_v36 = vmax.f32 %v6262_v31, 0.0  ;;  %v6156_v58 = vmul.f32 %v12686_v53, %v15529_v33 }
 0x73d   :  { %8797 = vmatmul.mubr.bf16.gmra.mrb[144].mxu0 %v12925_v52  ;;  %v6327_v56 = vmax.f32 %v6263_v46, 0.0  ;;  %v6157_v41 = vmul.f32 %v12686_v53, %v15530_v48  ;;  %v6286_v22 = vmax.f32 %v12913_v10, 0.0  ;;  %v6287_v12 = vmax.f32 %v12917_v9, 0.0  ;;  %v15532_v52 = vld [vmem:[#allocation84_spill] sm:$0xff] }
 0x73e   :  { %8800 = vmatprep.mubr.bf16.mxu0 %v6338_v60  ;;  %v6358_v2 = vpack.c.bf16 %v6325_v40, %v6324_v45  ;;  %v6158_v8 = vmul.f32 %v12686_v53, %v15531_v54  ;;  %v6159_v37 = vmul.f32 %v12686_v53, %v15532_v52  ;;  %v6288_v29 = vmax.f32 %v12929_v26, 0.0 }
 0x73f   :  { %v6359_v18 = vpack.c.bf16 %v6327_v56, %v6326_v36  ;;  %v6289_v23 = vmax.f32 %v12941_v1, 0.0  ;;  %v6339_v59 = vpack.c.bf16 %v6287_v12, %v6286_v22  ;;  %v6226_v49 = vadd.f32 %v12727_v5, %v6156_v58 }
 0x740   :  { %v6227_v42 = vadd.f32 %v12727_v5, %v6157_v41  ;;  %v6228_v10 = vadd.f32 %v12727_v5, %v6158_v8  ;;  %v6229_v9 = vadd.f32 %v12727_v5, %v6159_v37  ;;  %v6160_v51 = vmul.f32 %v12686_v53, %v15533_v61 }
 0x741   :  { %v6340_v35 = vpack.c.bf16 %v6289_v23, %v6288_v29  ;;  %v6161_v26 = vmul.f32 %v12686_v53, %v15534_v39  ;;  %v6290_v43 = vmax.f32 %v6226_v49, 0.0  ;;  %v6162_v24 = vmul.f32 %v12686_v53, %v15535_v0 }
 0x742   :  { %v6291_v1 = vmax.f32 %v6227_v42, 0.0  ;;  %v6163_v57 = vmul.f32 %v12686_v53, %v15536_v62  ;;  %v6292_v4 = vmax.f32 %v6228_v10, 0.0  ;;  %v6293_v19 = vmax.f32 %v6229_v9, 0.0 }
 0x743   :  { %v6230_v25 = vadd.f32 %v12727_v5, %v6160_v51  ;;  %v6231_v6 = vadd.f32 %v12727_v5, %v6161_v26  ;;  %v6232_v7 = vadd.f32 %v12727_v5, %v6162_v24 }
 0x744   :  { %v6341_v30 = vpack.c.bf16 %v6291_v1, %v6290_v43  ;;  %v6342_v17 = vpack.c.bf16 %v6293_v19, %v6292_v4  ;;  %v6233_v55 = vadd.f32 %v12727_v5, %v6163_v57 }
 0x745   :  { %8801 = vmatmul.mubr.bf16.gmra.mrb[148].mxu0 %v6339_v59  ;;  %v6294_v14 = vmax.f32 %v6230_v25, 0.0  ;;  %v6295_v47 = vmax.f32 %v6231_v6, 0.0  ;;  %v6296_v11 = vmax.f32 %v6232_v7, 0.0 }
 0x746   :  { %8804 = vmatprep.mubr.bf16.mxu0 %v6340_v35  ;;  %v6297_v15 = vmax.f32 %v6233_v55, 0.0 }
 0x747   :  { %v6343_v31 = vpack.c.bf16 %v6295_v47, %v6294_v14 }
 0x748   :  { %v6344_v53 = vpack.c.bf16 %v6297_v15, %v6296_v11 }
 0x74d   :  { %8805 = vmatmul.mubr.bf16.gmra.mrb[152].mxu0 %v6341_v30 }
 0x74e   :  { %8808 = vmatprep.mubr.bf16.mxu0 %v6342_v17 }
 0x755   :  { %8809 = vmatmul.mubr.bf16.gmra.mrb[156].mxu0 %v6343_v31 }
 0x756   :  { %8812 = vmatprep.mubr.bf16.mxu0 %v6344_v53 }
 0x75d   :  { %8813 = vmatmul.mubr.bf16.gmra.mrb[160].mxu0 %v12945_v50 }
 0x75e   :  { %8816 = vmatprep.mubr.bf16.mxu0 %v12949_v32 }
 0x765   :  { %8817 = vmatmul.mubr.bf16.gmra.mrb[164].mxu0 %v12955_v21 }
 0x766   :  { %8820 = vmatprep.mubr.bf16.mxu0 %v12965_v13 }
 0x76d   :  { %8821 = vmatmul.mubr.bf16.gmra.mrb[168].mxu0 %v12969_v27 }
 0x76e   :  { %8824 = vmatprep.mubr.bf16.mxu0 %v12973_v38 }
 0x775   :  { %8825 = vmatmul.mubr.bf16.gmra.mrb[172].mxu0 %v12979_v28 }
 0x776   :  { %8828 = vmatprep.mubr.bf16.mxu0 %v12989_v3 }
 0x77d   :  { %8829 = vmatmul.mubr.bf16.gmra.mrb[176].mxu0 %v12993_v16 }
 0x77e   :  { %8832 = vmatprep.mubr.bf16.mxu0 %v12997_v34 }
 0x785   :  { %8833 = vmatmul.mubr.bf16.gmra.mrb[180].mxu0 %v13003_v63 }
 0x786   :  { %8836 = vmatprep.mubr.bf16.mxu0 %v6356_v44 }
 0x78d   :  { %8837 = vmatmul.mubr.bf16.gmra.mrb[184].mxu0 %v6357_v20 }
 0x78e   :  { %8840 = vmatprep.mubr.bf16.mxu0 %v6358_v2 }
 0x795   :  { %8841 = vmatmul.mubr.bf16.gmra.mrb[188].mxu0 %v6359_v18 }
 0x7f0   :  { %v13057_v5 = vpop.f32.mrb[128].mxu0 }
 0x7f1   :  { %v13059_v50 = vpop.f32.mrb[129].mxu0 }
 0x7f2   :  { %v13061_v32 = vpop.f32.mrb[130].mxu0 }
 0x7f3   :  { %v13063_v21 = vpop.f32.mrb[131].mxu0 }
 0x7f4   :  { %v6715_v13 = vadd.f32 %v13063_v21, %v13059_v50 }
 0x7f6   :  { %v6716_v27 = vadd.f32 %v13057_v5, %v6715_v13 }
 0x7f8   :  { %v13068_v38 = vpop.f32.mrb[132].mxu0  ;;  %v6717_v28 = vadd.f32 %v13061_v32, %v6716_v27 }
 0x7f9   :  { %v13071_v3 = vpop.f32.mrb[133].mxu0 }
 0x7fa   :  { %v6718_v16 = vadd.f32 %v6717_v28, %v13071_v3  ;;  %v13074_v34 = vpop.f32.mrb[134].mxu0 }
 0x7fb   :  { %v13076_v63 = vpop.f32.mrb[135].mxu0 }
 0x7fc   :  { %v6719_v46 = vadd.f32 %v6718_v16, %v13076_v63 }
 0x7fe   :  { %v6720_v60 = vadd.f32 %v13068_v38, %v6719_v46 }
 0x800   :  { %v13080_v44 = vpop.f32.mrb[136].mxu0  ;;  %v6721_v45 = vadd.f32 %v13074_v34, %v6720_v60 }
 0x801   :  { %v13083_v40 = vpop.f32.mrb[137].mxu0 }
 0x802   :  { %v6722_v20 = vadd.f32 %v6721_v45, %v13083_v40  ;;  %v13086_v36 = vpop.f32.mrb[138].mxu0 }
 0x803   :  { %v13088_v56 = vpop.f32.mrb[139].mxu0 }
 0x804   :  { %v6723_v33 = vadd.f32 %v6722_v20, %v13088_v56 }
 0x806   :  { %v6724_v58 = vadd.f32 %v13080_v44, %v6723_v33 }
 0x808   :  { %v13092_v2 = vpop.f32.mrb[140].mxu0  ;;  %v6725_v48 = vadd.f32 %v13086_v36, %v6724_v58 }
 0x809   :  { %v13095_v41 = vpop.f32.mrb[141].mxu0 }
 0x80a   :  { %v6726_v22 = vadd.f32 %v6725_v48, %v13095_v41  ;;  %v13098_v12 = vpop.f32.mrb[142].mxu0 }
 0x80b   :  { %v13100_v18 = vpop.f32.mrb[143].mxu0 }
 0x80c   :  { %v6727_v54 = vadd.f32 %v6726_v22, %v13100_v18 }
 0x80e   :  { %v6728_v8 = vadd.f32 %v13092_v2, %v6727_v54 }
 0x810   :  { %v13104_v52 = vpop.f32.mrb[144].mxu0  ;;  %v6729_v37 = vadd.f32 %v13098_v12, %v6728_v8 }
 0x811   :  { %v13107_v29 = vpop.f32.mrb[145].mxu0 }
 0x812   :  { %v6730_v23 = vadd.f32 %v6729_v37, %v13107_v29  ;;  %v13110_v59 = vpop.f32.mrb[146].mxu0 }
 0x813   :  { %v13112_v49 = vpop.f32.mrb[147].mxu0 }
 0x814   :  { %v6731_v42 = vadd.f32 %v6730_v23, %v13112_v49 }
 0x816   :  { %v6732_v35 = vadd.f32 %v13104_v52, %v6731_v42 }
 0x818   :  { %v13116_v10 = vpop.f32.mrb[148].mxu0  ;;  %v6733_v9 = vadd.f32 %v13110_v59, %v6732_v35 }
 0x819   :  { %v13119_v61 = vpop.f32.mrb[149].mxu0 }
 0x81a   :  { %v6734_v51 = vadd.f32 %v6733_v9, %v13119_v61  ;;  %v13122_v39 = vpop.f32.mrb[150].mxu0 }
 0x81b   :  { %v13124_v26 = vpop.f32.mrb[151].mxu0 }
 0x81c   :  { %v6735_v43 = vadd.f32 %v6734_v51, %v13124_v26 }
 0x81e   :  { %v6736_v1 = vadd.f32 %v13116_v10, %v6735_v43 }
 0x820   :  { %v13128_v0 = vpop.f32.mrb[152].mxu0  ;;  %v6737_v24 = vadd.f32 %v13122_v39, %v6736_v1 }
 0x821   :  { %v13131_v62 = vpop.f32.mrb[153].mxu0 }
 0x822   :  { %v6738_v57 = vadd.f32 %v6737_v24, %v13131_v62  ;;  %v13134_v4 = vpop.f32.mrb[154].mxu0 }
 0x823   :  { %v13136_v19 = vpop.f32.mrb[155].mxu0 }
 0x824   :  { %v6739_v30 = vadd.f32 %v6738_v57, %v13136_v19 }
 0x826   :  { %v6740_v25 = vadd.f32 %v13128_v0, %v6739_v30 }
 0x828   :  { %v13140_v6 = vpop.f32.mrb[156].mxu0  ;;  %v6741_v17 = vadd.f32 %v13134_v4, %v6740_v25 }
 0x829   :  { %v13143_v7 = vpop.f32.mrb[157].mxu0 }
 0x82a   :  { %v6742_v55 = vadd.f32 %v6741_v17, %v13143_v7  ;;  %v13146_v14 = vpop.f32.mrb[158].mxu0 }
 0x82b   :  { %v13148_v47 = vpop.f32.mrb[159].mxu0 }
 0x82c   :  { %v6743_v11 = vadd.f32 %v6742_v55, %v13148_v47 }
 0x82e   :  { %v6744_v15 = vadd.f32 %v13140_v6, %v6743_v11 }
 0x830   :  { %v13152_v31 = vpop.f32.mrb[160].mxu0  ;;  %v6745_v53 = vadd.f32 %v13146_v14, %v6744_v15 }
 0x831   :  { %v13155_v13 = vpop.f32.mrb[161].mxu0 }
 0x832   :  { %v6746_v27 = vadd.f32 %v6745_v53, %v13155_v13  ;;  %v13158_v28 = vpop.f32.mrb[162].mxu0 }
 0x833   :  { %v13160_v16 = vpop.f32.mrb[163].mxu0 }
 0x834   :  { %v6747_v46 = vadd.f32 %v6746_v27, %v13160_v16 }
 0x836   :  { %v6748_v60 = vadd.f32 %v13152_v31, %v6747_v46 }
 0x838   :  { %v13164_v45 = vpop.f32.mrb[164].mxu0  ;;  %v6749_v20 = vadd.f32 %v13158_v28, %v6748_v60 }
 0x839   :  { %v13167_v33 = vpop.f32.mrb[165].mxu0 }
 0x83a   :  { %v6750_v58 = vadd.f32 %v6749_v20, %v13167_v33  ;;  %v13170_v48 = vpop.f32.mrb[166].mxu0 }
 0x83b   :  { %v13172_v22 = vpop.f32.mrb[167].mxu0 }
 0x83c   :  { %v6751_v54 = vadd.f32 %v6750_v58, %v13172_v22 }
 0x83e   :  { %v6752_v8 = vadd.f32 %v13164_v45, %v6751_v54 }
 0x840   :  { %v13176_v37 = vpop.f32.mrb[168].mxu0  ;;  %v6753_v23 = vadd.f32 %v13170_v48, %v6752_v8 }
 0x841   :  { %v13179_v42 = vpop.f32.mrb[169].mxu0 }
 0x842   :  { %v6754_v35 = vadd.f32 %v6753_v23, %v13179_v42  ;;  %v13182_v9 = vpop.f32.mrb[170].mxu0 }
 0x843   :  { %v13184_v51 = vpop.f32.mrb[171].mxu0 }
 0x844   :  { %v6755_v43 = vadd.f32 %v6754_v35, %v13184_v51 }
 0x846   :  { %v6756_v1 = vadd.f32 %v13176_v37, %v6755_v43 }
 0x848   :  { %v13188_v24 = vpop.f32.mrb[172].mxu0  ;;  %v6757_v57 = vadd.f32 %v13182_v9, %v6756_v1 }
 0x849   :  { %v13191_v30 = vpop.f32.mrb[173].mxu0 }
 0x84a   :  { %v6758_v25 = vadd.f32 %v6757_v57, %v13191_v30  ;;  %v13194_v17 = vpop.f32.mrb[174].mxu0 }
 0x84b   :  { %v13196_v55 = vpop.f32.mrb[175].mxu0 }
 0x84c   :  { %v6759_v11 = vadd.f32 %v6758_v25, %v13196_v55 }
 0x84e   :  { %v6760_v15 = vadd.f32 %v13188_v24, %v6759_v11 }
 0x850   :  { %v13200_v53 = vpop.f32.mrb[176].mxu0  ;;  %v6761_v27 = vadd.f32 %v13194_v17, %v6760_v15 }
 0x851   :  { %15537 = vst [vmem:[#allocation47_spill] sm:$0xff] %v13200_v53  ;;  %v13203_v46 = vpop.f32.mrb[177].mxu0 }
 0x852   :  { %15538 = vst [vmem:[#allocation75_spill] sm:$0xff] %v13203_v46  ;;  %v6762_v60 = vadd.f32 %v6761_v27, %v13203_v46  ;;  %v13206_v20 = vpop.f32.mrb[178].mxu0 }
 0x853   :  { %15539 = vst [vmem:[#allocation89_spill] sm:$0xff] %v13206_v20  ;;  %v13208_v58 = vpop.f32.mrb[179].mxu0 }
 0x854   :  { %15540 = vst [vmem:[#allocation92_spill] sm:$0xff] %v13208_v58  ;;  %v6763_v54 = vadd.f32 %v6762_v60, %v13208_v58 }
 0x856   :  { %v6764_v8 = vadd.f32 %v13200_v53, %v6763_v54 }
 0x858   :  { %v13212_v23 = vpop.f32.mrb[180].mxu0  ;;  %v6765_v35 = vadd.f32 %v13206_v20, %v6764_v8 }
 0x859   :  { %15541 = vst [vmem:[#allocation73_spill] sm:$0xff] %v13212_v23  ;;  %v13215_v43 = vpop.f32.mrb[181].mxu0 }
 0x85a   :  { %15542 = vst [vmem:[#allocation96_spill] sm:$0xff] %v13215_v43  ;;  %v6766_v1 = vadd.f32 %v6765_v35, %v13215_v43  ;;  %v13218_v57 = vpop.f32.mrb[182].mxu0 }
 0x85b   :  { %15543 = vst [vmem:[#allocation48_spill] sm:$0xff] %v13218_v57  ;;  %v13220_v25 = vpop.f32.mrb[183].mxu0 }
 0x85c   :  { %15544 = vst [vmem:[#allocation49_spill] sm:$0xff] %v13220_v25  ;;  %v6767_v11 = vadd.f32 %v6766_v1, %v13220_v25 }
 0x85e   :  { %v6768_v15 = vadd.f32 %v13212_v23, %v6767_v11 }
 0x860   :  { %v13224_v27 = vpop.f32.mrb[184].mxu0  ;;  %v6769_v60 = vadd.f32 %v13218_v57, %v6768_v15 }
 0x861   :  { %15545 = vst [vmem:[#allocation76_spill] sm:$0xff] %v13224_v27  ;;  %v13227_v54 = vpop.f32.mrb[185].mxu0 }
 0x862   :  { %15546 = vst [vmem:[#allocation78_spill] sm:$0xff] %v13227_v54  ;;  %v6770_v8 = vadd.f32 %v6769_v60, %v13227_v54  ;;  %v13230_v20 = vpop.f32.mrb[186].mxu0 }
 0x863   :  { %15547 = vst [vmem:[#allocation38_spill] sm:$0xff] %v13230_v20  ;;  %v13232_v53 = vpop.f32.mrb[187].mxu0 }
 0x864   :  { %15548 = vst [vmem:[#allocation28_spill] sm:$0xff] %v13232_v53  ;;  %v6771_v35 = vadd.f32 %v6770_v8, %v13232_v53 }
 0x866   :  { %v6772_v43 = vadd.f32 %v13224_v27, %v6771_v35 }
 0x868   :  { %v13236_v58 = vpop.f32.mrb[188].mxu0  ;;  %v6773_v1 = vadd.f32 %v13230_v20, %v6772_v43 }
 0x869   :  { %v13239_v11 = vpop.f32.mrb[189].mxu0 }
 0x86a   :  { %15549 = vst [vmem:[#allocation79_spill] sm:$0xff] %v13239_v11  ;;  %v6774_v15 = vadd.f32 %v6773_v1, %v13239_v11  ;;  %v13242_v57 = vpop.f32.mrb[190].mxu0 }
 0x86b   :  { %v13244_v23 = vpop.f32.mrb[191].mxu0 }
 0x86c   :  { %v6775_v60 = vadd.f32 %v6774_v15, %v13244_v23 }
 0x86e   :  { %v6776_v54 = vadd.f32 %v13236_v58, %v6775_v60  ;;  %v15563_v60 = vld [vmem:[#allocation89_spill] sm:$0xff] }
 0x870   :  { %v6777_v8 = vadd.f32 %v13242_v57, %v6776_v54  ;;  %v15561_v54 = vld [vmem:[#allocation47_spill] sm:$0xff] }
 0x872   :  { %v6778_v53 = vrot.slane %v6777_v8, 4 }
 0x874   :  { %v6779_v35 = vadd.f32 %v6778_v53, %v6777_v8  ;;  %v15565_v8 = vld [vmem:[#allocation96_spill] sm:$0xff] }
 0x876   :  { %v6780_v27 = vrot.slane %v6779_v35, 2 }
 0x878   :  { %v6781_v25 = vadd.f32 %v6780_v27, %v6779_v35  ;;  %v15559_v27 = vld [vmem:[#allocation92_spill] sm:$0xff]  ;;  %v15567_v35 = vld [vmem:[#allocation49_spill] sm:$0xff] }
 0x87a   :  { %v6782_v46 = vrot.slane %v6781_v25, 1 }
 0x87c   :  { %v6783_v43 = vadd.f32 %v6782_v46, %v6781_v25  ;;  %v15557_v25 = vld [vmem:[#allocation75_spill] sm:$0xff] }
 0x87e   :  { %v13249_v20 = vmul.f32 0.001953125, %v6783_v43 }
 0x880   :  { %v13253_v1 = vsub.f32 %v13059_v50, %v13249_v20  ;;  %v13257_v11 = vsub.f32 %v13063_v21, %v13249_v20  ;;  %v13261_v15 = vsub.f32 %v13057_v5, %v13249_v20  ;;  %v13265_v53 = vsub.f32 %v13061_v32, %v13249_v20 }
 0x881   :  { %v13269_v46 = vsub.f32 %v13071_v3, %v13249_v20  ;;  %v13273_v50 = vsub.f32 %v13076_v63, %v13249_v20  ;;  %v13277_v21 = vsub.f32 %v13068_v38, %v13249_v20  ;;  %v13281_v5 = vsub.f32 %v13074_v34, %v13249_v20 }
 0x882   :  { %15550 = vst [vmem:[#allocation82_spill] sm:$0xff] %v13253_v1  ;;  %15551 = vst [vmem:[#allocation83_spill] sm:$0xff] %v13257_v11  ;;  %v13285_v32 = vsub.f32 %v13083_v40, %v13249_v20  ;;  %v13289_v3 = vsub.f32 %v13088_v56, %v13249_v20  ;;  %v13293_v63 = vsub.f32 %v13080_v44, %v13249_v20 }
 0x883   :  { %15552 = vst [vmem:[#allocation86_spill] sm:$0xff] %v13261_v15  ;;  %v13297_v38 = vsub.f32 %v13086_v36, %v13249_v20  ;;  %v13301_v34 = vsub.f32 %v13095_v41, %v13249_v20  ;;  %v13305_v40 = vsub.f32 %v13100_v18, %v13249_v20  ;;  %v13309_v56 = vsub.f32 %v13092_v2, %v13249_v20 }
 0x884   :  { %v13313_v44 = vsub.f32 %v13098_v12, %v13249_v20  ;;  %v13317_v36 = vsub.f32 %v13107_v29, %v13249_v20  ;;  %v13321_v41 = vsub.f32 %v13112_v49, %v13249_v20  ;;  %v13325_v18 = vsub.f32 %v13104_v52, %v13249_v20 }
 0x885   :  { %v13329_v2 = vsub.f32 %v13110_v59, %v13249_v20  ;;  %v13333_v12 = vsub.f32 %v13119_v61, %v13249_v20  ;;  %v13337_v29 = vsub.f32 %v13124_v26, %v13249_v20  ;;  %v13341_v49 = vsub.f32 %v13116_v10, %v13249_v20 }
 0x886   :  { %v13345_v52 = vsub.f32 %v13122_v39, %v13249_v20  ;;  %v13349_v59 = vsub.f32 %v13131_v62, %v13249_v20  ;;  %v13353_v61 = vsub.f32 %v13136_v19, %v13249_v20  ;;  %v13357_v26 = vsub.f32 %v13128_v0, %v13249_v20 }
 0x887   :  { %v13361_v10 = vsub.f32 %v13134_v4, %v13249_v20  ;;  %v13365_v39 = vsub.f32 %v13143_v7, %v13249_v20  ;;  %v13369_v62 = vsub.f32 %v13148_v47, %v13249_v20  ;;  %v13373_v19 = vsub.f32 %v13140_v6, %v13249_v20 }
 0x888   :  { %v13377_v0 = vsub.f32 %v13146_v14, %v13249_v20  ;;  %v13381_v4 = vsub.f32 %v13155_v13, %v13249_v20  ;;  %v13385_v7 = vsub.f32 %v13160_v16, %v13249_v20  ;;  %v13389_v47 = vsub.f32 %v13152_v31, %v13249_v20 }
 0x889   :  { %v13393_v6 = vsub.f32 %v13158_v28, %v13249_v20  ;;  %v13397_v14 = vsub.f32 %v13167_v33, %v13249_v20  ;;  %v13401_v13 = vsub.f32 %v13172_v22, %v13249_v20  ;;  %v13405_v16 = vsub.f32 %v13164_v45, %v13249_v20 }
 0x88a   :  { %v13409_v31 = vsub.f32 %v13170_v48, %v13249_v20  ;;  %v13413_v28 = vsub.f32 %v13179_v42, %v13249_v20  ;;  %v13417_v33 = vsub.f32 %v13184_v51, %v13249_v20  ;;  %v13421_v22 = vsub.f32 %v13176_v37, %v13249_v20 }
 0x88b   :  { %v13425_v45 = vsub.f32 %v13182_v9, %v13249_v20  ;;  %v13429_v48 = vsub.f32 %v13191_v30, %v13249_v20  ;;  %v13433_v42 = vsub.f32 %v13196_v55, %v13249_v20  ;;  %v13437_v51 = vsub.f32 %v13188_v24, %v13249_v20 }
 0x88c   :  { %v13441_v37 = vsub.f32 %v13194_v17, %v13249_v20  ;;  %v13445_v9 = vsub.f32 %v15557_v25, %v13249_v20  ;;  %v13449_v30 = vsub.f32 %v15559_v27, %v13249_v20  ;;  %v13453_v55 = vsub.f32 %v15561_v54, %v13249_v20  ;;  %v15569_v25 = vld [vmem:[#allocation73_spill] sm:$0xff] }
 0x88d   :  { %15553 = vst [vmem:[#allocation87_spill] sm:$0xff] %v13429_v48  ;;  %15554 = vst [vmem:[#allocation90_spill] sm:$0xff] %v13433_v42  ;;  %v13457_v24 = vsub.f32 %v15563_v60, %v13249_v20  ;;  %v13461_v17 = vsub.f32 %v15565_v8, %v13249_v20  ;;  %v13465_v43 = vsub.f32 %v15567_v35, %v13249_v20 }
 0x88e   :  { %15555 = vst [vmem:[#allocation91_spill] sm:$0xff] %v13437_v51  ;;  %15556 = vst [vmem:[#allocation94_spill] sm:$0xff] %v13441_v37  ;;  %v13469_v27 = vsub.f32 %v15569_v25, %v13249_v20 }
 0x88f   :  { %15558 = vst [vmem:[#allocation95_spill] sm:$0xff] %v13445_v9  ;;  %15560 = vst [vmem:[#allocation26_spill] sm:$0xff] %v13449_v30  ;;  %v15571_v30 = vld [vmem:[#allocation48_spill] sm:$0xff] }
 0x890   :  { %15562 = vst [vmem:[#allocation50_spill] sm:$0xff] %v13453_v55  ;;  %15564 = vst [vmem:[#allocation54_spill] sm:$0xff] %v13457_v24  ;;  %v13473_v54 = vsub.f32 %v15571_v30, %v13249_v20  ;;  %v15573_v55 = vld [vmem:[#allocation78_spill] sm:$0xff]  ;;  %v15575_v24 = vld [vmem:[#allocation28_spill] sm:$0xff] }
 0x891   :  { %15566 = vst [vmem:[#allocation40_spill] sm:$0xff] %v13461_v17  ;;  %15568 = vst [vmem:[#allocation41_spill] sm:$0xff] %v13465_v43  ;;  %v13477_v60 = vsub.f32 %v15573_v55, %v13249_v20  ;;  %v13481_v8 = vsub.f32 %v15575_v24, %v13249_v20  ;;  %v15577_v17 = vld [vmem:[#allocation76_spill] sm:$0xff]  ;;  %v15579_v43 = vld [vmem:[#allocation38_spill] sm:$0xff]  ;;  %v13497_v55 = vsub.f32 %v13244_v23, %v13249_v20 }
 0x892   :  { %15570 = vst [vmem:[#allocation43_spill] sm:$0xff] %v13469_v27  ;;  %15572 = vst [vmem:[#allocation97_spill] sm:$0xff] %v13473_v54  ;;  %v13485_v35 = vsub.f32 %v15577_v17, %v13249_v20  ;;  %v13489_v25 = vsub.f32 %v15579_v43, %v13249_v20  ;;  %v15581_v27 = vld [vmem:[#allocation79_spill] sm:$0xff]  ;;  %v13501_v24 = vsub.f32 %v13236_v58, %v13249_v20 }
 0x893   :  { %15574 = vst [vmem:[#allocation98_spill] sm:$0xff] %v13477_v60  ;;  %15576 = vst [vmem:[#allocation99_spill] sm:$0xff] %v13481_v8  ;;  %v13493_v30 = vsub.f32 %v15581_v27, %v13249_v20  ;;  %v13505_v17 = vsub.f32 %v13242_v57, %v13249_v20  ;;  %v6849_v43 = vmul.f32 %v13253_v1, %v13253_v1 }
 0x894   :  { %15578 = vst [vmem:[#allocation100_spill] sm:$0xff] %v13485_v35  ;;  %15580 = vst [vmem:[#allocation101_spill] sm:$0xff] %v13489_v25  ;;  %v6850_v25 = vmul.f32 %v13257_v11, %v13257_v11  ;;  %v6851_v27 = vmul.f32 %v13261_v15, %v13261_v15  ;;  %v6852_v23 = vmul.f32 %v13265_v53, %v13265_v53 }
 0x895   :  { %15582 = vst [vmem:[#allocation102_spill] sm:$0xff] %v13493_v30  ;;  %15583 = vst [vmem:[#allocation103_spill] sm:$0xff] %v13497_v55  ;;  %v6853_v58 = vmul.f32 %v13269_v46, %v13269_v46  ;;  %v6854_v20 = vmul.f32 %v13273_v50, %v13273_v50  ;;  %v6855_v1 = vmul.f32 %v13277_v21, %v13277_v21 }
 0x896   :  { %15584 = vst [vmem:[#allocation104_spill] sm:$0xff] %v13501_v24  ;;  %v6913_v30 = vadd.f32 %v6850_v25, %v6849_v43  ;;  %v6856_v15 = vmul.f32 %v13281_v5, %v13281_v5  ;;  %v6857_v43 = vmul.f32 %v13285_v32, %v13285_v32 }
 0x898   :  { %v6914_v55 = vadd.f32 %v6913_v30, %v6851_v27  ;;  %v6858_v27 = vmul.f32 %v13289_v3, %v13289_v3 }
 0x89a   :  { %v6915_v24 = vadd.f32 %v6914_v55, %v6852_v23  ;;  %v6859_v23 = vmul.f32 %v13293_v63, %v13293_v63 }
 0x89c   :  { %v6916_v57 = vadd.f32 %v6915_v24, %v6853_v58  ;;  %v6860_v58 = vmul.f32 %v13297_v38, %v13297_v38 }
 0x89e   :  { %v6917_v11 = vadd.f32 %v6916_v57, %v6854_v20  ;;  %v6861_v57 = vmul.f32 %v13301_v34, %v13301_v34 }
 0x8a0   :  { %v6918_v25 = vadd.f32 %v6917_v11, %v6855_v1  ;;  %v6862_v1 = vmul.f32 %v13305_v40, %v13305_v40 }
 0x8a2   :  { %v6919_v30 = vadd.f32 %v6918_v25, %v6856_v15  ;;  %v6863_v25 = vmul.f32 %v13309_v56, %v13309_v56 }
 0x8a4   :  { %v6920_v55 = vadd.f32 %v6919_v30, %v6857_v43  ;;  %v6864_v30 = vmul.f32 %v13313_v44, %v13313_v44 }
 0x8a6   :  { %v6921_v24 = vadd.f32 %v6920_v55, %v6858_v27  ;;  %v6865_v55 = vmul.f32 %v13317_v36, %v13317_v36 }
 0x8a8   :  { %v6922_v20 = vadd.f32 %v6921_v24, %v6859_v23  ;;  %v6866_v24 = vmul.f32 %v13321_v41, %v13321_v41 }
 0x8aa   :  { %v6923_v11 = vadd.f32 %v6922_v20, %v6860_v58  ;;  %v6867_v20 = vmul.f32 %v13325_v18, %v13325_v18 }
 0x8ac   :  { %v6924_v15 = vadd.f32 %v6923_v11, %v6861_v57  ;;  %v6868_v11 = vmul.f32 %v13329_v2, %v13329_v2 }
 0x8ae   :  { %v6925_v43 = vadd.f32 %v6924_v15, %v6862_v1  ;;  %v6869_v15 = vmul.f32 %v13333_v12, %v13333_v12 }
 0x8b0   :  { %v6926_v27 = vadd.f32 %v6925_v43, %v6863_v25  ;;  %v6870_v43 = vmul.f32 %v13337_v29, %v13337_v29 }
 0x8b2   :  { %v6927_v23 = vadd.f32 %v6926_v27, %v6864_v30  ;;  %v6871_v27 = vmul.f32 %v13341_v49, %v13341_v49 }
 0x8b4   :  { %v6928_v58 = vadd.f32 %v6927_v23, %v6865_v55  ;;  %v6872_v23 = vmul.f32 %v13345_v52, %v13345_v52 }
 0x8b6   :  { %v6929_v57 = vadd.f32 %v6928_v58, %v6866_v24  ;;  %v6873_v58 = vmul.f32 %v13349_v59, %v13349_v59 }
 0x8b8   :  { %v6930_v1 = vadd.f32 %v6929_v57, %v6867_v20  ;;  %v6874_v57 = vmul.f32 %v13353_v61, %v13353_v61 }
 0x8ba   :  { %v6931_v25 = vadd.f32 %v6930_v1, %v6868_v11  ;;  %v6875_v1 = vmul.f32 %v13357_v26, %v13357_v26 }
 0x8bc   :  { %v6932_v30 = vadd.f32 %v6931_v25, %v6869_v15  ;;  %v6876_v25 = vmul.f32 %v13361_v10, %v13361_v10 }
 0x8be   :  { %v6933_v55 = vadd.f32 %v6932_v30, %v6870_v43  ;;  %v6877_v30 = vmul.f32 %v13365_v39, %v13365_v39 }
 0x8c0   :  { %v6934_v24 = vadd.f32 %v6933_v55, %v6871_v27  ;;  %v6878_v55 = vmul.f32 %v13369_v62, %v13369_v62 }
 0x8c2   :  { %v6935_v20 = vadd.f32 %v6934_v24, %v6872_v23  ;;  %v6879_v24 = vmul.f32 %v13373_v19, %v13373_v19 }
 0x8c4   :  { %v6936_v11 = vadd.f32 %v6935_v20, %v6873_v58  ;;  %v6880_v20 = vmul.f32 %v13377_v0, %v13377_v0 }
 0x8c6   :  { %v6937_v15 = vadd.f32 %v6936_v11, %v6874_v57  ;;  %v6881_v11 = vmul.f32 %v13381_v4, %v13381_v4 }
 0x8c8   :  { %v6938_v43 = vadd.f32 %v6937_v15, %v6875_v1  ;;  %v6882_v15 = vmul.f32 %v13385_v7, %v13385_v7 }
 0x8ca   :  { %v6939_v27 = vadd.f32 %v6938_v43, %v6876_v25  ;;  %v6883_v43 = vmul.f32 %v13389_v47, %v13389_v47 }
 0x8cc   :  { %v6940_v23 = vadd.f32 %v6939_v27, %v6877_v30  ;;  %v6884_v27 = vmul.f32 %v13393_v6, %v13393_v6 }
 0x8ce   :  { %v6941_v58 = vadd.f32 %v6940_v23, %v6878_v55  ;;  %v6885_v23 = vmul.f32 %v13397_v14, %v13397_v14 }
 0x8d0   :  { %v6942_v57 = vadd.f32 %v6941_v58, %v6879_v24  ;;  %v6886_v58 = vmul.f32 %v13401_v13, %v13401_v13 }
 0x8d2   :  { %v6943_v1 = vadd.f32 %v6942_v57, %v6880_v20  ;;  %v6887_v57 = vmul.f32 %v13405_v16, %v13405_v16 }
 0x8d4   :  { %v6944_v25 = vadd.f32 %v6943_v1, %v6881_v11  ;;  %v6888_v1 = vmul.f32 %v13409_v31, %v13409_v31 }
 0x8d6   :  { %v6945_v30 = vadd.f32 %v6944_v25, %v6882_v15  ;;  %v6889_v25 = vmul.f32 %v13413_v28, %v13413_v28 }
 0x8d8   :  { %v6946_v55 = vadd.f32 %v6945_v30, %v6883_v43  ;;  %v6890_v30 = vmul.f32 %v13417_v33, %v13417_v33 }
 0x8da   :  { %v6947_v24 = vadd.f32 %v6946_v55, %v6884_v27  ;;  %v6891_v55 = vmul.f32 %v13421_v22, %v13421_v22 }
 0x8dc   :  { %v6948_v20 = vadd.f32 %v6947_v24, %v6885_v23  ;;  %v6892_v24 = vmul.f32 %v13425_v45, %v13425_v45 }
 0x8de   :  { %v6949_v11 = vadd.f32 %v6948_v20, %v6886_v58  ;;  %v6893_v20 = vmul.f32 %v13429_v48, %v13429_v48 }
 0x8e0   :  { %v6950_v15 = vadd.f32 %v6949_v11, %v6887_v57  ;;  %v6894_v11 = vmul.f32 %v13433_v42, %v13433_v42 }
 0x8e2   :  { %v6951_v43 = vadd.f32 %v6950_v15, %v6888_v1  ;;  %v6895_v15 = vmul.f32 %v13437_v51, %v13437_v51 }
 0x8e4   :  { %v6952_v27 = vadd.f32 %v6951_v43, %v6889_v25  ;;  %v6896_v43 = vmul.f32 %v13441_v37, %v13441_v37 }
 0x8e6   :  { %v6953_v23 = vadd.f32 %v6952_v27, %v6890_v30  ;;  %v6897_v27 = vmul.f32 %v13445_v9, %v13445_v9 }
 0x8e8   :  { %v6954_v58 = vadd.f32 %v6953_v23, %v6891_v55  ;;  %v15585_v23 = vld [vmem:[#allocation26_spill] sm:$0xff] }
 0x8e9   :  { %v6898_v48 = vmul.f32 %v15585_v23, %v15585_v23 }
 0x8ea   :  { %v6955_v57 = vadd.f32 %v6954_v58, %v6892_v24  ;;  %v15586_v58 = vld [vmem:[#allocation50_spill] sm:$0xff] }
 0x8eb   :  { %v6899_v42 = vmul.f32 %v15586_v58, %v15586_v58 }
 0x8ec   :  { %v6956_v1 = vadd.f32 %v6955_v57, %v6893_v20  ;;  %v15587_v57 = vld [vmem:[#allocation54_spill] sm:$0xff] }
 0x8ed   :  { %v6900_v51 = vmul.f32 %v15587_v57, %v15587_v57 }
 0x8ee   :  { %v6957_v25 = vadd.f32 %v6956_v1, %v6894_v11  ;;  %v15588_v1 = vld [vmem:[#allocation40_spill] sm:$0xff] }
 0x8ef   :  { %v6901_v37 = vmul.f32 %v15588_v1, %v15588_v1 }
 0x8f0   :  { %v6958_v30 = vadd.f32 %v6957_v25, %v6895_v15  ;;  %v15589_v25 = vld [vmem:[#allocation41_spill] sm:$0xff] }
 0x8f1   :  { %v6902_v9 = vmul.f32 %v15589_v25, %v15589_v25 }
 0x8f2   :  { %v6959_v55 = vadd.f32 %v6958_v30, %v6896_v43  ;;  %v15590_v30 = vld [vmem:[#allocation43_spill] sm:$0xff] }
 0x8f3   :  { %v6903_v23 = vmul.f32 %v15590_v30, %v15590_v30 }
 0x8f4   :  { %v6960_v24 = vadd.f32 %v6959_v55, %v6897_v27  ;;  %v6904_v55 = vmul.f32 %v13473_v54, %v13473_v54 }
 0x8f6   :  { %v6961_v20 = vadd.f32 %v6960_v24, %v6898_v48  ;;  %v6905_v24 = vmul.f32 %v13477_v60, %v13477_v60 }
 0x8f8   :  { %v6962_v11 = vadd.f32 %v6961_v20, %v6899_v42  ;;  %v6906_v20 = vmul.f32 %v13481_v8, %v13481_v8 }
 0x8fa   :  { %v6963_v15 = vadd.f32 %v6962_v11, %v6900_v51  ;;  %v6907_v11 = vmul.f32 %v13485_v35, %v13485_v35 }
 0x8fc   :  { %v6964_v43 = vadd.f32 %v6963_v15, %v6901_v37  ;;  %v15591_v15 = vld [vmem:[#allocation101_spill] sm:$0xff] }
 0x8fd   :  { %v6908_v30 = vmul.f32 %v15591_v15, %v15591_v15 }
 0x8fe   :  { %v6965_v27 = vadd.f32 %v6964_v43, %v6902_v9  ;;  %v15592_v43 = vld [vmem:[#allocation102_spill] sm:$0xff] }
 0x8ff   :  { %v6909_v54 = vmul.f32 %v15592_v43, %v15592_v43 }
 0x900   :  { %v6966_v48 = vadd.f32 %v6965_v27, %v6903_v23  ;;  %v15593_v27 = vld [vmem:[#allocation103_spill] sm:$0xff] }
 0x901   :  { %v6910_v60 = vmul.f32 %v15593_v27, %v15593_v27 }
 0x902   :  { %v6967_v42 = vadd.f32 %v6966_v48, %v6904_v55  ;;  %v15594_v48 = vld [vmem:[#allocation104_spill] sm:$0xff] }
 0x903   :  { %v6911_v8 = vmul.f32 %v15594_v48, %v15594_v48  ;;  %v13639_v48 = vld [vmem:[#allocation3 + $0x8] sm:$0xff]  }
 0x904   :  { %v6968_v51 = vadd.f32 %v6967_v42, %v6905_v24  ;;  %v6912_v42 = vmul.f32 %v13505_v17, %v13505_v17  ;;  %15596 = vst [vmem:[#allocation106_spill] sm:$0xff] %v13639_v48  ;;  %v15642_v48 = vld [vmem:[#allocation43_spill] sm:$0xff] }
 0x906   :  { %v6969_v37 = vadd.f32 %v6968_v51, %v6906_v20 }
 0x908   :  { %v6970_v9 = vadd.f32 %v6969_v37, %v6907_v11 }
 0x90a   :  { %v6971_v23 = vadd.f32 %v6970_v9, %v6908_v30  ;;  %v13635_v9 = vld [vmem:[#allocation3] sm:$0xff]  }
 0x90b   :  { %15595 = vst [vmem:[#allocation105_spill] sm:$0xff] %v13635_v9  ;;  %v15644_v9 = vld [vmem:[#allocation97_spill] sm:$0xff] }
 0x90c   :  { %v6972_v55 = vadd.f32 %v6971_v23, %v6909_v54  ;;  %v13671_v23 = vld [vmem:[#allocation3 + $0x48] sm:$0xff]   ;;  %v13675_v54 = vld [vmem:[#allocation3 + $0x50] sm:$0xff]  }
 0x90d   :  { %15604 = vst [vmem:[#allocation61_spill] sm:$0xff] %v13671_v23  ;;  %15605 = vst [vmem:[#allocation62_spill] sm:$0xff] %v13675_v54  ;;  %v13691_v23 = vld [vmem:[#allocation3 + $0x70] sm:$0xff]   ;;  %v13695_v54 = vld [vmem:[#allocation3 + $0x78] sm:$0xff]  }
 0x90e   :  { %v6973_v24 = vadd.f32 %v6972_v55, %v6910_v60  ;;  %15609 = vst [vmem:[#allocation21_spill] sm:$0xff] %v13691_v23  ;;  %15610 = vst [vmem:[#allocation23_spill] sm:$0xff] %v13695_v54  ;;  %v13711_v23 = vld [vmem:[#allocation3 + $0x98] sm:$0xff]   ;;  %v13715_v54 = vld [vmem:[#allocation3 + $0xa0] sm:$0xff]  }
 0x90f   :  { %15614 = vst [vmem:[#allocation65_spill] sm:$0xff] %v13711_v23  ;;  %15615 = vst [vmem:[#allocation67_spill] sm:$0xff] %v13715_v54  ;;  %v6713_v60 = vld [vmem:[%s14686_s8] sm:$0x1]  ;;  %v13746_v54 = vld [vmem:[#allocation3 + $0xd8] sm:$0xff]  }
 0x910   :  { %v6974_v20 = vadd.f32 %v6973_v24, %v6911_v8  ;;  %v13643_v24 = vld [vmem:[#allocation3 + $0x10] sm:$0xff]   ;;  %v13730_v8 = vld [vmem:[#allocation3 + $0xb8] sm:$0xff]   ;;  %15622 = vst [vmem:[#allocation71_spill] sm:$0xff] %v13746_v54 }
 0x911   :  { %15597 = vst [vmem:[#allocation39_spill] sm:$0xff] %v13643_v24  ;;  %15618 = vst [vmem:[#allocation68_spill] sm:$0xff] %v13730_v8  ;;  %v13765_v54 = vld [vmem:[#allocation3 + $0xf8] sm:$0xff]   ;;  %v15640_v24 = vld [vmem:[#allocation41_spill] sm:$0xff] }
 0x912   :  { %v6975_v51 = vadd.f32 %v6974_v20, %v6912_v42  ;;  %v13651_v20 = vld [vmem:[#allocation3 + $0x20] sm:$0xff]   ;;  %v13663_v42 = vld [vmem:[#allocation3 + $0x38] sm:$0xff]   ;;  %15627 = vst [vmem:[#allocation51_spill] sm:$0xff] %v13765_v54 }
 0x913   :  { %15599 = vst [vmem:[#allocation74_spill] sm:$0xff] %v13651_v20  ;;  %15602 = vst [vmem:[#allocation55_spill] sm:$0xff] %v13663_v42  ;;  %v13683_v42 = vld [vmem:[#allocation3 + $0x60] sm:$0xff]   ;;  %v15629_v8 = vld [vmem:[#allocation83_spill] sm:$0xff] }
 0x914   :  { %v6976_v35 = vrot.slane %v6975_v51, 4  ;;  %15607 = vst [vmem:[#allocation59_spill] sm:$0xff] %v13683_v42  ;;  %v13703_v42 = vld [vmem:[#allocation3 + $0x88] sm:$0xff]  }
 0x915   :  { %15612 = vst [vmem:[#allocation63_spill] sm:$0xff] %v13703_v42  ;;  %v13722_v42 = vld [vmem:[#allocation3 + $0xa8] sm:$0xff]  }
 0x916   :  { %v6977_v15 = vadd.f32 %v6976_v35, %v6975_v51  ;;  %15616 = vst [vmem:[#allocation69_spill] sm:$0xff] %v13722_v42  ;;  %v13738_v51 = vld [vmem:[#allocation3 + $0xc8] sm:$0xff]  }
 0x917   :  { %15620 = vst [vmem:[#allocation72_spill] sm:$0xff] %v13738_v51  ;;  %v13754_v35 = vld [vmem:[#allocation3 + $0xe8] sm:$0xff]   ;;  %v13772_v51 = vld [vmem:[%s14687_s9] ss:$0 sm:$0xff]  ;;  %s9707_s9 = smov [#allocation11]  }
 0x918   :  { %v6978_v11 = vrot.slane %v6977_v15, 2  ;;  %15624 = vst [vmem:[#allocation27_spill] sm:$0xff] %v13754_v35  ;;  %v15630_v35 = vld [vmem:[#allocation86_spill] sm:$0xff]  ;;  %s7387_s28 = sshll.u32 %s9707_s9, 4  ;;  %s14655_s28 = int_to_ptr.vmem [resolvable:$true] %s7387_s28 }
 0x919   :  { %s9669_s29 = scalar_lea.vmem %s14655_s28, 8192  ;;  %p9674_p5 = scmp.lt.s32.totalorder %s14655_s28, %s14655_s28 }
 0x91a   :  { %v6979_v37 = vadd.f32 %v6978_v11, %v6977_v15  ;;  %v13647_v15 = vld [vmem:[#allocation3 + $0x18] sm:$0xff]   ;;  %v13667_v11 = vld [vmem:[#allocation3 + $0x40] sm:$0xff]   ;;  %p9670_p4 = scmp.ne.s32.totalorder %s14655_s28, %s9669_s29  ;;  %p9675_p6 = scmp.lt.s32.totalorder %s9669_s29, %s9669_s29 }
 0x91b   :  { %15598 = vst [vmem:[#allocation36_spill] sm:$0xff] %v13647_v15  ;;  %15603 = vst [vmem:[#allocation56_spill] sm:$0xff] %v13667_v11  ;;  %v13687_v11 = vld [vmem:[#allocation3 + $0x68] sm:$0xff]   ;;  %v15636_v15 = vld [vmem:[#allocation26_spill] sm:$0xff] }
 0x91c   :  { %v6980_v25 = vrot.slane %v6979_v37, 1  ;;  %15608 = vst [vmem:[#allocation60_spill] sm:$0xff] %v13687_v11  ;;  %v13707_v11 = vld [vmem:[#allocation3 + $0x90] sm:$0xff]   ;;  %p9676_p7 = por %p9675_p6, %p9674_p5 }
 0x91d   :  { %15613 = vst [vmem:[#allocation64_spill] sm:$0xff] %v13707_v11  ;;  %v13726_v11 = vld [vmem:[#allocation3 + $0xb0] sm:$0xff]  }
 0x91e   :  { %v6981_v43 = vadd.f32 %v6980_v25, %v6979_v37  ;;  %v13655_v37 = vld [vmem:[#allocation3 + $0x28] sm:$0xff]   ;;  %v13659_v25 = vld [vmem:[#allocation3 + $0x30] sm:$0xff]   ;;  %15617 = vst [vmem:[#allocation66_spill] sm:$0xff] %v13726_v11  ;;  %p9677_p8 = pnand %p9676_p7, %p9670_p4 }
 0x91f   :  { %15600 = vst [vmem:[#allocation57_spill] sm:$0xff] %v13655_v37  ;;  %15601 = vst [vmem:[#allocation58_spill] sm:$0xff] %v13659_v25  ;;  %v13679_v25 = vld [vmem:[#allocation3 + $0x58] sm:$0xff]   ;;  %v13761_v11 = vld [vmem:[#allocation3 + $0xf0] sm:$0xff]  }
 0x920   :  { %v6982_v30 = vmul.f32 0.001953125, %v6981_v43  ;;  %15606 = vst [vmem:[#allocation19_spill] sm:$0xff] %v13679_v25  ;;  %v13699_v25 = vld [vmem:[#allocation3 + $0x80] sm:$0xff]   ;;  %15626 = vst [vmem:[#allocation25_spill] sm:$0xff] %v13761_v11  ;;  %v7187_v37 = vunpack.c.h.bf16 %v13761_v11 }
 0x921   :  { %15611 = vst [vmem:[#allocation20_spill] sm:$0xff] %v13699_v25  ;;  %v13734_v25 = vld [vmem:[#allocation3 + $0xc0] sm:$0xff]  }
 0x922   :  { %v6983_v55 = vadd.f32 1e-05, %v6982_v30  ;;  %15619 = vst [vmem:[#allocation22_spill] sm:$0xff] %v13734_v25  ;;  %v13742_v30 = vld [vmem:[#allocation3 + $0xd0] sm:$0xff]  }
 0x923   :  { %15621 = vst [vmem:[#allocation70_spill] sm:$0xff] %v13742_v30  ;;  %v15635_v30 = vld [vmem:[#allocation95_spill] sm:$0xff] }
 0x924   :  { %9539 = vrsqrt.f32 %v6983_v55  ;;  %v13750_v55 = vld [vmem:[#allocation3 + $0xe0] sm:$0xff]  }
 0x925   :  { %15623 = vst [vmem:[#allocation37_spill] sm:$0xff] %v13750_v55  ;;  %v15634_v55 = vld [vmem:[#allocation94_spill] sm:$0xff] }
 0x92e   :  { %v9540_v23 = vpop.eup %9539 }
 0x92f   :  { %v6985_v20 = vmul.f32 %v9540_v23, %v6713_v60  ;;  %v15625_v60 = vld [vmem:[#allocation16_spill] sm:$0xff] }
 0x931   :  { %v13759_v43 = vrot.slane %v6985_v20, %v15625_v60  ;;  %v15628_v60 = vld [vmem:[#allocation82_spill] sm:$0xff] }
 0x933   :  { %v7053_v20 = vmul.f32 %v13759_v43, %v15593_v27  ;;  %v13778_v23 = vmul.f32 %v13759_v43, %v15628_v60  ;;  %v13782_v11 = vmul.f32 %v13759_v43, %v15629_v8  ;;  %v13786_v25 = vmul.f32 %v13759_v43, %v15630_v35 }
 0x934   :  { %v13790_v42 = vmul.f32 %v13759_v43, %v13265_v53  ;;  %v13794_v54 = vmul.f32 %v13759_v43, %v13269_v46  ;;  %v13798_v27 = vmul.f32 %v13759_v43, %v13273_v50  ;;  %v13802_v8 = vmul.f32 %v13759_v43, %v13277_v21 }
 0x935   :  { %v7123_v60 = vadd.f32 %v13772_v51, %v7053_v20  ;;  %v13807_v35 = vmul.f32 %v13759_v43, %v13281_v5  ;;  %v13811_v53 = vmul.f32 %v13759_v43, %v13285_v32  ;;  %v13815_v46 = vmul.f32 %v13759_v43, %v13289_v3 }
 0x936   :  { %v13819_v50 = vmul.f32 %v13759_v43, %v13293_v63  ;;  %v13823_v21 = vmul.f32 %v13759_v43, %v13297_v38  ;;  %v13827_v5 = vmul.f32 %v13759_v43, %v13301_v34  ;;  %v13831_v32 = vmul.f32 %v13759_v43, %v13305_v40 }
 0x937   :  { %v7251_v20 = vadd.f32 %v7187_v37, %v7123_v60  ;;  %v13835_v3 = vmul.f32 %v13759_v43, %v13309_v56  ;;  %v13839_v63 = vmul.f32 %v13759_v43, %v13313_v44  ;;  %v13843_v38 = vmul.f32 %v13759_v43, %v13317_v36  ;;  %v15631_v60 = vld [vmem:[#allocation87_spill] sm:$0xff] }
 0x938   :  { %v13847_v34 = vmul.f32 %v13759_v43, %v13321_v41  ;;  %v13851_v40 = vmul.f32 %v13759_v43, %v13325_v18  ;;  %v13855_v56 = vmul.f32 %v13759_v43, %v13329_v2  ;;  %v13859_v44 = vmul.f32 %v13759_v43, %v13333_v12 }
 0x939   :  { %v7315_v37 = vmax.f32 %v7251_v20, 0.0  ;;  %v13863_v36 = vmul.f32 %v13759_v43, %v13337_v29  ;;  %v13867_v41 = vmul.f32 %v13759_v43, %v13341_v49  ;;  %v13871_v18 = vmul.f32 %v13759_v43, %v13345_v52  ;;  %v15632_v20 = vld [vmem:[#allocation90_spill] sm:$0xff] }
 0x93a   :  { %v13875_v2 = vmul.f32 %v13759_v43, %v13349_v59  ;;  %v13879_v12 = vmul.f32 %v13759_v43, %v13353_v61  ;;  %v13883_v29 = vmul.f32 %v13759_v43, %v13357_v26  ;;  %v13887_v49 = vmul.f32 %v13759_v43, %v13361_v10 }
 0x93b   :  { %7379 = vst [vmem:[#allocation11 + $0x1e8] sm:$0xff] %v7315_v37  ;;  %v13891_v52 = vmul.f32 %v13759_v43, %v13365_v39  ;;  %v13895_v59 = vmul.f32 %v13759_v43, %v13369_v62  ;;  %v13899_v61 = vmul.f32 %v13759_v43, %v13373_v19  ;;  %v13903_v26 = vmul.f32 %v13759_v43, %v13377_v0  ;;  %v15633_v37 = vld [vmem:[#allocation91_spill] sm:$0xff] }
 0x93c   :  { %v13907_v10 = vmul.f32 %v13759_v43, %v13381_v4  ;;  %v13911_v39 = vmul.f32 %v13759_v43, %v13385_v7  ;;  %v13915_v62 = vmul.f32 %v13759_v43, %v13389_v47  ;;  %v13919_v19 = vmul.f32 %v13759_v43, %v13393_v6 }
 0x93d   :  { %v13923_v0 = vmul.f32 %v13759_v43, %v13397_v14  ;;  %v13927_v4 = vmul.f32 %v13759_v43, %v13401_v13  ;;  %v13931_v7 = vmul.f32 %v13759_v43, %v13405_v16  ;;  %v13935_v47 = vmul.f32 %v13759_v43, %v13409_v31 }
 0x93e   :  { %v13939_v6 = vmul.f32 %v13759_v43, %v13413_v28  ;;  %v13943_v14 = vmul.f32 %v13759_v43, %v13417_v33  ;;  %v13947_v13 = vmul.f32 %v13759_v43, %v13421_v22  ;;  %v13951_v16 = vmul.f32 %v13759_v43, %v13425_v45 }
 0x93f   :  { %v13955_v31 = vmul.f32 %v13759_v43, %v15631_v60  ;;  %v13959_v28 = vmul.f32 %v13759_v43, %v15632_v20  ;;  %v13963_v33 = vmul.f32 %v13759_v43, %v15633_v37  ;;  %v13967_v22 = vmul.f32 %v13759_v43, %v15634_v55 }
 0x940   :  { %v13971_v45 = vmul.f32 %v13759_v43, %v15635_v30  ;;  %v13975_v60 = vmul.f32 %v13759_v43, %v15636_v15  ;;  %v13979_v20 = vmul.f32 %v13759_v43, %v15586_v58  ;;  %v13983_v37 = vmul.f32 %v13759_v43, %v15587_v57 }
 0x941   :  { %v13987_v55 = vmul.f32 %v13759_v43, %v15588_v1  ;;  %v13991_v30 = vmul.f32 %v13759_v43, %v15640_v24  ;;  %v13995_v15 = vmul.f32 %v13759_v43, %v15642_v48  ;;  %v13999_v58 = vmul.f32 %v13759_v43, %v15644_v9 }
 0x942   :  { %15637 = vst [vmem:[#allocation29_spill] sm:$0xff] %v13979_v20  ;;  %15638 = vst [vmem:[#allocation31_spill] sm:$0xff] %v13983_v37  ;;  %v15646_v20 = vld [vmem:[#allocation98_spill] sm:$0xff]  ;;  %v15647_v37 = vld [vmem:[#allocation99_spill] sm:$0xff] }
 0x943   :  { %15639 = vst [vmem:[#allocation24_spill] sm:$0xff] %v13987_v55  ;;  %15641 = vst [vmem:[#allocation30_spill] sm:$0xff] %v13991_v30  ;;  %v14003_v57 = vmul.f32 %v13759_v43, %v15646_v20  ;;  %v14007_v1 = vmul.f32 %v13759_v43, %v15647_v37  ;;  %v15648_v55 = vld [vmem:[#allocation100_spill] sm:$0xff]  ;;  %v15649_v30 = vld [vmem:[#allocation101_spill] sm:$0xff]  ;;  %v14027_v37 = vmul.f32 %v13759_v43, %v13505_v17 }
 0x944   :  { %15643 = vst [vmem:[#allocation32_spill] sm:$0xff] %v13995_v15  ;;  %15645 = vst [vmem:[#allocation53_spill] sm:$0xff] %v13999_v58  ;;  %v14011_v24 = vmul.f32 %v13759_v43, %v15648_v55  ;;  %v14015_v48 = vmul.f32 %v13759_v43, %v15649_v30  ;;  %v15650_v15 = vld [vmem:[#allocation102_spill] sm:$0xff]  ;;  %v15651_v58 = vld [vmem:[#allocation104_spill] sm:$0xff]  ;;  %v14031_v55 = vadd.f32 %v13772_v51, %v13778_v23 }
 0x945   :  { %v14019_v9 = vmul.f32 %v13759_v43, %v15650_v15  ;;  %v14023_v20 = vmul.f32 %v13759_v43, %v15651_v58  ;;  %v14035_v30 = vadd.f32 %v13772_v51, %v13782_v11  ;;  %v14039_v15 = vadd.f32 %v13772_v51, %v13786_v25 }
 0x946   :  { %v14043_v58 = vadd.f32 %v13772_v51, %v13790_v42  ;;  %v14047_v17 = vadd.f32 %v13772_v51, %v13794_v54  ;;  %v14051_v43 = vadd.f32 %v13772_v51, %v13798_v27  ;;  %v14055_v11 = vadd.f32 %v13772_v51, %v13802_v8 }
 0x947   :  { %v14059_v25 = vadd.f32 %v13772_v51, %v13807_v35  ;;  %v14063_v42 = vadd.f32 %v13772_v51, %v13811_v53  ;;  %v14067_v54 = vadd.f32 %v13772_v51, %v13815_v46  ;;  %v14071_v23 = vadd.f32 %v13772_v51, %v13819_v50 }
 0x948   :  { %v14075_v27 = vadd.f32 %v13772_v51, %v13823_v21  ;;  %v14079_v8 = vadd.f32 %v13772_v51, %v13827_v5  ;;  %v14083_v35 = vadd.f32 %v13772_v51, %v13831_v32  ;;  %v14087_v53 = vadd.f32 %v13772_v51, %v13835_v3 }
 0x949   :  { %v14091_v46 = vadd.f32 %v13772_v51, %v13839_v63  ;;  %v14095_v50 = vadd.f32 %v13772_v51, %v13843_v38  ;;  %v14099_v21 = vadd.f32 %v13772_v51, %v13847_v34  ;;  %v14103_v5 = vadd.f32 %v13772_v51, %v13851_v40 }
 0x94a   :  { %v14107_v32 = vadd.f32 %v13772_v51, %v13855_v56  ;;  %v14111_v3 = vadd.f32 %v13772_v51, %v13859_v44  ;;  %v14115_v63 = vadd.f32 %v13772_v51, %v13863_v36  ;;  %v14119_v38 = vadd.f32 %v13772_v51, %v13867_v41 }
 0x94b   :  { %v14123_v34 = vadd.f32 %v13772_v51, %v13871_v18  ;;  %v14127_v40 = vadd.f32 %v13772_v51, %v13875_v2  ;;  %v14131_v56 = vadd.f32 %v13772_v51, %v13879_v12  ;;  %v14135_v44 = vadd.f32 %v13772_v51, %v13883_v29 }
 0x94c   :  { %v14139_v36 = vadd.f32 %v13772_v51, %v13887_v49  ;;  %v14143_v41 = vadd.f32 %v13772_v51, %v13891_v52  ;;  %v14147_v18 = vadd.f32 %v13772_v51, %v13895_v59  ;;  %v14151_v2 = vadd.f32 %v13772_v51, %v13899_v61 }
 0x94d   :  { %v14155_v12 = vadd.f32 %v13772_v51, %v13903_v26  ;;  %v14159_v29 = vadd.f32 %v13772_v51, %v13907_v10  ;;  %v14163_v49 = vadd.f32 %v13772_v51, %v13911_v39  ;;  %v14167_v52 = vadd.f32 %v13772_v51, %v13915_v62 }
 0x94e   :  { %v14171_v59 = vadd.f32 %v13772_v51, %v13919_v19  ;;  %v14175_v61 = vadd.f32 %v13772_v51, %v13923_v0  ;;  %v14179_v26 = vadd.f32 %v13772_v51, %v13927_v4  ;;  %v14183_v10 = vadd.f32 %v13772_v51, %v13931_v7 }
 0x94f   :  { %v14187_v39 = vadd.f32 %v13772_v51, %v13935_v47  ;;  %v14191_v62 = vadd.f32 %v13772_v51, %v13939_v6  ;;  %v14195_v19 = vadd.f32 %v13772_v51, %v13943_v14  ;;  %v14199_v0 = vadd.f32 %v13772_v51, %v13947_v13 }
 0x950   :  { %v14203_v4 = vadd.f32 %v13772_v51, %v13951_v16  ;;  %v14207_v7 = vadd.f32 %v13772_v51, %v13955_v31  ;;  %v14211_v47 = vadd.f32 %v13772_v51, %v13959_v28  ;;  %v14215_v6 = vadd.f32 %v13772_v51, %v13963_v33  ;;  %v15657_v31 = vld [vmem:[#allocation29_spill] sm:$0xff] }
 0x951   :  { %v14219_v14 = vadd.f32 %v13772_v51, %v13967_v22  ;;  %v14223_v13 = vadd.f32 %v13772_v51, %v13971_v45  ;;  %v14227_v16 = vadd.f32 %v13772_v51, %v13975_v60  ;;  %v14231_v28 = vadd.f32 %v13772_v51, %v15657_v31 }
 0x952   :  { %15652 = vst [vmem:[#allocation42_spill] sm:$0xff] %v14211_v47  ;;  %15653 = vst [vmem:[#allocation44_spill] sm:$0xff] %v14215_v6  ;;  %v15658_v47 = vld [vmem:[#allocation31_spill] sm:$0xff]  ;;  %v15659_v6 = vld [vmem:[#allocation24_spill] sm:$0xff] }
 0x953   :  { %15654 = vst [vmem:[#allocation45_spill] sm:$0xff] %v14219_v14  ;;  %15655 = vst [vmem:[#allocation46_spill] sm:$0xff] %v14223_v13  ;;  %v14235_v33 = vadd.f32 %v13772_v51, %v15658_v47  ;;  %v14239_v22 = vadd.f32 %v13772_v51, %v15659_v6  ;;  %v15660_v14 = vld [vmem:[#allocation30_spill] sm:$0xff]  ;;  %v15661_v13 = vld [vmem:[#allocation32_spill] sm:$0xff]  ;;  %v14255_v47 = vadd.f32 %v13772_v51, %v14003_v57 }
 0x954   :  { %15656 = vst [vmem:[#allocation33_spill] sm:$0xff] %v14227_v16  ;;  %v14243_v45 = vadd.f32 %v13772_v51, %v15660_v14  ;;  %v14247_v60 = vadd.f32 %v13772_v51, %v15661_v13  ;;  %v15662_v16 = vld [vmem:[#allocation53_spill] sm:$0xff]  ;;  %v14259_v6 = vadd.f32 %v13772_v51, %v14007_v1  ;;  %v14263_v14 = vadd.f32 %v13772_v51, %v14011_v24 }
 0x955   :  { %v14251_v31 = vadd.f32 %v13772_v51, %v15662_v16  ;;  %15663 = vst [vmem:[#allocation34_spill] sm:$0xff] %v14255_v47  ;;  %v14267_v13 = vadd.f32 %v13772_v51, %v14015_v48  ;;  %v14271_v16 = vadd.f32 %v13772_v51, %v14019_v9  ;;  %v14275_v57 = vadd.f32 %v13772_v51, %v14023_v20  ;;  %v15672_v9 = vld [vmem:[#allocation106_spill] sm:$0xff] }
 0x956   :  { %15664 = vst [vmem:[#allocation17_spill] sm:$0xff] %v14259_v6  ;;  %15665 = vst [vmem:[#allocation18_spill] sm:$0xff] %v14263_v14  ;;  %v14279_v1 = vadd.f32 %v13772_v51, %v14027_v37  ;;  %v15669_v6 = vld [vmem:[#allocation105_spill] sm:$0xff]  ;;  %v15674_v20 = vunpack.c.h.bf16 %v15672_v9  ;;  %v15675_v37 = vld [vmem:[#allocation39_spill] sm:$0xff] }
 0x957   :  { %15666 = vst [vmem:[#allocation35_spill] sm:$0xff] %v14267_v13  ;;  %15667 = vst [vmem:[#allocation77_spill] sm:$0xff] %v14271_v16  ;;  %v15670_v24 = vunpack.c.l.bf16 %v15669_v6  ;;  %v15671_v48 = vunpack.c.h.bf16 %v15669_v6  ;;  %v15673_v16 = vunpack.c.l.bf16 %v15672_v9  ;;  %v15677_v6 = vunpack.c.h.bf16 %v15675_v37  ;;  %v15681_v9 = vld [vmem:[#allocation74_spill] sm:$0xff] }
 0x958   :  { %15668 = vst [vmem:[#allocation80_spill] sm:$0xff] %v14279_v1  ;;  %v14299_v51 = vadd.f32 %v15674_v20, %v14043_v58  ;;  %v15676_v1 = vunpack.c.l.bf16 %v15675_v37  ;;  %v15682_v20 = vunpack.c.l.bf16 %v15681_v9  ;;  %v15684_v37 = vld [vmem:[#allocation57_spill] sm:$0xff] }
 0x959   :  { %v14284_v14 = vadd.f32 %v15670_v24, %v14031_v55  ;;  %v14289_v13 = vadd.f32 %v15671_v48, %v14035_v30  ;;  %v14294_v47 = vadd.f32 %v15673_v16, %v14039_v15  ;;  %v14309_v30 = vadd.f32 %v15677_v6, %v14051_v43  ;;  %v15678_v24 = vld [vmem:[#allocation36_spill] sm:$0xff] }
 0x95a   :  { %v14304_v55 = vadd.f32 %v15676_v1, %v14047_v17  ;;  %v15679_v48 = vunpack.c.l.bf16 %v15678_v24  ;;  %v15680_v16 = vunpack.c.h.bf16 %v15678_v24  ;;  %v14324_v17 = vadd.f32 %v15682_v20, %v14063_v42  ;;  %v15690_v20 = vld [vmem:[#allocation55_spill] sm:$0xff] }
 0x95b   :  { %v15683_v1 = vunpack.c.h.bf16 %v15681_v9  ;;  %v15685_v6 = vunpack.c.l.bf16 %v15684_v37  ;;  %v15686_v24 = vunpack.c.h.bf16 %v15684_v37  ;;  %v15692_v37 = vunpack.c.h.bf16 %v15690_v20 }
 0x95c   :  { %v14314_v15 = vadd.f32 %v15679_v48, %v14055_v11  ;;  %v14319_v58 = vadd.f32 %v15680_v16, %v14059_v25  ;;  %v15687_v48 = vld [vmem:[#allocation58_spill] sm:$0xff] }
 0x95d   :  { %v14329_v43 = vadd.f32 %v15683_v1, %v14067_v54  ;;  %v14334_v11 = vadd.f32 %v15685_v6, %v14071_v23  ;;  %v14339_v25 = vadd.f32 %v15686_v24, %v14075_v27  ;;  %v15688_v16 = vunpack.c.l.bf16 %v15687_v48  ;;  %v15693_v6 = vld [vmem:[#allocation56_spill] sm:$0xff] }
 0x95e   :  { %v15689_v9 = vunpack.c.h.bf16 %v15687_v48  ;;  %v15691_v1 = vunpack.c.l.bf16 %v15690_v20  ;;  %v14359_v27 = vadd.f32 %v15692_v37, %v14091_v46  ;;  %v15694_v24 = vunpack.c.l.bf16 %v15693_v6 }
 0x95f   :  { %v14344_v42 = vadd.f32 %v15688_v16, %v14079_v8  ;;  %v15695_v48 = vunpack.c.h.bf16 %v15693_v6  ;;  %v15696_v16 = vld [vmem:[#allocation61_spill] sm:$0xff] }
 0x960   :  { %v14349_v54 = vadd.f32 %v15689_v9, %v14083_v35  ;;  %v14354_v23 = vadd.f32 %v15691_v1, %v14087_v53  ;;  %v14364_v8 = vadd.f32 %v15694_v24, %v14095_v50  ;;  %v15697_v9 = vunpack.c.l.bf16 %v15696_v16  ;;  %v15699_v1 = vld [vmem:[#allocation62_spill] sm:$0xff]  ;;  %v15702_v24 = vld [vmem:[#allocation19_spill] sm:$0xff] }
 0x961   :  { %v14369_v35 = vadd.f32 %v15695_v48, %v14099_v21  ;;  %v15698_v20 = vunpack.c.h.bf16 %v15696_v16  ;;  %v15700_v37 = vunpack.c.l.bf16 %v15699_v1  ;;  %v15701_v6 = vunpack.c.h.bf16 %v15699_v1 }
 0x962   :  { %v14374_v53 = vadd.f32 %v15697_v9, %v14103_v5  ;;  %v15703_v48 = vunpack.c.l.bf16 %v15702_v24  ;;  %v15704_v16 = vunpack.c.h.bf16 %v15702_v24  ;;  %v15705_v9 = vld [vmem:[#allocation59_spill] sm:$0xff] }
 0x963   :  { %v14379_v46 = vadd.f32 %v15698_v20, %v14107_v32  ;;  %v14384_v50 = vadd.f32 %v15700_v37, %v14111_v3  ;;  %v14389_v21 = vadd.f32 %v15701_v6, %v14115_v63  ;;  %v15706_v20 = vunpack.c.l.bf16 %v15705_v9  ;;  %v15708_v37 = vld [vmem:[#allocation60_spill] sm:$0xff] }
 0x964   :  { %v14394_v5 = vadd.f32 %v15703_v48, %v14119_v38  ;;  %v14399_v32 = vadd.f32 %v15704_v16, %v14123_v34  ;;  %v15707_v1 = vunpack.c.h.bf16 %v15705_v9  ;;  %v15709_v6 = vunpack.c.l.bf16 %v15708_v37  ;;  %v15711_v48 = vld [vmem:[#allocation21_spill] sm:$0xff] }
 0x965   :  { %v14404_v3 = vadd.f32 %v15706_v20, %v14127_v40  ;;  %v15710_v24 = vunpack.c.h.bf16 %v15708_v37  ;;  %v15712_v16 = vunpack.c.l.bf16 %v15711_v48  ;;  %v15713_v9 = vunpack.c.h.bf16 %v15711_v48  ;;  %v15714_v20 = vld [vmem:[#allocation23_spill] sm:$0xff] }
 0x966   :  { %v14409_v63 = vadd.f32 %v15707_v1, %v14131_v56  ;;  %v14414_v38 = vadd.f32 %v15709_v6, %v14135_v44  ;;  %v15715_v1 = vunpack.c.l.bf16 %v15714_v20  ;;  %v15716_v37 = vunpack.c.h.bf16 %v15714_v20  ;;  %v15717_v6 = vld [vmem:[#allocation20_spill] sm:$0xff] }
 0x967   :  { %v14419_v34 = vadd.f32 %v15710_v24, %v14139_v36  ;;  %v14424_v40 = vadd.f32 %v15712_v16, %v14143_v41  ;;  %v14429_v56 = vadd.f32 %v15713_v9, %v14147_v18  ;;  %v15718_v24 = vunpack.c.l.bf16 %v15717_v6  ;;  %v15720_v16 = vld [vmem:[#allocation63_spill] sm:$0xff] }
 0x968   :  { %v14434_v44 = vadd.f32 %v15715_v1, %v14151_v2  ;;  %v14439_v36 = vadd.f32 %v15716_v37, %v14155_v12  ;;  %v15719_v48 = vunpack.c.h.bf16 %v15717_v6  ;;  %v15721_v9 = vunpack.c.l.bf16 %v15720_v16  ;;  %v15723_v1 = vld [vmem:[#allocation64_spill] sm:$0xff] }
 0x969   :  { %v14444_v41 = vadd.f32 %v15718_v24, %v14159_v29  ;;  %v15722_v20 = vunpack.c.h.bf16 %v15720_v16  ;;  %v15724_v37 = vunpack.c.l.bf16 %v15723_v1  ;;  %v15725_v6 = vunpack.c.h.bf16 %v15723_v1  ;;  %v15726_v24 = vld [vmem:[#allocation65_spill] sm:$0xff] }
 0x96a   :  { %v14449_v18 = vadd.f32 %v15719_v48, %v14163_v49  ;;  %v14454_v2 = vadd.f32 %v15721_v9, %v14167_v52  ;;  %v15727_v48 = vunpack.c.l.bf16 %v15726_v24  ;;  %v15728_v16 = vunpack.c.h.bf16 %v15726_v24  ;;  %v15729_v9 = vld [vmem:[#allocation67_spill] sm:$0xff] }
 0x96b   :  { %v14459_v12 = vadd.f32 %v15722_v20, %v14171_v59  ;;  %v14464_v29 = vadd.f32 %v15724_v37, %v14175_v61  ;;  %v14469_v49 = vadd.f32 %v15725_v6, %v14179_v26  ;;  %v15730_v20 = vunpack.c.l.bf16 %v15729_v9  ;;  %v15734_v37 = vld [vmem:[#allocation69_spill] sm:$0xff] }
 0x96c   :  { %v14474_v52 = vadd.f32 %v15727_v48, %v14183_v10  ;;  %v14479_v59 = vadd.f32 %v15728_v16, %v14187_v39  ;;  %v15732_v1 = vunpack.c.h.bf16 %v15729_v9  ;;  %v15735_v6 = vunpack.c.l.bf16 %v15734_v37  ;;  %v15739_v48 = vld [vmem:[#allocation66_spill] sm:$0xff] }
 0x96d   :  { %v14484_v61 = vadd.f32 %v15730_v20, %v14191_v62  ;;  %v15737_v24 = vunpack.c.h.bf16 %v15734_v37  ;;  %v15740_v16 = vunpack.c.l.bf16 %v15739_v48  ;;  %v15741_v20 = vld [vmem:[#allocation42_spill] sm:$0xff]  ;;  %v15742_v9 = vunpack.c.h.bf16 %v15739_v48 }
 0x96e   :  { %v14489_v26 = vadd.f32 %v15732_v1, %v14195_v19  ;;  %v14494_v10 = vadd.f32 %v15735_v6, %v14199_v0  ;;  %v15744_v1 = vld [vmem:[#allocation44_spill] sm:$0xff]  ;;  %v15747_v6 = vld [vmem:[#allocation45_spill] sm:$0xff] }
 0x96f   :  { %15731 = vst [vmem:[#allocation81_spill] sm:$0xff] %v14484_v61  ;;  %v14499_v39 = vadd.f32 %v15737_v24, %v14203_v4  ;;  %v14504_v62 = vadd.f32 %v15740_v16, %v14207_v7  ;;  %v14509_v19 = vadd.f32 %v15742_v9, %v15741_v20  ;;  %v15749_v24 = vld [vmem:[#allocation46_spill] sm:$0xff]  ;;  %v15752_v16 = vld [vmem:[#allocation33_spill] sm:$0xff]  ;;  %v15754_v9 = vld [vmem:[#allocation72_spill] sm:$0xff] }
 0x970   :  { %15733 = vst [vmem:[#allocation84_spill] sm:$0xff] %v14489_v26  ;;  %15736 = vst [vmem:[#allocation85_spill] sm:$0xff] %v14494_v10  ;;  %v15745_v26 = vld [vmem:[#allocation68_spill] sm:$0xff] }
 0x971   :  { %15738 = vst [vmem:[#allocation88_spill] sm:$0xff] %v14499_v39  ;;  %15743 = vst [vmem:[#allocation93_spill] sm:$0xff] %v14509_v19  ;;  %v15746_v61 = vunpack.c.l.bf16 %v15745_v26  ;;  %v15748_v37 = vunpack.c.h.bf16 %v15745_v26  ;;  %v15750_v39 = vld [vmem:[#allocation22_spill] sm:$0xff]  ;;  %v15755_v19 = vunpack.c.l.bf16 %v15754_v9  ;;  %v15756_v26 = vunpack.c.h.bf16 %v15754_v9 }
 0x972   :  { %v15751_v10 = vunpack.c.l.bf16 %v15750_v39  ;;  %v15753_v48 = vunpack.c.h.bf16 %v15750_v39  ;;  %v15768_v9 = vld [vmem:[#allocation34_spill] sm:$0xff] }
 0x973   :  { %v14514_v0 = vadd.f32 %v15746_v61, %v15744_v1  ;;  %v14519_v4 = vadd.f32 %v15748_v37, %v15747_v6  ;;  %v14534_v61 = vadd.f32 %v15755_v19, %v14231_v28  ;;  %v14539_v1 = vadd.f32 %v15756_v26, %v14235_v33  ;;  %v15758_v6 = vld [vmem:[#allocation70_spill] sm:$0xff]  ;;  %v15769_v26 = vld [vmem:[#allocation37_spill] sm:$0xff] }
 0x974   :  { %v14524_v7 = vadd.f32 %v15751_v10, %v15749_v24  ;;  %v14529_v20 = vadd.f32 %v15753_v48, %v15752_v16  ;;  %v15759_v37 = vunpack.c.l.bf16 %v15758_v6  ;;  %v15761_v39 = vunpack.c.h.bf16 %v15758_v6  ;;  %v15763_v16 = vld [vmem:[#allocation71_spill] sm:$0xff] }
 0x975   :  { %15757 = vst [vmem:[#allocation52_spill] sm:$0xff] %v14539_v1  ;;  %v15764_v48 = vunpack.c.l.bf16 %v15763_v16  ;;  %v15766_v19 = vunpack.c.h.bf16 %v15763_v16  ;;  %v15770_v1 = vunpack.c.l.bf16 %v15769_v26  ;;  %v15772_v6 = vunpack.c.h.bf16 %v15769_v26 }
 0x976   :  { %v14544_v10 = vadd.f32 %v15759_v37, %v14239_v22  ;;  %v14549_v24 = vadd.f32 %v15761_v39, %v14243_v45  ;;  %v15771_v37 = vld [vmem:[#allocation17_spill] sm:$0xff]  ;;  %v15774_v39 = vld [vmem:[#allocation18_spill] sm:$0xff] }
 0x977   :  { %v14554_v28 = vadd.f32 %v15764_v48, %v14247_v60  ;;  %v14559_v33 = vadd.f32 %v15766_v19, %v14251_v31  ;;  %v14564_v22 = vadd.f32 %v15770_v1, %v15768_v9  ;;  %v14569_v45 = vadd.f32 %v15772_v6, %v15771_v37  ;;  %v15777_v48 = vld [vmem:[#allocation35_spill] sm:$0xff]  ;;  %v15779_v19 = vld [vmem:[#allocation77_spill] sm:$0xff]  ;;  %v15784_v6 = vld [vmem:[#allocation80_spill] sm:$0xff] }
 0x978   :  { %15760 = vst [vmem:[#allocation75_spill] sm:$0xff] %v14544_v10  ;;  %15762 = vst [vmem:[#allocation92_spill] sm:$0xff] %v14549_v24  ;;  %v15775_v24 = vld [vmem:[#allocation27_spill] sm:$0xff] }
 0x979   :  { %15765 = vst [vmem:[#allocation47_spill] sm:$0xff] %v14554_v28  ;;  %15767 = vst [vmem:[#allocation89_spill] sm:$0xff] %v14559_v33  ;;  %v15776_v10 = vunpack.c.l.bf16 %v15775_v24  ;;  %v15778_v16 = vunpack.c.h.bf16 %v15775_v24  ;;  %v15780_v33 = vld [vmem:[#allocation25_spill] sm:$0xff]  ;;  %v15782_v9 = vld [vmem:[#allocation51_spill] sm:$0xff]  ;;  %v7255_v24 = vmax.f32 %v14289_v13, 0.0  ;;  %v7266_v13 = vmax.f32 %v14344_v42, 0.0 }
 0x97a   :  { %15773 = vst [vmem:[#allocation96_spill] sm:$0xff] %v14569_v45  ;;  %v15781_v28 = vunpack.c.l.bf16 %v15780_v33  ;;  %v15783_v26 = vunpack.c.l.bf16 %v15782_v9  ;;  %v15785_v45 = vunpack.c.h.bf16 %v15782_v9  ;;  %v7257_v33 = vmax.f32 %v14299_v51, 0.0 }
 0x97b   :  { %v14574_v60 = vadd.f32 %v15776_v10, %v15774_v39  ;;  %v14579_v31 = vadd.f32 %v15778_v16, %v15777_v48  ;;  %v7254_v39 = vmax.f32 %v14284_v14, 0.0  ;;  %v7256_v48 = vmax.f32 %v14294_v47, 0.0  ;;  %7319 = vst [vmem:[#allocation11 + $0x8] sm:$0xff] %v7255_v24  ;;  %7330 = vst [vmem:[#allocation11 + $0x60] sm:$0xff] %v7266_v13 }
 0x97c   :  { %v14584_v1 = vadd.f32 %v15781_v28, %v15779_v19  ;;  %v14589_v37 = vadd.f32 %v15783_v26, %v14275_v57  ;;  %v14594_v10 = vadd.f32 %v15785_v45, %v15784_v6  ;;  %v7258_v28 = vmax.f32 %v14304_v55, 0.0  ;;  %7321 = vst [vmem:[#allocation11 + $0x18] sm:$0xff] %v7257_v33 }
 0x97d   :  { %v7259_v16 = vmax.f32 %v14309_v30, 0.0  ;;  %v7260_v57 = vmax.f32 %v14314_v15, 0.0  ;;  %v7261_v19 = vmax.f32 %v14319_v58, 0.0  ;;  %v7262_v9 = vmax.f32 %v14324_v17, 0.0  ;;  %7318 = vst [vmem:[#allocation11] sm:$0xff] %v7254_v39  ;;  %7320 = vst [vmem:[#allocation11 + $0x10] sm:$0xff] %v7256_v48 }
 0x97e   :  { %v7263_v45 = vmax.f32 %v14329_v43, 0.0  ;;  %v7264_v14 = vmax.f32 %v14334_v11, 0.0  ;;  %v7265_v47 = vmax.f32 %v14339_v25, 0.0  ;;  %v7267_v51 = vmax.f32 %v14349_v54, 0.0  ;;  %7322 = vst [vmem:[#allocation11 + $0x20] sm:$0xff] %v7258_v28 }
 0x97f   :  { %v7268_v55 = vmax.f32 %v14354_v23, 0.0  ;;  %7323 = vst [vmem:[#allocation11 + $0x28] sm:$0xff] %v7259_v16  ;;  %7324 = vst [vmem:[#allocation11 + $0x30] sm:$0xff] %v7260_v57  ;;  %v7269_v30 = vmax.f32 %v14359_v27, 0.0  ;;  %v7270_v15 = vmax.f32 %v14364_v8, 0.0  ;;  %v7271_v58 = vmax.f32 %v14369_v35, 0.0 }
 0x980   :  { %v7272_v17 = vmax.f32 %v14374_v53, 0.0  ;;  %7325 = vst [vmem:[#allocation11 + $0x38] sm:$0xff] %v7261_v19  ;;  %7326 = vst [vmem:[#allocation11 + $0x40] sm:$0xff] %v7262_v9  ;;  %v7273_v43 = vmax.f32 %v14379_v46, 0.0  ;;  %v7274_v11 = vmax.f32 %v14384_v50, 0.0  ;;  %v7275_v25 = vmax.f32 %v14389_v21, 0.0 }
 0x981   :  { %7327 = vst [vmem:[#allocation11 + $0x48] sm:$0xff] %v7263_v45  ;;  %7328 = vst [vmem:[#allocation11 + $0x50] sm:$0xff] %v7264_v14  ;;  %v7276_v42 = vmax.f32 %v14394_v5, 0.0  ;;  %v7277_v54 = vmax.f32 %v14399_v32, 0.0  ;;  %v7278_v23 = vmax.f32 %v14404_v3, 0.0  ;;  %v7279_v27 = vmax.f32 %v14409_v63, 0.0 }
 0x982   :  { %7329 = vst [vmem:[#allocation11 + $0x58] sm:$0xff] %v7265_v47  ;;  %7331 = vst [vmem:[#allocation11 + $0x68] sm:$0xff] %v7267_v51  ;;  %v7280_v8 = vmax.f32 %v14414_v38, 0.0  ;;  %v7281_v35 = vmax.f32 %v14419_v34, 0.0  ;;  %v7282_v53 = vmax.f32 %v14424_v40, 0.0  ;;  %v7283_v46 = vmax.f32 %v14429_v56, 0.0 }
 0x983   :  { %7332 = vst [vmem:[#allocation11 + $0x70] sm:$0xff] %v7268_v55  ;;  %7333 = vst [vmem:[#allocation11 + $0x78] sm:$0xff] %v7269_v30  ;;  %v7284_v50 = vmax.f32 %v14434_v44, 0.0  ;;  %v7285_v21 = vmax.f32 %v14439_v36, 0.0  ;;  %v7286_v5 = vmax.f32 %v14444_v41, 0.0  ;;  %v7287_v32 = vmax.f32 %v14449_v18, 0.0 }
 0x984   :  { %7334 = vst [vmem:[#allocation11 + $0x80] sm:$0xff] %v7270_v15  ;;  %7335 = vst [vmem:[#allocation11 + $0x88] sm:$0xff] %v7271_v58  ;;  %v7288_v3 = vmax.f32 %v14454_v2, 0.0  ;;  %v7289_v63 = vmax.f32 %v14459_v12, 0.0  ;;  %v7290_v38 = vmax.f32 %v14464_v29, 0.0  ;;  %v7291_v34 = vmax.f32 %v14469_v49, 0.0 }
 0x985   :  { %7336 = vst [vmem:[#allocation11 + $0x90] sm:$0xff] %v7272_v17  ;;  %7337 = vst [vmem:[#allocation11 + $0x98] sm:$0xff] %v7273_v43  ;;  %v7292_v40 = vmax.f32 %v14474_v52, 0.0  ;;  %v7293_v56 = vmax.f32 %v14479_v59, 0.0  ;;  %v15786_v44 = vld [vmem:[#allocation81_spill] sm:$0xff]  ;;  %v15787_v41 = vld [vmem:[#allocation84_spill] sm:$0xff] }
 0x986   :  { %7338 = vst [vmem:[#allocation11 + $0xa0] sm:$0xff] %v7274_v11  ;;  %7339 = vst [vmem:[#allocation11 + $0xa8] sm:$0xff] %v7275_v25  ;;  %v7294_v36 = vmax.f32 %v15786_v44, 0.0  ;;  %v7295_v18 = vmax.f32 %v15787_v41, 0.0  ;;  %v15788_v2 = vld [vmem:[#allocation85_spill] sm:$0xff]  ;;  %v15789_v12 = vld [vmem:[#allocation88_spill] sm:$0xff] }
 0x987   :  { %7340 = vst [vmem:[#allocation11 + $0xb0] sm:$0xff] %v7276_v42  ;;  %7341 = vst [vmem:[#allocation11 + $0xb8] sm:$0xff] %v7277_v54  ;;  %v7296_v26 = vmax.f32 %v15788_v2, 0.0  ;;  %v7297_v29 = vmax.f32 %v15789_v12, 0.0  ;;  %v7298_v49 = vmax.f32 %v14504_v62, 0.0  ;;  %v15790_v52 = vld [vmem:[#allocation93_spill] sm:$0xff] }
 0x988   :  { %7342 = vst [vmem:[#allocation11 + $0xc0] sm:$0xff] %v7278_v23  ;;  %7343 = vst [vmem:[#allocation11 + $0xc8] sm:$0xff] %v7279_v27  ;;  %v7299_v6 = vmax.f32 %v15790_v52, 0.0  ;;  %v7300_v39 = vmax.f32 %v14514_v0, 0.0  ;;  %v7301_v59 = vmax.f32 %v14519_v4, 0.0  ;;  %v7302_v24 = vmax.f32 %v14524_v7, 0.0 }
 0x989   :  { %7344 = vst [vmem:[#allocation11 + $0xd0] sm:$0xff] %v7280_v8  ;;  %7345 = vst [vmem:[#allocation11 + $0xd8] sm:$0xff] %v7281_v35  ;;  %v7303_v48 = vmax.f32 %v14529_v20, 0.0  ;;  %v7304_v33 = vmax.f32 %v14534_v61, 0.0  ;;  %v15791_v62 = vld [vmem:[#allocation52_spill] sm:$0xff]  ;;  %v15792_v28 = vld [vmem:[#allocation75_spill] sm:$0xff] }
 0x98a   :  { %7346 = vst [vmem:[#allocation11 + $0xe0] sm:$0xff] %v7282_v53  ;;  %7347 = vst [vmem:[#allocation11 + $0xe8] sm:$0xff] %v7283_v46  ;;  %v7305_v0 = vmax.f32 %v15791_v62, 0.0  ;;  %v7306_v16 = vmax.f32 %v15792_v28, 0.0  ;;  %v15793_v57 = vld [vmem:[#allocation92_spill] sm:$0xff]  ;;  %v15794_v9 = vld [vmem:[#allocation47_spill] sm:$0xff] }
 0x98b   :  { %7348 = vst [vmem:[#allocation11 + $0xf0] sm:$0xff] %v7284_v50  ;;  %7349 = vst [vmem:[#allocation11 + $0xf8] sm:$0xff] %v7285_v21  ;;  %v7307_v19 = vmax.f32 %v15793_v57, 0.0  ;;  %v7308_v45 = vmax.f32 %v15794_v9, 0.0  ;;  %v15795_v4 = vld [vmem:[#allocation89_spill] sm:$0xff]  ;;  %v7310_v20 = vmax.f32 %v14564_v22, 0.0 }
 0x98c   :  { %7350 = vst [vmem:[#allocation11 + $0x100] sm:$0xff] %v7286_v5  ;;  %7351 = vst [vmem:[#allocation11 + $0x108] sm:$0xff] %v7287_v32  ;;  %v7309_v7 = vmax.f32 %v15795_v4, 0.0  ;;  %v15796_v61 = vld [vmem:[#allocation96_spill] sm:$0xff]  ;;  %v7312_v47 = vmax.f32 %v14574_v60, 0.0  ;;  %v7313_v13 = vmax.f32 %v14579_v31, 0.0 }
 0x98d   :  { %7352 = vst [vmem:[#allocation11 + $0x110] sm:$0xff] %v7288_v3  ;;  %7353 = vst [vmem:[#allocation11 + $0x118] sm:$0xff] %v7289_v63  ;;  %v7311_v14 = vmax.f32 %v15796_v61, 0.0  ;;  %v7314_v51 = vmax.f32 %v14584_v1, 0.0  ;;  %v7316_v55 = vmax.f32 %v14589_v37, 0.0  ;;  %v7317_v22 = vmax.f32 %v14594_v10, 0.0 }
 0x98e   :  { %7354 = vst [vmem:[#allocation11 + $0x120] sm:$0xff] %v7290_v38  ;;  %7355 = vst [vmem:[#allocation11 + $0x128] sm:$0xff] %v7291_v34 }
 0x98f   :  { %7356 = vst [vmem:[#allocation11 + $0x130] sm:$0xff] %v7292_v40  ;;  %7357 = vst [vmem:[#allocation11 + $0x138] sm:$0xff] %v7293_v56 }
 0x990   :  { %7358 = vst [vmem:[#allocation11 + $0x140] sm:$0xff] %v7294_v36  ;;  %7359 = vst [vmem:[#allocation11 + $0x148] sm:$0xff] %v7295_v18 }
 0x991   :  { %7360 = vst [vmem:[#allocation11 + $0x150] sm:$0xff] %v7296_v26  ;;  %7361 = vst [vmem:[#allocation11 + $0x158] sm:$0xff] %v7297_v29 }
 0x992   :  { %7362 = vst [vmem:[#allocation11 + $0x160] sm:$0xff] %v7298_v49  ;;  %7363 = vst [vmem:[#allocation11 + $0x168] sm:$0xff] %v7299_v6 }
 0x993   :  { %7364 = vst [vmem:[#allocation11 + $0x170] sm:$0xff] %v7300_v39  ;;  %7365 = vst [vmem:[#allocation11 + $0x178] sm:$0xff] %v7301_v59 }
 0x994   :  { %7366 = vst [vmem:[#allocation11 + $0x180] sm:$0xff] %v7302_v24  ;;  %7367 = vst [vmem:[#allocation11 + $0x188] sm:$0xff] %v7303_v48 }
 0x995   :  { %7368 = vst [vmem:[#allocation11 + $0x190] sm:$0xff] %v7304_v33  ;;  %7369 = vst [vmem:[#allocation11 + $0x198] sm:$0xff] %v7305_v0 }
 0x996   :  { %7370 = vst [vmem:[#allocation11 + $0x1a0] sm:$0xff] %v7306_v16  ;;  %7371 = vst [vmem:[#allocation11 + $0x1a8] sm:$0xff] %v7307_v19 }
 0x997   :  { %7372 = vst [vmem:[#allocation11 + $0x1b0] sm:$0xff] %v7308_v45  ;;  %7373 = vst [vmem:[#allocation11 + $0x1b8] sm:$0xff] %v7309_v7 }
 0x998   :  { %7374 = vst [vmem:[#allocation11 + $0x1c0] sm:$0xff] %v7310_v20  ;;  %7375 = vst [vmem:[#allocation11 + $0x1c8] sm:$0xff] %v7311_v14 }
 0x999   :  { %7376 = vst [vmem:[#allocation11 + $0x1d0] sm:$0xff] %v7312_v47  ;;  %7377 = vst [vmem:[#allocation11 + $0x1d8] sm:$0xff] %v7313_v13 }
 0x99a   :  { %7378 = vst [vmem:[#allocation11 + $0x1e0] sm:$0xff] %v7314_v51  ;;  %7380 = vst [vmem:[#allocation11 + $0x1f0] sm:$0xff] %v7316_v55 }
 0x99b   :  { %7381 = vst [vmem:[#allocation11 + $0x1f8] sm:$0xff] %v7317_v22 }
 0x99c   :  { %9680 = shalt.err (!%p9677_p8)
}
 0x99d   :  { %s9681_s0 = scalar_lea.hbm %s14688_s10, 8192 }
 0x99e   :  { %p9682_p9 = scmp.ne.s32.totalorder %s14688_s10, %s9681_s0  ;;  %p9685_p10 = scmp.lt.u32.totalorder %s9681_s0, %s14688_s10 }
 0x9a0   :  { %p9687_p11 = pnand %p9685_p10, %p9682_p9 }
 0x9a2   :  { %9690 = shalt.err (!%p9687_p11)
}
 0x9a3   :  { %s9708_s17 = smov 128   ;;  %s9709_s18 = smov 8  }
 0x9a4   :  { %7393 = dma.vmem_to_hbm [thread:$0]  %s14655_s28, 8192, %s14688_s10, [#allocation5], %s9708_s17, %s9708_s17, %s9709_s18  }
 0x9a5   :  { %9697 = dma.done.wait [#allocation5], 8192  }
 0x9a6   :  { %9698 = vsyncadd [#allocation5], 4294959104 }
 0x9a7   :  { %7397 = vsyncpa [#allocation4], 1 }
 0x9a8   :  { %7398 = vsyncpa [#allocation7], 1 }
 0x9a9   :  { %7399 = vsyncpa [#allocation10], 1 }
 0x9aa   :  { %7400 = vsyncpa [#allocation5], 1 }

</bundles_post_ra>
